<compile_context>
chip_gen: v7x
topology: tpu7x:2x2x1
jax: 0.10.0
libtpu: 0.0.40
codegen_flags: <defaults>
</compile_context>

<pallas_src>
import functools

import jax
import jax.numpy as jnp
from jax.experimental import pallas as pl
from jax.experimental.pallas import tpu as pltpu

NEG_SLOPE = 0.01                 # nn.LeakyReLU default
MATMUL_DTYPE = jnp.bfloat16      # MXU operand dtype; accumulation stays f32


# ----------------------------------------------------------------------------
# small helpers
# ----------------------------------------------------------------------------
_TM_CANDIDATES = (512, 256, 128, 64, 32, 16)


def _pick_tile(m):
    """Largest row tile that divides m (avoids pad-M + slice-M HBM copies)."""
    for t in _TM_CANDIDATES:
        if m % t == 0:
            return t
    return None


def _largest_divisor(n, cap):
    cap = max(1, min(n, cap))
    for t in range(cap, 0, -1):
        if n % t == 0:
            return t
    return 1


def _leaky(v):
    return jnp.where(v >= 0, v, NEG_SLOPE * v)


# ----------------------------------------------------------------------------
# Pallas kernels
# ----------------------------------------------------------------------------
def _matmul_lrelu_kernel(x_ref, w_ref, o_ref):
    """One M-tile of leaky_relu(patches @ weights); bf16 in, f32 accum/out."""
    acc = jnp.dot(x_ref[...], w_ref[...], preferred_element_type=jnp.float32)
    o_ref[...] = _leaky(acc).astype(o_ref.dtype)


def _glconv_sum_kernel(gp_ref, wg_ref, lp_ref, wl_ref, o_ref):
    """GLConv fm_sign=False: leaky(gp@wg) + leaky(lp@wl) fused in one kernel."""
    g = jnp.dot(gp_ref[...], wg_ref[...], preferred_element_type=jnp.float32)
    l = jnp.dot(lp_ref[...], wl_ref[...], preferred_element_type=jnp.float32)
    o_ref[...] = (_leaky(g) + _leaky(l)).astype(o_ref.dtype)


def _glconv_cat_kernel(gp_ref, wg_ref, lp_ref, wl_ref, og_ref, ol_ref):
    """GLConv fm_sign=True: both branches from one call (concat done in XLA)."""
    g = jnp.dot(gp_ref[...], wg_ref[...], preferred_element_type=jnp.float32)
    l = jnp.dot(lp_ref[...], wl_ref[...], preferred_element_type=jnp.float32)
    og_ref[...] = _leaky(g).astype(og_ref.dtype)
    ol_ref[...] = _leaky(l).astype(ol_ref.dtype)


def pallas_matmul_lrelu(patches, w_mat):
    """leaky_relu(patches @ w_mat).  patches:[M,K], w_mat:[K,N] -> f32 [M,N]."""
    M, K = patches.shape
    K2, N = w_mat.shape
    assert K == K2
    tm = _pick_tile(M)
    m_pad = M
    if tm is None:  # ragged fallback; never hit for the shapes in this script
        tm = 128
        m_pad = ((M + tm - 1) // tm) * tm
        patches = jnp.pad(patches, ((0, m_pad - M), (0, 0)))

    out = pl.pallas_call(
        _matmul_lrelu_kernel,
        out_shape=jax.ShapeDtypeStruct((m_pad, N), jnp.float32),
        grid=(m_pad // tm,),
        in_specs=[
            pl.BlockSpec((tm, K), lambda i: (i, 0)),
            pl.BlockSpec((K, N), lambda i: (0, 0)),
        ],
        out_specs=pl.BlockSpec((tm, N), lambda i: (i, 0)),
        compiler_params=pltpu.CompilerParams(
            dimension_semantics=("parallel",)),
    )(patches, w_mat)
    return out if m_pad == M else out[:M]


def pallas_glconv(gp, wg, lp, wl, fm_sign):
    """Fused GLConv3d core.

    gp/lp: [M, K] bf16 im2col patches (global / local, identical row order).
    wg/wl: [K, N] bf16 weight matrices.
    fm_sign=False -> f32 [M, N] = leaky(gp@wg) + leaky(lp@wl)
    fm_sign=True  -> (f32 [M, N], f32 [M, N]) = (leaky(gp@wg), leaky(lp@wl))
    """
    M, Kg = gp.shape
    Ml, Kl = lp.shape
    assert M == Ml
    N = wg.shape[1]
    assert wl.shape[1] == N

    tm = _pick_tile(M)
    m_pad = M
    if tm is None:  # ragged fallback; never hit for the shapes in this script
        tm = 128
        m_pad = ((M + tm - 1) // tm) * tm
        gp = jnp.pad(gp, ((0, m_pad - M), (0, 0)))
        lp = jnp.pad(lp, ((0, m_pad - M), (0, 0)))

    in_specs = [
        pl.BlockSpec((tm, Kg), lambda i: (i, 0)),
        pl.BlockSpec((Kg, N), lambda i: (0, 0)),
        pl.BlockSpec((tm, Kl), lambda i: (i, 0)),
        pl.BlockSpec((Kl, N), lambda i: (0, 0)),
    ]
    grid = (m_pad // tm,)
    cparams = pltpu.CompilerParams(dimension_semantics=("parallel",))

    if fm_sign:
        g, l = pl.pallas_call(
            _glconv_cat_kernel,
            out_shape=(jax.ShapeDtypeStruct((m_pad, N), jnp.float32),
                       jax.ShapeDtypeStruct((m_pad, N), jnp.float32)),
            grid=grid,
            in_specs=in_specs,
            out_specs=(pl.BlockSpec((tm, N), lambda i: (i, 0)),
                       pl.BlockSpec((tm, N), lambda i: (i, 0))),
            compiler_params=cparams,
        )(gp, wg, lp, wl)
        if m_pad != M:
            g, l = g[:M], l[:M]
        return g, l

    out = pl.pallas_call(
        _glconv_sum_kernel,
        out_shape=jax.ShapeDtypeStruct((m_pad, N), jnp.float32),
        grid=grid,
        in_specs=in_specs,
        out_specs=pl.BlockSpec((tm, N), lambda i: (i, 0)),
        compiler_params=cparams,
    )(gp, wg, lp, wl)
    return out if m_pad == M else out[:M]


def _pool_kernel(c, x_ref, o_ref):
    """2x2 spatial max on a [rt, 2, Wo, 2*C] tile (H pair, then W pair)."""
    v = x_ref[...]                                   # [rt, 2, Wo, 2*C]
    hmax = jnp.maximum(v[:, 0], v[:, 1])             # [rt, Wo, 2*C]
    o_ref[...] = jnp.maximum(hmax[..., :c], hmax[..., c:])   # [rt, Wo, C]


def pallas_maxpool_1_2_2_cl(x):
    """nn.MaxPool3d(kernel=(1,2,2), stride=(1,2,2)) on channels-last [B,T,H,W,C]."""
    B, T, H, W, C = x.shape
    Ho, Wo = H // 2, W // 2
    R = B * T * Ho
    # Pure row-major dim split/merge -> no data movement in XLA.
    xr = x.reshape(R, 2, Wo, 2 * C)
    row_bytes = 2 * Wo * 2 * C * x.dtype.itemsize
    rt = _largest_divisor(R, min(1024, max(1, (2 * 1024 * 1024) // row_bytes)))
    out = pl.pallas_call(
        functools.partial(_pool_kernel, C),
        out_shape=jax.ShapeDtypeStruct((R, Wo, C), x.dtype),
        grid=(R // rt,),
        in_specs=[pl.BlockSpec((rt, 2, Wo, 2 * C), lambda i: (i, 0, 0, 0))],
        out_specs=pl.BlockSpec((rt, Wo, C), lambda i: (i, 0, 0)),
        compiler_params=pltpu.CompilerParams(
            dimension_semantics=("parallel",)),
    )(xr)
    return out.reshape(B, T, Ho, Wo, C)


def _tmax_kernel(x_ref, o_ref):
    o_ref[...] = jnp.max(x_ref[...], axis=1, keepdims=True)


def pallas_temporal_max_cl(x):
    """torch.max(out, dim=T)[0].unsqueeze: [B,T,H,W,C] -> [B,1,H,W,C]."""
    B, T, H, W, C = x.shape
    L = H * W * C
    xr = x.reshape(B, T, L)
    row_bytes = T * L * x.dtype.itemsize
    gb = _largest_divisor(B, min(64, max(1, (2 * 1024 * 1024) // row_bytes)))
    out = pl.pallas_call(
        _tmax_kernel,
        out_shape=jax.ShapeDtypeStruct((B, 1, L), x.dtype),
        grid=(B // gb,),
        in_specs=[pl.BlockSpec((gb, T, L), lambda i: (i, 0, 0))],
        out_specs=pl.BlockSpec((gb, 1, L), lambda i: (i, 0, 0)),
        compiler_params=pltpu.CompilerParams(
            dimension_semantics=("parallel",)),
    )(xr)
    return out.reshape(B, 1, H, W, C)


# ----------------------------------------------------------------------------
# JAX glue: channels-last im2col (slicing / stacking only, no compute)
# ----------------------------------------------------------------------------
def _tap_windows(xp, ksize, stride, out_dims):
    """All kt*kh*kw shifted windows of a padded channels-last tensor."""
    kt, kh, kw = ksize
    st, sh, sw = stride
    To, Ho, Wo = out_dims
    wins = []
    for dt in range(kt):
        for dh in range(kh):
            for dw in range(kw):
                wins.append(
                    xp[:, dt:dt + To * st:st, dh:dh + Ho * sh:sh,
                       dw:dw + Wo * sw:sw, :])
    return wins


def _patches_cl(x, ksize, stride, padding):
    """im2col: [B,T,H,W,C] -> ([B*To*Ho*Wo, kvol*C] bf16, (To,Ho,Wo)).

    K ordering is (dt, dh, dw, c), matching _weight_matrix below.
    """
    # TODO(synk): replace the explicit kvol-times HBM patch expansion with
    # in-kernel halo-window patch formation (manual DMA) for a ~kvol x
    # reduction in conv input traffic.
    B, T, H, W, C = x.shape
    kt, kh, kw = ksize
    st, sh, sw = stride
    pt, ph, pw = padding
    xp = jnp.pad(x, ((0, 0), (pt, pt), (ph, ph), (pw, pw), (0, 0)))
    To = (T + 2 * pt - kt) // st + 1
    Ho = (H + 2 * ph - kh) // sh + 1
    Wo = (W + 2 * pw - kw) // sw + 1
    wins = [v.astype(MATMUL_DTYPE)
            for v in _tap_windows(xp, ksize, stride, (To, Ho, Wo))]
    p = jnp.stack(wins, axis=4)                       # [B, To, Ho, Wo, kvol, C]
    return p.reshape(B * To * Ho * Wo, kt * kh * kw * C), (To, Ho, Wo)


def _local_patches_cl(x, ksize, n_split):
    """Per-H-split im2col (stride 1, pad 1), with splits stacked back along H
    so the flattened row order matches the global conv output (fused combine)."""
    B, T, H, W, C = x.shape
    kt, kh, kw = ksize
    assert H % n_split == 0
    sh = H // n_split
    To = T + 2 - kt + 1
    Ho = sh + 2 - kh + 1
    Wo = W + 2 - kw + 1
    per_split = []
    for i in range(n_split):
        part = jnp.pad(x[:, :, i * sh:(i + 1) * sh, :, :],
                       ((0, 0), (1, 1), (1, 1), (1, 1), (0, 0)))
        per_split.append(_tap_windows(part, ksize, (1, 1, 1), (To, Ho, Wo)))
    kvol = kt * kh * kw
    wins = [
        jnp.concatenate([per_split[i][t] for i in range(n_split)],
                        axis=2).astype(MATMUL_DTYPE)
        for t in range(kvol)
    ]
    p = jnp.stack(wins, axis=4)                       # [B, To, H, Wo, kvol, C]
    Hout = n_split * Ho
    return p.reshape(B * To * Hout * Wo, kvol * C), (To, Hout, Wo)


def _weight_matrix(w):
    """PyTorch [Cout, Cin, kt, kh, kw] -> [kt*kh*kw*Cin, Cout] bf16 (K = (dt,dh,dw,c))."""
    Cout, Cin, kt, kh, kw = w.shape
    return (w.transpose(2, 3, 4, 1, 0)
            .reshape(kt * kh * kw * Cin, Cout)
            .astype(MATMUL_DTYPE))


# ----------------------------------------------------------------------------
# modules
# ----------------------------------------------------------------------------
def conv3d_lrelu_cl(x, w, stride, padding):
    """BasicConv3d: Conv3d(bias=False) + LeakyReLU, channels-last in/out."""
    B = x.shape[0]
    Cout = w.shape[0]
    patches, (To, Ho, Wo) = _patches_cl(x, w.shape[2:], stride, padding)
    y = pallas_matmul_lrelu(patches, _weight_matrix(w))
    return y.reshape(B, To, Ho, Wo, Cout)


def glconv3d_cl(x, w_glob, w_loc, halving, fm_sign):
    """GLConv3d: global conv + per-H-split local conv, fused in one pallas_call."""
    B = x.shape[0]
    Cout = w_glob.shape[0]
    n_split = 2 ** halving

    gp, (To, Ho, Wo) = _patches_cl(x, w_glob.shape[2:], (1, 1, 1), (1, 1, 1))
    lp, (To2, Hl, Wl) = _local_patches_cl(x, w_loc.shape[2:], n_split)
    assert (To, Ho, Wo) == (To2, Hl, Wl)

    wg = _weight_matrix(w_glob)
    wl = _weight_matrix(w_loc)

    if fm_sign:
        # leaky(cat([g, l], dim=H)) == cat([leaky(g), leaky(l)], dim=H)
        g, l = pallas_glconv(gp, wg, lp, wl, fm_sign=True)
        g = g.reshape(B, To, Ho, Wo, Cout)
        l = l.reshape(B, To, Ho, Wo, Cout)
        return jnp.concatenate([g, l], axis=2)

    # fm_sign=False: leaky(g) + leaky(l), fused inside one kernel (the local
    # patch row order matches the global conv's flatten order by construction).
    y = pallas_glconv(gp, wg, lp, wl, fm_sign=False)
    return y.reshape(B, To, Ho, Wo, Cout)


# ----------------------------------------------------------------------------
# GLNet
# ----------------------------------------------------------------------------
def init_params(key, set_channels):
    c0, c1, c2 = set_channels

    def w(k, co, ci, kt, kh, kw):
        return 0.1 * jax.random.normal(k, (co, ci, kt, kh, kw), jnp.float32)

    ks = jax.random.split(key, 8)
    return {
        "l1":   w(ks[0], c0, 1, 3, 3, 3),   # set_layer1: (3,3,3) s1 p1
        "l2":   w(ks[1], c0, c0, 3, 1, 1),  # set_layer2: (3,1,1) s(3,1,1) p0
        "l3_g": w(ks[2], c1, c0, 3, 3, 3),  # set_layer3 global
        "l3_l": w(ks[3], c1, c0, 3, 3, 3),  # set_layer3 local
        "l4_g": w(ks[4], c1, c1, 3, 3, 3),
        "l4_l": w(ks[5], c1, c1, 3, 3, 3),
        "l5_g": w(ks[6], c2, c1, 3, 3, 3),
        "l5_l": w(ks[7], c2, c1, 3, 3, 3),
    }


def glnet_forward(params, x):
    """x: [B, 1, T, H, W] (NCTHW) -> [B, C2, 1, H_out, W_out] (NCTHW)."""
    # channels-last conversion is free here (C == 1)
    out = jnp.transpose(x, (0, 2, 3, 4, 1))                      # [B,T,H,W,1]
    out = conv3d_lrelu_cl(out, params["l1"], (1, 1, 1), (1, 1, 1))
    out = conv3d_lrelu_cl(out, params["l2"], (3, 1, 1), (0, 0, 0))
    out = glconv3d_cl(out, params["l3_g"], params["l3_l"], halving=3, fm_sign=False)
    out = pallas_maxpool_1_2_2_cl(out)
    out = glconv3d_cl(out, params["l4_g"], params["l4_l"], halving=3, fm_sign=False)
    out = glconv3d_cl(out, params["l5_g"], params["l5_l"], halving=3, fm_sign=True)
    out = pallas_temporal_max_cl(out)                            # [B,1,H,W,C]
    return jnp.transpose(out, (0, 4, 1, 2, 3))                   # [B,C,1,H,W]


if __name__ == "__main__":
    key = jax.random.PRNGKey(0)
    kx, kp = jax.random.split(key)

    # B=2, Cin=1 (silhouette), T=6 (divisible by 3 for set_layer2),
    # H=W=16 (H divisible by 2**halving * pool = 16).
    x = jax.random.normal(kx, (2, 1, 6, 16, 16), jnp.float32)
    set_channels = (4, 8, 8)
    params = init_params(kp, set_channels)

    fwd = jax.jit(functools.partial(glnet_forward, params))
    out = fwd(x)
    jax.block_until_ready(out)

    # [B, C2, 1, H_pooled*2 (fm_sign concat), W_pooled] = [2, 8, 1, 16, 8]
    assert out.shape == (2, 8, 1, 16, 8), out.shape
    assert jnp.isfinite(out).all()
    print("KERNEL_OK")
</pallas_src>

<mosaic_0001>
module attributes {stable_mosaic.version = 11 : i64} {
  func.func @_matmul_lrelu_kernel(%arg0: i32, %arg1: memref<512x27xbf16, #tpu.memory_space<vmem>>, %arg2: memref<27x4xbf16, #tpu.memory_space<vmem>>, %arg3: memref<512x4xf32, #tpu.memory_space<vmem>>) attributes {dimension_semantics = [#tpu.dimension_semantics<parallel>], iteration_bounds = array<i64: 6>, scalar_prefetch = 0 : i64, scratch_operands = 0 : i64, tpu.core_type = #tpu.core_type<tc>, window_params = [{transform_indices = @transform_0, window_bounds = array<i64: 512, 27>}, {pipeline_mode = #tpu.pipeline_mode<synchronous>, transform_indices = @transform_1, window_bounds = array<i64: 27, 4>}, {transform_indices = @transform_2, window_bounds = array<i64: 512, 4>}]} {
    %c0 = arith.constant 0 : index
    %c0_0 = arith.constant 0 : index
    %0 = vector.load %arg1[%c0, %c0_0] : memref<512x27xbf16, #tpu.memory_space<vmem>>, vector<512x27xbf16>
    %c0_1 = arith.constant 0 : index
    %c0_2 = arith.constant 0 : index
    %1 = vector.load %arg2[%c0_1, %c0_2] : memref<27x4xbf16, #tpu.memory_space<vmem>>, vector<27x4xbf16>
    %cst = arith.constant dense<0.000000e+00> : vector<512x4xf32>
    %2 = tpu.matmul %0, %1, %cst {dimension_numbers = #tpu.dot_dimension_numbers<[1], [0], [0], [1], [0, 0, 1, 1], [], []>} : vector<512x27xbf16>, vector<27x4xbf16>, vector<512x4xf32> -> vector<512x4xf32>
    %cst_3 = arith.constant 0.000000e+00 : f32
    %3 = vector.broadcast %cst_3 : f32 to vector<512x4xf32>
    %4 = arith.cmpf oge, %2, %3 : vector<512x4xf32>
    %cst_4 = arith.constant 0.00999999977 : f32
    %5 = vector.broadcast %cst_4 : f32 to vector<512x4xf32>
    %6 = arith.mulf %5, %2 : vector<512x4xf32>
    %7 = arith.select %4, %2, %6 : vector<512x4xi1>, vector<512x4xf32>
    %c0_5 = arith.constant 0 : index
    %c0_6 = arith.constant 0 : index
    %8 = vector.load %arg3[%c0_5, %c0_6] : memref<512x4xf32, #tpu.memory_space<vmem>>, vector<512x4xf32>
    tpu.vector_store %arg3[%c0_5, %c0_6], %7 {strides = array<i32>} : memref<512x4xf32, #tpu.memory_space<vmem>>, vector<512x4xf32>,
    return
  }
  func.func @transform_0(%arg0: i32) -> (i32, i32) {
    %c0_i32 = arith.constant 0 : i32
    %c0_i32_0 = arith.constant 0 : i32
    return %arg0, %c0_i32 : i32, i32
  }
  func.func @transform_1(%arg0: i32) -> (i32, i32) {
    %c0_i32 = arith.constant 0 : i32
    %c0_i32_0 = arith.constant 0 : i32
    %c0_i32_1 = arith.constant 0 : i32
    return %c0_i32, %c0_i32_0 : i32, i32
  }
  func.func @transform_2(%arg0: i32) -> (i32, i32) {
    %c0_i32 = arith.constant 0 : i32
    %c0_i32_0 = arith.constant 0 : i32
    return %arg0, %c0_i32 : i32, i32
  }
}

module attributes {stable_mosaic.version = 11 : i64} {
  func.func @_matmul_lrelu_kernel(%arg0: i32, %arg1: memref<512x12xbf16, #tpu.memory_space<vmem>>, %arg2: memref<12x4xbf16, #tpu.memory_space<vmem>>, %arg3: memref<512x4xf32, #tpu.memory_space<vmem>>) attributes {dimension_semantics = [#tpu.dimension_semantics<parallel>], iteration_bounds = array<i64: 2>, scalar_prefetch = 0 : i64, scratch_operands = 0 : i64, tpu.core_type = #tpu.core_type<tc>, window_params = [{transform_indices = @transform_0, window_bounds = array<i64: 512, 12>}, {pipeline_mode = #tpu.pipeline_mode<synchronous>, transform_indices = @transform_1, window_bounds = array<i64: 12, 4>}, {transform_indices = @transform_2, window_bounds = array<i64: 512, 4>}]} {
    %c0 = arith.constant 0 : index
    %c0_0 = arith.constant 0 : index
    %0 = vector.load %arg1[%c0, %c0_0] : memref<512x12xbf16, #tpu.memory_space<vmem>>, vector<512x12xbf16>
    %c0_1 = arith.constant 0 : index
    %c0_2 = arith.constant 0 : index
    %1 = vector.load %arg2[%c0_1, %c0_2] : memref<12x4xbf16, #tpu.memory_space<vmem>>, vector<12x4xbf16>
    %cst = arith.constant dense<0.000000e+00> : vector<512x4xf32>
    %2 = tpu.matmul %0, %1, %cst {dimension_numbers = #tpu.dot_dimension_numbers<[1], [0], [0], [1], [0, 0, 1, 1], [], []>} : vector<512x12xbf16>, vector<12x4xbf16>, vector<512x4xf32> -> vector<512x4xf32>
    %cst_3 = arith.constant 0.000000e+00 : f32
    %3 = vector.broadcast %cst_3 : f32 to vector<512x4xf32>
    %4 = arith.cmpf oge, %2, %3 : vector<512x4xf32>
    %cst_4 = arith.constant 0.00999999977 : f32
    %5 = vector.broadcast %cst_4 : f32 to vector<512x4xf32>
    %6 = arith.mulf %5, %2 : vector<512x4xf32>
    %7 = arith.select %4, %2, %6 : vector<512x4xi1>, vector<512x4xf32>
    %c0_5 = arith.constant 0 : index
    %c0_6 = arith.constant 0 : index
    %8 = vector.load %arg3[%c0_5, %c0_6] : memref<512x4xf32, #tpu.memory_space<vmem>>, vector<512x4xf32>
    tpu.vector_store %arg3[%c0_5, %c0_6], %7 {strides = array<i32>} : memref<512x4xf32, #tpu.memory_space<vmem>>, vector<512x4xf32>,
    return
  }
  func.func @transform_0(%arg0: i32) -> (i32, i32) {
    %c0_i32 = arith.constant 0 : i32
    %c0_i32_0 = arith.constant 0 : i32
    return %arg0, %c0_i32 : i32, i32
  }
  func.func @transform_1(%arg0: i32) -> (i32, i32) {
    %c0_i32 = arith.constant 0 : i32
    %c0_i32_0 = arith.constant 0 : i32
    %c0_i32_1 = arith.constant 0 : i32
    return %c0_i32, %c0_i32_0 : i32, i32
  }
  func.func @transform_2(%arg0: i32) -> (i32, i32) {
    %c0_i32 = arith.constant 0 : i32
    %c0_i32_0 = arith.constant 0 : i32
    return %arg0, %c0_i32 : i32, i32
  }
}

module attributes {stable_mosaic.version = 11 : i64} {
  func.func @_glconv_sum_kernel(%arg0: i32, %arg1: memref<512x108xbf16, #tpu.memory_space<vmem>>, %arg2: memref<108x8xbf16, #tpu.memory_space<vmem>>, %arg3: memref<512x108xbf16, #tpu.memory_space<vmem>>, %arg4: memref<108x8xbf16, #tpu.memory_space<vmem>>, %arg5: memref<512x8xf32, #tpu.memory_space<vmem>>) attributes {dimension_semantics = [#tpu.dimension_semantics<parallel>], iteration_bounds = array<i64: 2>, scalar_prefetch = 0 : i64, scratch_operands = 0 : i64, tpu.core_type = #tpu.core_type<tc>, window_params = [{transform_indices = @transform_0, window_bounds = array<i64: 512, 108>}, {pipeline_mode = #tpu.pipeline_mode<synchronous>, transform_indices = @transform_1, window_bounds = array<i64: 108, 8>}, {transform_indices = @transform_2, window_bounds = array<i64: 512, 108>}, {pipeline_mode = #tpu.pipeline_mode<synchronous>, transform_indices = @transform_3, window_bounds = array<i64: 108, 8>}, {transform_indices = @transform_4, window_bounds = array<i64: 512, 8>}]} {
    %c0 = arith.constant 0 : index
    %c0_0 = arith.constant 0 : index
    %0 = vector.load %arg1[%c0, %c0_0] : memref<512x108xbf16, #tpu.memory_space<vmem>>, vector<512x108xbf16>
    %c0_1 = arith.constant 0 : index
    %c0_2 = arith.constant 0 : index
    %1 = vector.load %arg2[%c0_1, %c0_2] : memref<108x8xbf16, #tpu.memory_space<vmem>>, vector<108x8xbf16>
    %cst = arith.constant dense<0.000000e+00> : vector<512x8xf32>
    %2 = tpu.matmul %0, %1, %cst {dimension_numbers = #tpu.dot_dimension_numbers<[1], [0], [0], [1], [0, 0, 1, 1], [], []>} : vector<512x108xbf16>, vector<108x8xbf16>, vector<512x8xf32> -> vector<512x8xf32>
    %c0_3 = arith.constant 0 : index
    %c0_4 = arith.constant 0 : index
    %3 = vector.load %arg3[%c0_3, %c0_4] : memref<512x108xbf16, #tpu.memory_space<vmem>>, vector<512x108xbf16>
    %c0_5 = arith.constant 0 : index
    %c0_6 = arith.constant 0 : index
    %4 = vector.load %arg4[%c0_5, %c0_6] : memref<108x8xbf16, #tpu.memory_space<vmem>>, vector<108x8xbf16>
    %cst_7 = arith.constant dense<0.000000e+00> : vector<512x8xf32>
    %5 = tpu.matmul %3, %4, %cst_7 {dimension_numbers = #tpu.dot_dimension_numbers<[1], [0], [0], [1], [0, 0, 1, 1], [], []>} : vector<512x108xbf16>, vector<108x8xbf16>, vector<512x8xf32> -> vector<512x8xf32>
    %cst_8 = arith.constant 0.000000e+00 : f32
    %6 = vector.broadcast %cst_8 : f32 to vector<512x8xf32>
    %7 = arith.cmpf oge, %2, %6 : vector<512x8xf32>
    %cst_9 = arith.constant 0.00999999977 : f32
    %8 = vector.broadcast %cst_9 : f32 to vector<512x8xf32>
    %9 = arith.mulf %8, %2 : vector<512x8xf32>
    %10 = arith.select %7, %2, %9 : vector<512x8xi1>, vector<512x8xf32>
    %cst_10 = arith.constant 0.000000e+00 : f32
    %11 = vector.broadcast %cst_10 : f32 to vector<512x8xf32>
    %12 = arith.cmpf oge, %5, %11 : vector<512x8xf32>
    %cst_11 = arith.constant 0.00999999977 : f32
    %13 = vector.broadcast %cst_11 : f32 to vector<512x8xf32>
    %14 = arith.mulf %13, %5 : vector<512x8xf32>
    %15 = arith.select %12, %5, %14 : vector<512x8xi1>, vector<512x8xf32>
    %16 = arith.addf %10, %15 : vector<512x8xf32>
    %c0_12 = arith.constant 0 : index
    %c0_13 = arith.constant 0 : index
    %17 = vector.load %arg5[%c0_12, %c0_13] : memref<512x8xf32, #tpu.memory_space<vmem>>, vector<512x8xf32>
    tpu.vector_store %arg5[%c0_12, %c0_13], %16 {strides = array<i32>} : memref<512x8xf32, #tpu.memory_space<vmem>>, vector<512x8xf32>,
    return
  }
  func.func @transform_0(%arg0: i32) -> (i32, i32) {
    %c0_i32 = arith.constant 0 : i32
    %c0_i32_0 = arith.constant 0 : i32
    return %arg0, %c0_i32 : i32, i32
  }
  func.func @transform_1(%arg0: i32) -> (i32, i32) {
    %c0_i32 = arith.constant 0 : i32
    %c0_i32_0 = arith.constant 0 : i32
    %c0_i32_1 = arith.constant 0 : i32
    return %c0_i32, %c0_i32_0 : i32, i32
  }
  func.func @transform_2(%arg0: i32) -> (i32, i32) {
    %c0_i32 = arith.constant 0 : i32
    %c0_i32_0 = arith.constant 0 : i32
    return %arg0, %c0_i32 : i32, i32
  }
  func.func @transform_3(%arg0: i32) -> (i32, i32) {
    %c0_i32 = arith.constant 0 : i32
    %c0_i32_0 = arith.constant 0 : i32
    %c0_i32_1 = arith.constant 0 : i32
    return %c0_i32, %c0_i32_0 : i32, i32
  }
  func.func @transform_4(%arg0: i32) -> (i32, i32) {
    %c0_i32 = arith.constant 0 : i32
    %c0_i32_0 = arith.constant 0 : i32
    return %arg0, %c0_i32 : i32, i32
  }
}

module attributes {stable_mosaic.version = 11 : i64} {
  func.func @_pool_kernel(%arg0: i32, %arg1: memref<32x2x8x16xf32, #tpu.memory_space<vmem>>, %arg2: memref<32x8x8xf32, #tpu.memory_space<vmem>>) attributes {dimension_semantics = [#tpu.dimension_semantics<parallel>], iteration_bounds = array<i64: 1>, scalar_prefetch = 0 : i64, scratch_operands = 0 : i64, tpu.core_type = #tpu.core_type<tc>, window_params = [{transform_indices = @transform_0, window_bounds = array<i64: 32, 2, 8, 16>}, {transform_indices = @transform_1, window_bounds = array<i64: 32, 8, 8>}]} {
    %c0 = arith.constant 0 : index
    %c0_0 = arith.constant 0 : index
    %c0_1 = arith.constant 0 : index
    %c0_2 = arith.constant 0 : index
    %0 = vector.load %arg1[%c0, %c0_0, %c0_1, %c0_2] : memref<32x2x8x16xf32, #tpu.memory_space<vmem>>, vector<32x2x8x16xf32>
    %1 = vector.extract_strided_slice %0 {offsets = [0, 0, 0, 0], sizes = [32, 1, 8, 16], strides = [1, 1, 1, 1]} : vector<32x2x8x16xf32> to vector<32x1x8x16xf32>
    %2 = vector.shape_cast %1 : vector<32x1x8x16xf32> to vector<32x8x16xf32>
    %3 = vector.extract_strided_slice %0 {offsets = [0, 1, 0, 0], sizes = [32, 1, 8, 16], strides = [1, 1, 1, 1]} : vector<32x2x8x16xf32> to vector<32x1x8x16xf32>
    %4 = vector.shape_cast %3 : vector<32x1x8x16xf32> to vector<32x8x16xf32>
    %5 = arith.maximumf %2, %4 : vector<32x8x16xf32>
    %6 = vector.extract_strided_slice %5 {offsets = [0, 0, 0], sizes = [32, 8, 8], strides = [1, 1, 1]} : vector<32x8x16xf32> to vector<32x8x8xf32>
    %7 = vector.extract_strided_slice %5 {offsets = [0, 0, 8], sizes = [32, 8, 8], strides = [1, 1, 1]} : vector<32x8x16xf32> to vector<32x8x8xf32>
    %8 = arith.maximumf %6, %7 : vector<32x8x8xf32>
    %c0_3 = arith.constant 0 : index
    %c0_4 = arith.constant 0 : index
    %c0_5 = arith.constant 0 : index
    %9 = vector.load %arg2[%c0_3, %c0_4, %c0_5] : memref<32x8x8xf32, #tpu.memory_space<vmem>>, vector<32x8x8xf32>
    tpu.vector_store %arg2[%c0_3, %c0_4, %c0_5], %8 {strides = array<i32>} : memref<32x8x8xf32, #tpu.memory_space<vmem>>, vector<32x8x8xf32>,
    return
  }
  func.func @transform_0(%arg0: i32) -> (i32, i32, i32, i32) {
    %c0_i32 = arith.constant 0 : i32
    %c0_i32_0 = arith.constant 0 : i32
    %c0_i32_1 = arith.constant 0 : i32
    %c0_i32_2 = arith.constant 0 : i32
    return %arg0, %c0_i32, %c0_i32_0, %c0_i32_1 : i32, i32, i32, i32
  }
  func.func @transform_1(%arg0: i32) -> (i32, i32, i32) {
    %c0_i32 = arith.constant 0 : i32
    %c0_i32_0 = arith.constant 0 : i32
    %c0_i32_1 = arith.constant 0 : i32
    return %arg0, %c0_i32, %c0_i32_0 : i32, i32, i32
  }
}

module attributes {stable_mosaic.version = 11 : i64} {
  func.func @_glconv_sum_kernel(%arg0: i32, %arg1: memref<256x216xbf16, #tpu.memory_space<vmem>>, %arg2: memref<216x8xbf16, #tpu.memory_space<vmem>>, %arg3: memref<256x216xbf16, #tpu.memory_space<vmem>>, %arg4: memref<216x8xbf16, #tpu.memory_space<vmem>>, %arg5: memref<256x8xf32, #tpu.memory_space<vmem>>) attributes {dimension_semantics = [#tpu.dimension_semantics<parallel>], iteration_bounds = array<i64: 1>, scalar_prefetch = 0 : i64, scratch_operands = 0 : i64, tpu.core_type = #tpu.core_type<tc>, window_params = [{transform_indices = @transform_0, window_bounds = array<i64: 256, 216>}, {pipeline_mode = #tpu.pipeline_mode<synchronous>, transform_indices = @transform_1, window_bounds = array<i64: 216, 8>}, {transform_indices = @transform_2, window_bounds = array<i64: 256, 216>}, {pipeline_mode = #tpu.pipeline_mode<synchronous>, transform_indices = @transform_3, window_bounds = array<i64: 216, 8>}, {transform_indices = @transform_4, window_bounds = array<i64: 256, 8>}]} {
    %c0 = arith.constant 0 : index
    %c0_0 = arith.constant 0 : index
    %0 = vector.load %arg1[%c0, %c0_0] : memref<256x216xbf16, #tpu.memory_space<vmem>>, vector<256x216xbf16>
    %c0_1 = arith.constant 0 : index
    %c0_2 = arith.constant 0 : index
    %1 = vector.load %arg2[%c0_1, %c0_2] : memref<216x8xbf16, #tpu.memory_space<vmem>>, vector<216x8xbf16>
    %cst = arith.constant dense<0.000000e+00> : vector<256x8xf32>
    %2 = tpu.matmul %0, %1, %cst {dimension_numbers = #tpu.dot_dimension_numbers<[1], [0], [0], [1], [0, 0, 1, 1], [], []>} : vector<256x216xbf16>, vector<216x8xbf16>, vector<256x8xf32> -> vector<256x8xf32>
    %c0_3 = arith.constant 0 : index
    %c0_4 = arith.constant 0 : index
    %3 = vector.load %arg3[%c0_3, %c0_4] : memref<256x216xbf16, #tpu.memory_space<vmem>>, vector<256x216xbf16>
    %c0_5 = arith.constant 0 : index
    %c0_6 = arith.constant 0 : index
    %4 = vector.load %arg4[%c0_5, %c0_6] : memref<216x8xbf16, #tpu.memory_space<vmem>>, vector<216x8xbf16>
    %cst_7 = arith.constant dense<0.000000e+00> : vector<256x8xf32>
    %5 = tpu.matmul %3, %4, %cst_7 {dimension_numbers = #tpu.dot_dimension_numbers<[1], [0], [0], [1], [0, 0, 1, 1], [], []>} : vector<256x216xbf16>, vector<216x8xbf16>, vector<256x8xf32> -> vector<256x8xf32>
    %cst_8 = arith.constant 0.000000e+00 : f32
    %6 = vector.broadcast %cst_8 : f32 to vector<256x8xf32>
    %7 = arith.cmpf oge, %2, %6 : vector<256x8xf32>
    %cst_9 = arith.constant 0.00999999977 : f32
    %8 = vector.broadcast %cst_9 : f32 to vector<256x8xf32>
    %9 = arith.mulf %8, %2 : vector<256x8xf32>
    %10 = arith.select %7, %2, %9 : vector<256x8xi1>, vector<256x8xf32>
    %cst_10 = arith.constant 0.000000e+00 : f32
    %11 = vector.broadcast %cst_10 : f32 to vector<256x8xf32>
    %12 = arith.cmpf oge, %5, %11 : vector<256x8xf32>
    %cst_11 = arith.constant 0.00999999977 : f32
    %13 = vector.broadcast %cst_11 : f32 to vector<256x8xf32>
    %14 = arith.mulf %13, %5 : vector<256x8xf32>
    %15 = arith.select %12, %5, %14 : vector<256x8xi1>, vector<256x8xf32>
    %16 = arith.addf %10, %15 : vector<256x8xf32>
    %c0_12 = arith.constant 0 : index
    %c0_13 = arith.constant 0 : index
    %17 = vector.load %arg5[%c0_12, %c0_13] : memref<256x8xf32, #tpu.memory_space<vmem>>, vector<256x8xf32>
    tpu.vector_store %arg5[%c0_12, %c0_13], %16 {strides = array<i32>} : memref<256x8xf32, #tpu.memory_space<vmem>>, vector<256x8xf32>,
    return
  }
  func.func @transform_0(%arg0: i32) -> (i32, i32) {
    %c0_i32 = arith.constant 0 : i32
    %c0_i32_0 = arith.constant 0 : i32
    return %arg0, %c0_i32 : i32, i32
  }
  func.func @transform_1(%arg0: i32) -> (i32, i32) {
    %c0_i32 = arith.constant 0 : i32
    %c0_i32_0 = arith.constant 0 : i32
    %c0_i32_1 = arith.constant 0 : i32
    return %c0_i32, %c0_i32_0 : i32, i32
  }
  func.func @transform_2(%arg0: i32) -> (i32, i32) {
    %c0_i32 = arith.constant 0 : i32
    %c0_i32_0 = arith.constant 0 : i32
    return %arg0, %c0_i32 : i32, i32
  }
  func.func @transform_3(%arg0: i32) -> (i32, i32) {
    %c0_i32 = arith.constant 0 : i32
    %c0_i32_0 = arith.constant 0 : i32
    %c0_i32_1 = arith.constant 0 : i32
    return %c0_i32, %c0_i32_0 : i32, i32
  }
  func.func @transform_4(%arg0: i32) -> (i32, i32) {
    %c0_i32 = arith.constant 0 : i32
    %c0_i32_0 = arith.constant 0 : i32
    return %arg0, %c0_i32 : i32, i32
  }
}

module attributes {stable_mosaic.version = 11 : i64} {
  func.func @_glconv_cat_kernel(%arg0: i32, %arg1: memref<256x216xbf16, #tpu.memory_space<vmem>>, %arg2: memref<216x8xbf16, #tpu.memory_space<vmem>>, %arg3: memref<256x216xbf16, #tpu.memory_space<vmem>>, %arg4: memref<216x8xbf16, #tpu.memory_space<vmem>>, %arg5: memref<256x8xf32, #tpu.memory_space<vmem>>, %arg6: memref<256x8xf32, #tpu.memory_space<vmem>>) attributes {dimension_semantics = [#tpu.dimension_semantics<parallel>], iteration_bounds = array<i64: 1>, scalar_prefetch = 0 : i64, scratch_operands = 0 : i64, tpu.core_type = #tpu.core_type<tc>, window_params = [{transform_indices = @transform_0, window_bounds = array<i64: 256, 216>}, {pipeline_mode = #tpu.pipeline_mode<synchronous>, transform_indices = @transform_1, window_bounds = array<i64: 216, 8>}, {transform_indices = @transform_2, window_bounds = array<i64: 256, 216>}, {pipeline_mode = #tpu.pipeline_mode<synchronous>, transform_indices = @transform_3, window_bounds = array<i64: 216, 8>}, {transform_indices = @transform_4, window_bounds = array<i64: 256, 8>}, {transform_indices = @transform_5, window_bounds = array<i64: 256, 8>}]} {
    %c0 = arith.constant 0 : index
    %c0_0 = arith.constant 0 : index
    %0 = vector.load %arg1[%c0, %c0_0] : memref<256x216xbf16, #tpu.memory_space<vmem>>, vector<256x216xbf16>
    %c0_1 = arith.constant 0 : index
    %c0_2 = arith.constant 0 : index
    %1 = vector.load %arg2[%c0_1, %c0_2] : memref<216x8xbf16, #tpu.memory_space<vmem>>, vector<216x8xbf16>
    %cst = arith.constant dense<0.000000e+00> : vector<256x8xf32>
    %2 = tpu.matmul %0, %1, %cst {dimension_numbers = #tpu.dot_dimension_numbers<[1], [0], [0], [1], [0, 0, 1, 1], [], []>} : vector<256x216xbf16>, vector<216x8xbf16>, vector<256x8xf32> -> vector<256x8xf32>
    %c0_3 = arith.constant 0 : index
    %c0_4 = arith.constant 0 : index
    %3 = vector.load %arg3[%c0_3, %c0_4] : memref<256x216xbf16, #tpu.memory_space<vmem>>, vector<256x216xbf16>
    %c0_5 = arith.constant 0 : index
    %c0_6 = arith.constant 0 : index
    %4 = vector.load %arg4[%c0_5, %c0_6] : memref<216x8xbf16, #tpu.memory_space<vmem>>, vector<216x8xbf16>
    %cst_7 = arith.constant dense<0.000000e+00> : vector<256x8xf32>
    %5 = tpu.matmul %3, %4, %cst_7 {dimension_numbers = #tpu.dot_dimension_numbers<[1], [0], [0], [1], [0, 0, 1, 1], [], []>} : vector<256x216xbf16>, vector<216x8xbf16>, vector<256x8xf32> -> vector<256x8xf32>
    %cst_8 = arith.constant 0.000000e+00 : f32
    %6 = vector.broadcast %cst_8 : f32 to vector<256x8xf32>
    %7 = arith.cmpf oge, %2, %6 : vector<256x8xf32>
    %cst_9 = arith.constant 0.00999999977 : f32
    %8 = vector.broadcast %cst_9 : f32 to vector<256x8xf32>
    %9 = arith.mulf %8, %2 : vector<256x8xf32>
    %10 = arith.select %7, %2, %9 : vector<256x8xi1>, vector<256x8xf32>
    %c0_10 = arith.constant 0 : index
    %c0_11 = arith.constant 0 : index
    %11 = vector.load %arg5[%c0_10, %c0_11] : memref<256x8xf32, #tpu.memory_space<vmem>>, vector<256x8xf32>
    tpu.vector_store %arg5[%c0_10, %c0_11], %10 {strides = array<i32>} : memref<256x8xf32, #tpu.memory_space<vmem>>, vector<256x8xf32>,
    %cst_12 = arith.constant 0.000000e+00 : f32
    %12 = vector.broadcast %cst_12 : f32 to vector<256x8xf32>
    %13 = arith.cmpf oge, %5, %12 : vector<256x8xf32>
    %cst_13 = arith.constant 0.00999999977 : f32
    %14 = vector.broadcast %cst_13 : f32 to vector<256x8xf32>
    %15 = arith.mulf %14, %5 : vector<256x8xf32>
    %16 = arith.select %13, %5, %15 : vector<256x8xi1>, vector<256x8xf32>
    %c0_14 = arith.constant 0 : index
    %c0_15 = arith.constant 0 : index
    %17 = vector.load %arg6[%c0_14, %c0_15] : memref<256x8xf32, #tpu.memory_space<vmem>>, vector<256x8xf32>
    tpu.vector_store %arg6[%c0_14, %c0_15], %16 {strides = array<i32>} : memref<256x8xf32, #tpu.memory_space<vmem>>, vector<256x8xf32>,
    return
  }
  func.func @transform_0(%arg0: i32) -> (i32, i32) {
    %c0_i32 = arith.constant 0 : i32
    %c0_i32_0 = arith.constant 0 : i32
    return %arg0, %c0_i32 : i32, i32
  }
  func.func @transform_1(%arg0: i32) -> (i32, i32) {
    %c0_i32 = arith.constant 0 : i32
    %c0_i32_0 = arith.constant 0 : i32
    %c0_i32_1 = arith.constant 0 : i32
    return %c0_i32, %c0_i32_0 : i32, i32
  }
  func.func @transform_2(%arg0: i32) -> (i32, i32) {
    %c0_i32 = arith.constant 0 : i32
    %c0_i32_0 = arith.constant 0 : i32
    return %arg0, %c0_i32 : i32, i32
  }
  func.func @transform_3(%arg0: i32) -> (i32, i32) {
    %c0_i32 = arith.constant 0 : i32
    %c0_i32_0 = arith.constant 0 : i32
    %c0_i32_1 = arith.constant 0 : i32
    return %c0_i32, %c0_i32_0 : i32, i32
  }
  func.func @transform_4(%arg0: i32) -> (i32, i32) {
    %c0_i32 = arith.constant 0 : i32
    %c0_i32_0 = arith.constant 0 : i32
    return %arg0, %c0_i32 : i32, i32
  }
  func.func @transform_5(%arg0: i32) -> (i32, i32) {
    %c0_i32 = arith.constant 0 : i32
    %c0_i32_0 = arith.constant 0 : i32
    return %arg0, %c0_i32 : i32, i32
  }
}

module attributes {stable_mosaic.version = 11 : i64} {
  func.func @_tmax_kernel(%arg0: i32, %arg1: memref<2x2x1024xf32, #tpu.memory_space<vmem>>, %arg2: memref<2x1x1024xf32, #tpu.memory_space<vmem>>) attributes {dimension_semantics = [#tpu.dimension_semantics<parallel>], iteration_bounds = array<i64: 1>, scalar_prefetch = 0 : i64, scratch_operands = 0 : i64, tpu.core_type = #tpu.core_type<tc>, window_params = [{transform_indices = @transform_0, window_bounds = array<i64: 2, 2, 1024>}, {transform_indices = @transform_1, window_bounds = array<i64: 2, 1, 1024>}]} {
    %c0 = arith.constant 0 : index
    %c0_0 = arith.constant 0 : index
    %c0_1 = arith.constant 0 : index
    %0 = vector.load %arg1[%c0, %c0_0, %c0_1] : memref<2x2x1024xf32, #tpu.memory_space<vmem>>, vector<2x2x1024xf32>
    %cst = arith.constant dense<0xFF800000> : vector<2x1024xf32>
    %1 = vector.multi_reduction <maximumf>, %0, %cst [1] : vector<2x2x1024xf32> to vector<2x1024xf32>
    %2 = vector.shape_cast %1 : vector<2x1024xf32> to vector<2x1x1024xf32>
    %c0_2 = arith.constant 0 : index
    %c0_3 = arith.constant 0 : index
    %c0_4 = arith.constant 0 : index
    %3 = vector.load %arg2[%c0_2, %c0_3, %c0_4] : memref<2x1x1024xf32, #tpu.memory_space<vmem>>, vector<2x1x1024xf32>
    tpu.vector_store %arg2[%c0_2, %c0_3, %c0_4], %2 {strides = array<i32>} : memref<2x1x1024xf32, #tpu.memory_space<vmem>>, vector<2x1x1024xf32>,
    return
  }
  func.func @transform_0(%arg0: i32) -> (i32, i32, i32) {
    %c0_i32 = arith.constant 0 : i32
    %c0_i32_0 = arith.constant 0 : i32
    %c0_i32_1 = arith.constant 0 : i32
    return %arg0, %c0_i32, %c0_i32_0 : i32, i32, i32
  }
  func.func @transform_1(%arg0: i32) -> (i32, i32, i32) {
    %c0_i32 = arith.constant 0 : i32
    %c0_i32_0 = arith.constant 0 : i32
    %c0_i32_1 = arith.constant 0 : i32
    return %arg0, %c0_i32, %c0_i32_0 : i32, i32, i32
  }
}

</mosaic_0001>

<bundles_post_ra>
// kernel: glnet_forward.7
= control target key start
LH: loop header
LB: loop body
LE: loop exit
PB: predicated region body
PF: predicated region fallthrough
CT: control target
= control target key end

     0   :  { %s1343_s9 = smov 0   ;;  %s1566_s0 = inlined_call_operand.vmem [shape: bf16[3072,27], index: 0, kind: input, shape index: {}]   ;;  %s1567_s1 = inlined_call_operand.vmem [shape: bf16[27,4], index: 1, kind: input, shape index: {}]   ;;  %s1568_s2 = inlined_call_operand.vmem [shape: f32[3072,4], index: 2, kind: output, shape index: {}]  }
   0x1 LB: > { %s1093_s10 = sadd.s32 4294967295, %s1325_s9   ;;  %p1097_p0 = scmp.ge.s32.totalorder %s1325_s9, 1  ;;  %s1325_s9 = sphi %s1343_s9, %s12_s9  }
   0x2   : > { %p113_p1 = scmp.lt.s32.totalorder %s1325_s9, 7 }
   0x4   : > { %p114_p2 = pnand %p1097_p0, %p113_p1 }
   0x5   : > { %v1285_v0 = vld [vmem:[%s1567_s1] sm:$0xff] (!%p114_p2)   ;;  %vm484_vm0 = vcmask (!%p114_p2), 1044480   ;;  %v1286_v1 = vld [vmem:[%s1567_s1 + $0x8] sm:$0x3f] (!%p114_p2)   ;;  %vm485_vm1 = vcmask (!%p114_p2), 1045504   ;;  %s1098_s15 = sshll.u32 (!%p114_p2), %s1093_s10, 6 }
   0x6   : > { %117 = sbr.rel (%p114_p2) target bundleno = 296 (0x128), region = 28  ;;  %1204 = vmatprep.subr.bf16.mxu0 (!%p114_p2), %v1285_v0  ;;  %1272 = vmatprep.subr.bf16.mxu1 (!%p114_p2), %v1285_v0  ;;  %v1327_v2 = vmov (!%p114_p2), 65535   ;;  %p136_p3 = scmp.lt.s32.totalorder (!%p114_p2), %s1098_s15, 383  ;;  %vm387_vm2 = vcmask (!%p114_p2), 220160   ;;  %vm972_vm4 = vcmask (!%p114_p2), 31744  }
   0x7   : > { %1205 = vmatpush3.bf16.msra.mxu0 (!%p114_p2), %v1285_v0  ;;  %1274 = vmatpush3.bf16.msra.mxu1 (!%p114_p2), %v1285_v0  ;;  %v486_v3 = vsel (!%p114_p2), %vm484_vm0, 4294967295, %v1327_v2 }
   0x8   : > { %v487_v4 = vsel (!%p114_p2), %vm485_vm1, %v486_v3, 0 }
   0x9   : > { %v489_v5 = vand.u32 (!%p114_p2), %v1286_v1, %v487_v4 }
   0xb   : > { %1206 = vmatprep.subr.bf16.mxu0 (!%p114_p2), %v489_v5  ;;  %1273 = vmatprep.subr.bf16.mxu1 (!%p114_p2), %v489_v5 }
   0xc   : > { %1207 = vmatpush3.bf16.msra.mxu0 (!%p114_p2), %v489_v5  ;;  %1275 = vmatpush3.bf16.msra.mxu1 (!%p114_p2), %v489_v5 }
   0xd   : > { %s1570_s15 = smov (!%p136_p3, %s1098_s15), 383 }
   0xe   : > { %s1099_s16 = sshll.u32 %s1570_s15, 2  ;;  %s1101_s20 = sshll.u32 %s1570_s15, 3 }
   0xf   : > { %s1363_s19 = scalar_lea.vmem %s1566_s0, %s1099_s16  ;;  %s1433_s23 = scalar_lea.vmem %s1568_s2, %s1101_s20 }
  0x10   : > { %v1287_v6 = vld [vmem:[%s1363_s19] sm:$0xff]   ;;  %v1289_v8 = vld [vmem:[%s1363_s19 + $0x8] sm:$0xff]   ;;  %v1291_v10 = vld [vmem:[%s1363_s19 + $0x10] sm:$0xff]  }
  0x11   : > { %v1288_v7 = vld [vmem:[%s1363_s19 + $0x80] sm:$0xff]   ;;  %1208 = vmatprep.mubr.msk.bf16.mxu0 %vm387_vm2, %v1287_v6  ;;  %v1290_v9 = vld [vmem:[%s1363_s19 + $0x88] sm:$0xff]   ;;  %v1292_v11 = vld [vmem:[%s1363_s19 + $0x90] sm:$0xff]  }
  0x12   : > { %1240 = vmatprep.mubr.msk.bf16.mxu1 %vm387_vm2, %v1288_v7  ;;  %1209 = vmatmul.mubr.msk.bf16.vlgmr.msra.gmra.mrb[0].mxu0 %vm387_vm2, %v1289_v8  ;;  %v1293_v12 = vld [vmem:[%s1363_s19 + $0x18] sm:$0xff]   ;;  %v1295_v14 = vld [vmem:[%s1363_s19 + $0x20] sm:$0xff]   ;;  %v1297_v16 = vld [vmem:[%s1363_s19 + $0x28] sm:$0xff]  }
  0x13   : > { %1241 = vmatmul.mubr.msk.bf16.vlgmr.msra.gmra.mrb[0].mxu1 %vm387_vm2, %v1290_v9  ;;  %1212 = vmatprep.mubr.msk.bf16.mxu0 %vm387_vm2, %v1291_v10  ;;  %v1294_v13 = vld [vmem:[%s1363_s19 + $0x98] sm:$0xff]   ;;  %v1296_v15 = vld [vmem:[%s1363_s19 + $0xa0] sm:$0xff]   ;;  %v1298_v17 = vld [vmem:[%s1363_s19 + $0xa8] sm:$0xff]  }
  0x14   : > { %1244 = vmatprep.mubr.msk.bf16.mxu1 %vm387_vm2, %v1292_v11  ;;  %v1299_v18 = vld [vmem:[%s1363_s19 + $0x30] sm:$0xff]   ;;  %v1301_v20 = vld [vmem:[%s1363_s19 + $0x38] sm:$0xff]   ;;  %v1303_v22 = vld [vmem:[%s1363_s19 + $0x40] sm:$0xff]  }
  0x15   : > { %v1300_v19 = vld [vmem:[%s1363_s19 + $0xb0] sm:$0xff]   ;;  %v1302_v21 = vld [vmem:[%s1363_s19 + $0xb8] sm:$0xff]   ;;  %v1304_v23 = vld [vmem:[%s1363_s19 + $0xc0] sm:$0xff]  }
  0x16   : > { %v1305_v24 = vld [vmem:[%s1363_s19 + $0x48] sm:$0xff]   ;;  %v1307_v26 = vld [vmem:[%s1363_s19 + $0x50] sm:$0xff]   ;;  %v1309_v28 = vld [vmem:[%s1363_s19 + $0x58] sm:$0xff]  }
  0x17   : > { %v1306_v25 = vld [vmem:[%s1363_s19 + $0xc8] sm:$0xff]   ;;  %v1308_v27 = vld [vmem:[%s1363_s19 + $0xd0] sm:$0xff]   ;;  %v1310_v29 = vld [vmem:[%s1363_s19 + $0xd8] sm:$0xff]  }
  0x18   : > { %v1311_v30 = vld [vmem:[%s1363_s19 + $0x60] sm:$0xff]   ;;  %v1313_v32 = vld [vmem:[%s1363_s19 + $0x68] sm:$0xff]   ;;  %v1315_v34 = vld [vmem:[%s1363_s19 + $0x70] sm:$0xff]  }
  0x19   : > { %v1312_v31 = vld [vmem:[%s1363_s19 + $0xe0] sm:$0xff]   ;;  %v1314_v33 = vld [vmem:[%s1363_s19 + $0xe8] sm:$0xff]   ;;  %v1316_v35 = vld [vmem:[%s1363_s19 + $0xf0] sm:$0xff]  }
  0x1a   : > { %1213 = vmatmul.mubr.msk.bf16.gmra.mrb[4].mxu0 %vm387_vm2, %v1293_v12  ;;  %v1317_v36 = vld [vmem:[%s1363_s19 + $0x78] sm:$0xff]  }
  0x1b   : > { %1245 = vmatmul.mubr.msk.bf16.gmra.mrb[4].mxu1 %vm387_vm2, %v1294_v13  ;;  %1216 = vmatprep.mubr.msk.bf16.mxu0 %vm387_vm2, %v1295_v14  ;;  %v1318_v37 = vld [vmem:[%s1363_s19 + $0xf8] sm:$0xff]  }
  0x1c   : > { %1248 = vmatprep.mubr.msk.bf16.mxu1 %vm387_vm2, %v1296_v15 }
  0x22   : > { %1217 = vmatmul.mubr.msk.bf16.gmra.mrb[8].mxu0 %vm387_vm2, %v1297_v16 }
  0x23   : > { %1249 = vmatmul.mubr.msk.bf16.gmra.mrb[8].mxu1 %vm387_vm2, %v1298_v17  ;;  %1220 = vmatprep.mubr.msk.bf16.mxu0 %vm387_vm2, %v1299_v18 }
  0x24   : > { %1252 = vmatprep.mubr.msk.bf16.mxu1 %vm387_vm2, %v1300_v19 }
  0x2a   : > { %1221 = vmatmul.mubr.msk.bf16.gmra.mrb[12].mxu0 %vm387_vm2, %v1301_v20 }
  0x2b   : > { %1253 = vmatmul.mubr.msk.bf16.gmra.mrb[12].mxu1 %vm387_vm2, %v1302_v21  ;;  %1224 = vmatprep.mubr.msk.bf16.mxu0 %vm387_vm2, %v1303_v22 }
  0x2c   : > { %1256 = vmatprep.mubr.msk.bf16.mxu1 %vm387_vm2, %v1304_v23 }
  0x32   : > { %1225 = vmatmul.mubr.msk.bf16.gmra.mrb[16].mxu0 %vm387_vm2, %v1305_v24 }
  0x33   : > { %1257 = vmatmul.mubr.msk.bf16.gmra.mrb[16].mxu1 %vm387_vm2, %v1306_v25  ;;  %1228 = vmatprep.mubr.msk.bf16.mxu0 %vm387_vm2, %v1307_v26 }
  0x34   : > { %1260 = vmatprep.mubr.msk.bf16.mxu1 %vm387_vm2, %v1308_v27 }
  0x3a   : > { %1229 = vmatmul.mubr.msk.bf16.gmra.mrb[20].mxu0 %vm387_vm2, %v1309_v28 }
  0x3b   : > { %1261 = vmatmul.mubr.msk.bf16.gmra.mrb[20].mxu1 %vm387_vm2, %v1310_v29  ;;  %1232 = vmatprep.mubr.msk.bf16.mxu0 %vm387_vm2, %v1311_v30 }
  0x3c   : > { %1264 = vmatprep.mubr.msk.bf16.mxu1 %vm387_vm2, %v1312_v31 }
  0x42   : > { %1233 = vmatmul.mubr.msk.bf16.gmra.mrb[24].mxu0 %vm387_vm2, %v1313_v32 }
  0x43   : > { %1265 = vmatmul.mubr.msk.bf16.gmra.mrb[24].mxu1 %vm387_vm2, %v1314_v33  ;;  %1236 = vmatprep.mubr.msk.bf16.mxu0 %vm387_vm2, %v1315_v34 }
  0x44   : > { %1268 = vmatprep.mubr.msk.bf16.mxu1 %vm387_vm2, %v1316_v35 }
  0x4a   : > { %1237 = vmatmul.mubr.msk.bf16.gmra.mrb[28].mxu0 %vm387_vm2, %v1317_v36 }
  0x4b   : > { %1269 = vmatmul.mubr.msk.bf16.gmra.mrb[28].mxu1 %vm387_vm2, %v1318_v37 }
  0xe5   : > { %v1210_v38 = vpop.f32.mrb[0].mxu0 }
  0xe6   : > { %vm782_vm3 = vcmp.ge.f32.partialorder %v1210_v38, 0.0  ;;  %v846_v39 = vmul.f32 0.01, %v1210_v38  ;;  %v1242_v40 = vpop.f32.mrb[0].mxu1  ;;  %v525_v41 = vpop.f32.mrb[1].mxu0 }
  0xe7   : > { %vm814_vm5 = vcmp.ge.f32.partialorder %v1242_v40, 0.0  ;;  %v878_v42 = vmul.f32 0.01, %v1242_v40  ;;  %vm780_vm6 = vcmp.ge.f32.partialorder %v525_v41, 0.0  ;;  %v844_v43 = vmul.f32 0.01, %v525_v41 }
  0xe8   : > { %v910_v44 = vsel %vm782_vm3, %v1210_v38, %v846_v39  ;;  %v653_v45 = vpop.f32.mrb[1].mxu1  ;;  %v1211_v46 = vpop.f32.mrb[2].mxu0 }
  0xe9   : > { %975 = vst.msk [vmem:[%s1433_s23 + $0x10] sm:$0xff] %vm972_vm4, %v910_v44  ;;  %v942_v47 = vsel %vm814_vm5, %v1242_v40, %v878_v42  ;;  %v908_v48 = vsel %vm780_vm6, %v525_v41, %v844_v43  ;;  %vm812_vm7 = vcmp.ge.f32.partialorder %v653_v45, 0.0  ;;  %v876_v49 = vmul.f32 0.01, %v653_v45  ;;  %v1243_v50 = vpop.f32.mrb[2].mxu1  ;;  %v528_v51 = vpop.f32.mrb[3].mxu0 }
  0xea   : > { %1007 = vst.msk [vmem:[%s1433_s23 + $0x110] sm:$0xff] %vm972_vm4, %v942_v47  ;;  %973 = vst.msk [vmem:[%s1433_s23] sm:$0xff] %vm972_vm4, %v908_v48  ;;  %vm783_vm8 = vcmp.ge.f32.partialorder %v1211_v46, 0.0  ;;  %v847_v52 = vmul.f32 0.01, %v1211_v46  ;;  %vm815_vm9 = vcmp.ge.f32.partialorder %v1243_v50, 0.0 }
  0xeb   : > { %v879_v53 = vmul.f32 0.01, %v1243_v50  ;;  %v940_v54 = vsel %vm812_vm7, %v653_v45, %v876_v49  ;;  %vm781_vm10 = vcmp.ge.f32.partialorder %v528_v51, 0.0  ;;  %v845_v55 = vmul.f32 0.01, %v528_v51  ;;  %v656_v56 = vpop.f32.mrb[3].mxu1 }
  0xec   : > { %1005 = vst.msk [vmem:[%s1433_s23 + $0x100] sm:$0xff] %vm972_vm4, %v940_v54  ;;  %v911_v57 = vsel %vm783_vm8, %v1211_v46, %v847_v52  ;;  %vm813_vm11 = vcmp.ge.f32.partialorder %v656_v56, 0.0  ;;  %v877_v59 = vmul.f32 0.01, %v656_v56 }
  0xed   : > { %v943_v58 = vsel %vm815_vm9, %v1243_v50, %v879_v53  ;;  %976 = vst.msk [vmem:[%s1433_s23 + $0x18] sm:$0xff] %vm972_vm4, %v911_v57  ;;  %v909_v60 = vsel %vm781_vm10, %v528_v51, %v845_v55  ;;  %v1214_v61 = vpop.f32.mrb[4].mxu0 }
  0xee   : > { %1008 = vst.msk [vmem:[%s1433_s23 + $0x118] sm:$0xff] %vm972_vm4, %v943_v58  ;;  %974 = vst.msk [vmem:[%s1433_s23 + $0x8] sm:$0xff] %vm972_vm4, %v909_v60  ;;  %v941_v62 = vsel %vm813_vm11, %v656_v56, %v877_v59  ;;  %vm786_vm12 = vcmp.ge.f32.partialorder %v1214_v61, 0.0  ;;  %v850_v63 = vmul.f32 0.01, %v1214_v61  ;;  %v1246_v0 = vpop.f32.mrb[4].mxu1 }
  0xef   : > { %v541_v1 = vpop.f32.mrb[5].mxu0  ;;  %1006 = vst.msk [vmem:[%s1433_s23 + $0x108] sm:$0xff] %vm972_vm4, %v941_v62  ;;  %vm818_vm13 = vcmp.ge.f32.partialorder %v1246_v0, 0.0  ;;  %v882_v2 = vmul.f32 0.01, %v1246_v0  ;;  %v669_v5 = vpop.f32.mrb[5].mxu1 }
  0xf0   : > { %vm784_vm14 = vcmp.ge.f32.partialorder %v541_v1, 0.0  ;;  %v848_v3 = vmul.f32 0.01, %v541_v1  ;;  %v914_v4 = vsel %vm786_vm12, %v1214_v61, %v850_v63  ;;  %v1215_v6 = vpop.f32.mrb[6].mxu0  ;;  %vm816_vm15 = vcmp.ge.f32.partialorder %v669_v5, 0.0  ;;  %v1247_v10 = vpop.f32.mrb[6].mxu1 }
  0xf1   : > { %979 = vst.msk [vmem:[%s1433_s23 + $0x30] sm:$0xff] %vm972_vm4, %v914_v4  ;;  %v946_v7 = vsel %vm818_vm13, %v1246_v0, %v882_v2  ;;  %v880_v9 = vmul.f32 0.01, %v669_v5  ;;  %v544_v11 = vpop.f32.mrb[7].mxu0  ;;  %vm787_vm0 = vcmp.ge.f32.partialorder %v1215_v6, 0.0  ;;  %vm819_vm1 = vcmp.ge.f32.partialorder %v1247_v10, 0.0 }
  0xf2   : > { %v912_v8 = vsel %vm784_vm14, %v541_v1, %v848_v3  ;;  %1011 = vst.msk [vmem:[%s1433_s23 + $0x130] sm:$0xff] %vm972_vm4, %v946_v7  ;;  %v851_v12 = vmul.f32 0.01, %v1215_v6  ;;  %v883_v13 = vmul.f32 0.01, %v1247_v10  ;;  %vm785_vm2 = vcmp.ge.f32.partialorder %v544_v11, 0.0 }
  0xf3   : > { %977 = vst.msk [vmem:[%s1433_s23 + $0x20] sm:$0xff] %vm972_vm4, %v912_v8  ;;  %v944_v14 = vsel %vm816_vm15, %v669_v5, %v880_v9  ;;  %v849_v15 = vmul.f32 0.01, %v544_v11  ;;  %v672_v16 = vpop.f32.mrb[7].mxu1 }
  0xf4   : > { %1009 = vst.msk [vmem:[%s1433_s23 + $0x120] sm:$0xff] %vm972_vm4, %v944_v14  ;;  %v915_v17 = vsel %vm787_vm0, %v1215_v6, %v851_v12  ;;  %v947_v18 = vsel %vm819_vm1, %v1247_v10, %v883_v13  ;;  %vm817_vm3 = vcmp.ge.f32.partialorder %v672_v16, 0.0  ;;  %v881_v19 = vmul.f32 0.01, %v672_v16 }
  0xf5   : > { %980 = vst.msk [vmem:[%s1433_s23 + $0x38] sm:$0xff] %vm972_vm4, %v915_v17  ;;  %1012 = vst.msk [vmem:[%s1433_s23 + $0x138] sm:$0xff] %vm972_vm4, %v947_v18  ;;  %v913_v20 = vsel %vm785_vm2, %v544_v11, %v849_v15  ;;  %v1218_v21 = vpop.f32.mrb[8].mxu0 }
  0xf6   : > { %978 = vst.msk [vmem:[%s1433_s23 + $0x28] sm:$0xff] %vm972_vm4, %v913_v20  ;;  %v945_v22 = vsel %vm817_vm3, %v672_v16, %v881_v19  ;;  %vm790_vm5 = vcmp.ge.f32.partialorder %v1218_v21, 0.0  ;;  %v854_v23 = vmul.f32 0.01, %v1218_v21  ;;  %v1250_v24 = vpop.f32.mrb[8].mxu1  ;;  %v557_v25 = vpop.f32.mrb[9].mxu0 }
  0xf7   : > { %1010 = vst.msk [vmem:[%s1433_s23 + $0x128] sm:$0xff] %vm972_vm4, %v945_v22  ;;  %vm822_vm6 = vcmp.ge.f32.partialorder %v1250_v24, 0.0  ;;  %v886_v26 = vmul.f32 0.01, %v1250_v24  ;;  %vm788_vm7 = vcmp.ge.f32.partialorder %v557_v25, 0.0  ;;  %v685_v29 = vpop.f32.mrb[9].mxu1 }
  0xf8   : > { %v852_v27 = vmul.f32 0.01, %v557_v25  ;;  %v918_v28 = vsel %vm790_vm5, %v1218_v21, %v854_v23  ;;  %v1219_v30 = vpop.f32.mrb[10].mxu0  ;;  %vm820_vm8 = vcmp.ge.f32.partialorder %v685_v29, 0.0  ;;  %v884_v33 = vmul.f32 0.01, %v685_v29 }
  0xf9   : > { %983 = vst.msk [vmem:[%s1433_s23 + $0x50] sm:$0xff] %vm972_vm4, %v918_v28  ;;  %v950_v31 = vsel %vm822_vm6, %v1250_v24, %v886_v26  ;;  %v1251_v34 = vpop.f32.mrb[10].mxu1  ;;  %v560_v35 = vpop.f32.mrb[11].mxu0  ;;  %vm791_vm9 = vcmp.ge.f32.partialorder %v1219_v30, 0.0  ;;  %v855_v36 = vmul.f32 0.01, %v1219_v30 }
  0xfa   : > { %v916_v32 = vsel %vm788_vm7, %v557_v25, %v852_v27  ;;  %1015 = vst.msk [vmem:[%s1433_s23 + $0x150] sm:$0xff] %vm972_vm4, %v950_v31  ;;  %vm823_vm10 = vcmp.ge.f32.partialorder %v1251_v34, 0.0  ;;  %v887_v37 = vmul.f32 0.01, %v1251_v34  ;;  %v948_v38 = vsel %vm820_vm8, %v685_v29, %v884_v33  ;;  %v688_v40 = vpop.f32.mrb[11].mxu1 }
  0xfb   : > { %981 = vst.msk [vmem:[%s1433_s23 + $0x40] sm:$0xff] %vm972_vm4, %v916_v32  ;;  %vm789_vm11 = vcmp.ge.f32.partialorder %v560_v35, 0.0  ;;  %v853_v39 = vmul.f32 0.01, %v560_v35  ;;  %1013 = vst.msk [vmem:[%s1433_s23 + $0x140] sm:$0xff] %vm972_vm4, %v948_v38  ;;  %v919_v41 = vsel %vm791_vm9, %v1219_v30, %v855_v36  ;;  %vm821_vm12 = vcmp.ge.f32.partialorder %v688_v40, 0.0 }
  0xfc   : > { %v951_v42 = vsel %vm823_vm10, %v1251_v34, %v887_v37  ;;  %v885_v43 = vmul.f32 0.01, %v688_v40  ;;  %984 = vst.msk [vmem:[%s1433_s23 + $0x58] sm:$0xff] %vm972_vm4, %v919_v41 }
  0xfd   : > { %1016 = vst.msk [vmem:[%s1433_s23 + $0x158] sm:$0xff] %vm972_vm4, %v951_v42  ;;  %v917_v44 = vsel %vm789_vm11, %v560_v35, %v853_v39  ;;  %v1222_v45 = vpop.f32.mrb[12].mxu0 }
  0xfe   : > { %982 = vst.msk [vmem:[%s1433_s23 + $0x48] sm:$0xff] %vm972_vm4, %v917_v44  ;;  %v949_v46 = vsel %vm821_vm12, %v688_v40, %v885_v43  ;;  %vm794_vm13 = vcmp.ge.f32.partialorder %v1222_v45, 0.0  ;;  %v858_v47 = vmul.f32 0.01, %v1222_v45  ;;  %v1254_v48 = vpop.f32.mrb[12].mxu1  ;;  %v573_v49 = vpop.f32.mrb[13].mxu0 }
  0xff   : > { %1014 = vst.msk [vmem:[%s1433_s23 + $0x148] sm:$0xff] %vm972_vm4, %v949_v46  ;;  %vm826_vm14 = vcmp.ge.f32.partialorder %v1254_v48, 0.0  ;;  %v890_v50 = vmul.f32 0.01, %v1254_v48  ;;  %vm792_vm15 = vcmp.ge.f32.partialorder %v573_v49, 0.0  ;;  %v701_v53 = vpop.f32.mrb[13].mxu1 }
 0x100   : > { %v856_v51 = vmul.f32 0.01, %v573_v49  ;;  %v922_v52 = vsel %vm794_vm13, %v1222_v45, %v858_v47  ;;  %v1223_v54 = vpop.f32.mrb[14].mxu0  ;;  %vm824_vm0 = vcmp.ge.f32.partialorder %v701_v53, 0.0  ;;  %v888_v57 = vmul.f32 0.01, %v701_v53 }
 0x101   : > { %987 = vst.msk [vmem:[%s1433_s23 + $0x70] sm:$0xff] %vm972_vm4, %v922_v52  ;;  %v954_v55 = vsel %vm826_vm14, %v1254_v48, %v890_v50  ;;  %v1255_v58 = vpop.f32.mrb[14].mxu1  ;;  %v576_v59 = vpop.f32.mrb[15].mxu0  ;;  %vm795_vm1 = vcmp.ge.f32.partialorder %v1223_v54, 0.0  ;;  %v859_v60 = vmul.f32 0.01, %v1223_v54 }
 0x102   : > { %v920_v56 = vsel %vm792_vm15, %v573_v49, %v856_v51  ;;  %1019 = vst.msk [vmem:[%s1433_s23 + $0x170] sm:$0xff] %vm972_vm4, %v954_v55  ;;  %vm827_vm2 = vcmp.ge.f32.partialorder %v1255_v58, 0.0  ;;  %v891_v61 = vmul.f32 0.01, %v1255_v58  ;;  %v952_v62 = vsel %vm824_vm0, %v701_v53, %v888_v57  ;;  %v704_v0 = vpop.f32.mrb[15].mxu1 }
 0x103   : > { %985 = vst.msk [vmem:[%s1433_s23 + $0x60] sm:$0xff] %vm972_vm4, %v920_v56  ;;  %vm793_vm3 = vcmp.ge.f32.partialorder %v576_v59, 0.0  ;;  %v857_v63 = vmul.f32 0.01, %v576_v59  ;;  %1017 = vst.msk [vmem:[%s1433_s23 + $0x160] sm:$0xff] %vm972_vm4, %v952_v62  ;;  %v923_v1 = vsel %vm795_vm1, %v1223_v54, %v859_v60  ;;  %vm825_vm5 = vcmp.ge.f32.partialorder %v704_v0, 0.0 }
 0x104   : > { %v955_v2 = vsel %vm827_vm2, %v1255_v58, %v891_v61  ;;  %v889_v3 = vmul.f32 0.01, %v704_v0  ;;  %988 = vst.msk [vmem:[%s1433_s23 + $0x78] sm:$0xff] %vm972_vm4, %v923_v1 }
 0x105   : > { %1020 = vst.msk [vmem:[%s1433_s23 + $0x178] sm:$0xff] %vm972_vm4, %v955_v2  ;;  %v921_v4 = vsel %vm793_vm3, %v576_v59, %v857_v63  ;;  %v1226_v5 = vpop.f32.mrb[16].mxu0 }
 0x106   : > { %986 = vst.msk [vmem:[%s1433_s23 + $0x68] sm:$0xff] %vm972_vm4, %v921_v4  ;;  %v953_v6 = vsel %vm825_vm5, %v704_v0, %v889_v3  ;;  %vm798_vm6 = vcmp.ge.f32.partialorder %v1226_v5, 0.0  ;;  %v862_v7 = vmul.f32 0.01, %v1226_v5  ;;  %v1258_v8 = vpop.f32.mrb[16].mxu1  ;;  %v589_v9 = vpop.f32.mrb[17].mxu0 }
 0x107   : > { %1018 = vst.msk [vmem:[%s1433_s23 + $0x168] sm:$0xff] %vm972_vm4, %v953_v6  ;;  %vm830_vm7 = vcmp.ge.f32.partialorder %v1258_v8, 0.0  ;;  %v894_v10 = vmul.f32 0.01, %v1258_v8  ;;  %vm796_vm8 = vcmp.ge.f32.partialorder %v589_v9, 0.0  ;;  %v717_v13 = vpop.f32.mrb[17].mxu1 }
 0x108   : > { %v860_v11 = vmul.f32 0.01, %v589_v9  ;;  %v926_v12 = vsel %vm798_vm6, %v1226_v5, %v862_v7  ;;  %v1227_v14 = vpop.f32.mrb[18].mxu0  ;;  %vm828_vm9 = vcmp.ge.f32.partialorder %v717_v13, 0.0  ;;  %v892_v17 = vmul.f32 0.01, %v717_v13 }
 0x109   : > { %991 = vst.msk [vmem:[%s1433_s23 + $0x90] sm:$0xff] %vm972_vm4, %v926_v12  ;;  %v958_v15 = vsel %vm830_vm7, %v1258_v8, %v894_v10  ;;  %v1259_v18 = vpop.f32.mrb[18].mxu1  ;;  %v592_v19 = vpop.f32.mrb[19].mxu0  ;;  %vm799_vm10 = vcmp.ge.f32.partialorder %v1227_v14, 0.0  ;;  %v863_v20 = vmul.f32 0.01, %v1227_v14 }
 0x10a   : > { %v924_v16 = vsel %vm796_vm8, %v589_v9, %v860_v11  ;;  %1023 = vst.msk [vmem:[%s1433_s23 + $0x190] sm:$0xff] %vm972_vm4, %v958_v15  ;;  %vm831_vm11 = vcmp.ge.f32.partialorder %v1259_v18, 0.0  ;;  %v895_v21 = vmul.f32 0.01, %v1259_v18  ;;  %v956_v22 = vsel %vm828_vm9, %v717_v13, %v892_v17  ;;  %v720_v24 = vpop.f32.mrb[19].mxu1 }
 0x10b   : > { %989 = vst.msk [vmem:[%s1433_s23 + $0x80] sm:$0xff] %vm972_vm4, %v924_v16  ;;  %vm797_vm12 = vcmp.ge.f32.partialorder %v592_v19, 0.0  ;;  %v861_v23 = vmul.f32 0.01, %v592_v19  ;;  %1021 = vst.msk [vmem:[%s1433_s23 + $0x180] sm:$0xff] %vm972_vm4, %v956_v22  ;;  %v927_v25 = vsel %vm799_vm10, %v1227_v14, %v863_v20  ;;  %vm829_vm13 = vcmp.ge.f32.partialorder %v720_v24, 0.0 }
 0x10c   : > { %v959_v26 = vsel %vm831_vm11, %v1259_v18, %v895_v21  ;;  %v893_v27 = vmul.f32 0.01, %v720_v24  ;;  %992 = vst.msk [vmem:[%s1433_s23 + $0x98] sm:$0xff] %vm972_vm4, %v927_v25 }
 0x10d   : > { %1024 = vst.msk [vmem:[%s1433_s23 + $0x198] sm:$0xff] %vm972_vm4, %v959_v26  ;;  %v925_v28 = vsel %vm797_vm12, %v592_v19, %v861_v23  ;;  %v1230_v29 = vpop.f32.mrb[20].mxu0 }
 0x10e   : > { %990 = vst.msk [vmem:[%s1433_s23 + $0x88] sm:$0xff] %vm972_vm4, %v925_v28  ;;  %v957_v30 = vsel %vm829_vm13, %v720_v24, %v893_v27  ;;  %vm802_vm14 = vcmp.ge.f32.partialorder %v1230_v29, 0.0  ;;  %v866_v31 = vmul.f32 0.01, %v1230_v29  ;;  %v1262_v32 = vpop.f32.mrb[20].mxu1  ;;  %v605_v33 = vpop.f32.mrb[21].mxu0 }
 0x10f   : > { %1022 = vst.msk [vmem:[%s1433_s23 + $0x188] sm:$0xff] %vm972_vm4, %v957_v30  ;;  %vm834_vm15 = vcmp.ge.f32.partialorder %v1262_v32, 0.0  ;;  %v898_v34 = vmul.f32 0.01, %v1262_v32  ;;  %vm800_vm0 = vcmp.ge.f32.partialorder %v605_v33, 0.0  ;;  %v733_v37 = vpop.f32.mrb[21].mxu1 }
 0x110   : > { %v864_v35 = vmul.f32 0.01, %v605_v33  ;;  %v930_v36 = vsel %vm802_vm14, %v1230_v29, %v866_v31  ;;  %v1231_v38 = vpop.f32.mrb[22].mxu0  ;;  %vm832_vm1 = vcmp.ge.f32.partialorder %v733_v37, 0.0  ;;  %v896_v41 = vmul.f32 0.01, %v733_v37 }
 0x111   : > { %995 = vst.msk [vmem:[%s1433_s23 + $0xb0] sm:$0xff] %vm972_vm4, %v930_v36  ;;  %v962_v39 = vsel %vm834_vm15, %v1262_v32, %v898_v34  ;;  %v1263_v42 = vpop.f32.mrb[22].mxu1  ;;  %v608_v43 = vpop.f32.mrb[23].mxu0  ;;  %vm803_vm2 = vcmp.ge.f32.partialorder %v1231_v38, 0.0  ;;  %v867_v44 = vmul.f32 0.01, %v1231_v38 }
 0x112   : > { %v928_v40 = vsel %vm800_vm0, %v605_v33, %v864_v35  ;;  %1027 = vst.msk [vmem:[%s1433_s23 + $0x1b0] sm:$0xff] %vm972_vm4, %v962_v39  ;;  %vm835_vm3 = vcmp.ge.f32.partialorder %v1263_v42, 0.0  ;;  %v899_v45 = vmul.f32 0.01, %v1263_v42  ;;  %v960_v46 = vsel %vm832_vm1, %v733_v37, %v896_v41  ;;  %v736_v48 = vpop.f32.mrb[23].mxu1 }
 0x113   : > { %993 = vst.msk [vmem:[%s1433_s23 + $0xa0] sm:$0xff] %vm972_vm4, %v928_v40  ;;  %vm801_vm5 = vcmp.ge.f32.partialorder %v608_v43, 0.0  ;;  %v865_v47 = vmul.f32 0.01, %v608_v43  ;;  %1025 = vst.msk [vmem:[%s1433_s23 + $0x1a0] sm:$0xff] %vm972_vm4, %v960_v46  ;;  %v931_v49 = vsel %vm803_vm2, %v1231_v38, %v867_v44  ;;  %vm833_vm6 = vcmp.ge.f32.partialorder %v736_v48, 0.0 }
 0x114   : > { %v963_v50 = vsel %vm835_vm3, %v1263_v42, %v899_v45  ;;  %v897_v51 = vmul.f32 0.01, %v736_v48  ;;  %996 = vst.msk [vmem:[%s1433_s23 + $0xb8] sm:$0xff] %vm972_vm4, %v931_v49 }
 0x115   : > { %1028 = vst.msk [vmem:[%s1433_s23 + $0x1b8] sm:$0xff] %vm972_vm4, %v963_v50  ;;  %v929_v52 = vsel %vm801_vm5, %v608_v43, %v865_v47  ;;  %v1234_v53 = vpop.f32.mrb[24].mxu0 }
 0x116   : > { %994 = vst.msk [vmem:[%s1433_s23 + $0xa8] sm:$0xff] %vm972_vm4, %v929_v52  ;;  %v961_v54 = vsel %vm833_vm6, %v736_v48, %v897_v51  ;;  %vm806_vm7 = vcmp.ge.f32.partialorder %v1234_v53, 0.0  ;;  %v870_v55 = vmul.f32 0.01, %v1234_v53  ;;  %v1266_v56 = vpop.f32.mrb[24].mxu1  ;;  %v621_v57 = vpop.f32.mrb[25].mxu0 }
 0x117   : > { %1026 = vst.msk [vmem:[%s1433_s23 + $0x1a8] sm:$0xff] %vm972_vm4, %v961_v54  ;;  %vm838_vm8 = vcmp.ge.f32.partialorder %v1266_v56, 0.0  ;;  %v902_v58 = vmul.f32 0.01, %v1266_v56  ;;  %vm804_vm9 = vcmp.ge.f32.partialorder %v621_v57, 0.0  ;;  %v749_v61 = vpop.f32.mrb[25].mxu1 }
 0x118   : > { %v868_v59 = vmul.f32 0.01, %v621_v57  ;;  %v934_v60 = vsel %vm806_vm7, %v1234_v53, %v870_v55  ;;  %v1235_v62 = vpop.f32.mrb[26].mxu0  ;;  %vm836_vm10 = vcmp.ge.f32.partialorder %v749_v61, 0.0  ;;  %v900_v1 = vmul.f32 0.01, %v749_v61 }
 0x119   : > { %999 = vst.msk [vmem:[%s1433_s23 + $0xd0] sm:$0xff] %vm972_vm4, %v934_v60  ;;  %v966_v63 = vsel %vm838_vm8, %v1266_v56, %v902_v58  ;;  %v1267_v2 = vpop.f32.mrb[26].mxu1  ;;  %v624_v3 = vpop.f32.mrb[27].mxu0  ;;  %vm807_vm11 = vcmp.ge.f32.partialorder %v1235_v62, 0.0  ;;  %v871_v4 = vmul.f32 0.01, %v1235_v62 }
 0x11a   : > { %v932_v0 = vsel %vm804_vm9, %v621_v57, %v868_v59  ;;  %1031 = vst.msk [vmem:[%s1433_s23 + $0x1d0] sm:$0xff] %vm972_vm4, %v966_v63  ;;  %vm839_vm12 = vcmp.ge.f32.partialorder %v1267_v2, 0.0  ;;  %v903_v5 = vmul.f32 0.01, %v1267_v2  ;;  %v964_v6 = vsel %vm836_vm10, %v749_v61, %v900_v1  ;;  %v752_v8 = vpop.f32.mrb[27].mxu1 }
 0x11b   : > { %997 = vst.msk [vmem:[%s1433_s23 + $0xc0] sm:$0xff] %vm972_vm4, %v932_v0  ;;  %vm805_vm13 = vcmp.ge.f32.partialorder %v624_v3, 0.0  ;;  %v869_v7 = vmul.f32 0.01, %v624_v3  ;;  %1029 = vst.msk [vmem:[%s1433_s23 + $0x1c0] sm:$0xff] %vm972_vm4, %v964_v6  ;;  %v935_v9 = vsel %vm807_vm11, %v1235_v62, %v871_v4  ;;  %vm837_vm14 = vcmp.ge.f32.partialorder %v752_v8, 0.0 }
 0x11c   : > { %v967_v10 = vsel %vm839_vm12, %v1267_v2, %v903_v5  ;;  %v901_v11 = vmul.f32 0.01, %v752_v8  ;;  %1000 = vst.msk [vmem:[%s1433_s23 + $0xd8] sm:$0xff] %vm972_vm4, %v935_v9 }
 0x11d   : > { %1032 = vst.msk [vmem:[%s1433_s23 + $0x1d8] sm:$0xff] %vm972_vm4, %v967_v10  ;;  %v933_v12 = vsel %vm805_vm13, %v624_v3, %v869_v7  ;;  %v1238_v13 = vpop.f32.mrb[28].mxu0 }
 0x11e   : > { %998 = vst.msk [vmem:[%s1433_s23 + $0xc8] sm:$0xff] %vm972_vm4, %v933_v12  ;;  %v965_v14 = vsel %vm837_vm14, %v752_v8, %v901_v11  ;;  %vm810_vm15 = vcmp.ge.f32.partialorder %v1238_v13, 0.0  ;;  %v874_v15 = vmul.f32 0.01, %v1238_v13  ;;  %v1270_v16 = vpop.f32.mrb[28].mxu1  ;;  %v637_v17 = vpop.f32.mrb[29].mxu0 }
 0x11f   : > { %1030 = vst.msk [vmem:[%s1433_s23 + $0x1c8] sm:$0xff] %vm972_vm4, %v965_v14  ;;  %vm842_vm0 = vcmp.ge.f32.partialorder %v1270_v16, 0.0  ;;  %v906_v18 = vmul.f32 0.01, %v1270_v16  ;;  %vm808_vm1 = vcmp.ge.f32.partialorder %v637_v17, 0.0  ;;  %v765_v21 = vpop.f32.mrb[29].mxu1 }
 0x120   : > { %v872_v19 = vmul.f32 0.01, %v637_v17  ;;  %v938_v20 = vsel %vm810_vm15, %v1238_v13, %v874_v15  ;;  %v1239_v22 = vpop.f32.mrb[30].mxu0  ;;  %vm840_vm2 = vcmp.ge.f32.partialorder %v765_v21, 0.0  ;;  %v904_v25 = vmul.f32 0.01, %v765_v21 }
 0x121   : > { %1003 = vst.msk [vmem:[%s1433_s23 + $0xf0] sm:$0xff] %vm972_vm4, %v938_v20  ;;  %v970_v23 = vsel %vm842_vm0, %v1270_v16, %v906_v18  ;;  %v1271_v26 = vpop.f32.mrb[30].mxu1  ;;  %v640_v27 = vpop.f32.mrb[31].mxu0  ;;  %vm811_vm3 = vcmp.ge.f32.partialorder %v1239_v22, 0.0  ;;  %v875_v28 = vmul.f32 0.01, %v1239_v22 }
 0x122   : > { %v936_v24 = vsel %vm808_vm1, %v637_v17, %v872_v19  ;;  %1035 = vst.msk [vmem:[%s1433_s23 + $0x1f0] sm:$0xff] %vm972_vm4, %v970_v23  ;;  %vm843_vm5 = vcmp.ge.f32.partialorder %v1271_v26, 0.0  ;;  %v907_v29 = vmul.f32 0.01, %v1271_v26  ;;  %v968_v30 = vsel %vm840_vm2, %v765_v21, %v904_v25  ;;  %v768_v32 = vpop.f32.mrb[31].mxu1 }
 0x123   : > { %1001 = vst.msk [vmem:[%s1433_s23 + $0xe0] sm:$0xff] %vm972_vm4, %v936_v24  ;;  %vm809_vm6 = vcmp.ge.f32.partialorder %v640_v27, 0.0  ;;  %v873_v31 = vmul.f32 0.01, %v640_v27  ;;  %1033 = vst.msk [vmem:[%s1433_s23 + $0x1e0] sm:$0xff] %vm972_vm4, %v968_v30  ;;  %v939_v33 = vsel %vm811_vm3, %v1239_v22, %v875_v28  ;;  %vm841_vm7 = vcmp.ge.f32.partialorder %v768_v32, 0.0 }
 0x124   : > { %v971_v34 = vsel %vm843_vm5, %v1271_v26, %v907_v29  ;;  %v905_v35 = vmul.f32 0.01, %v768_v32  ;;  %1004 = vst.msk [vmem:[%s1433_s23 + $0xf8] sm:$0xff] %vm972_vm4, %v939_v33 }
 0x125   : > { %1036 = vst.msk [vmem:[%s1433_s23 + $0x1f8] sm:$0xff] %vm972_vm4, %v971_v34  ;;  %v937_v36 = vsel %vm809_vm6, %v640_v27, %v873_v31 }
 0x126   : > { %1002 = vst.msk [vmem:[%s1433_s23 + $0xe8] sm:$0xff] %vm972_vm4, %v937_v36  ;;  %v969_v37 = vsel %vm841_vm7, %v768_v32, %v905_v35 }
 0x127   : > { %1034 = vst.msk [vmem:[%s1433_s23 + $0x1e8] sm:$0xff] %vm972_vm4, %v969_v37 }
 0x128 PF: > { %s12_s9 = sadd.s32 1, %s1325_s9  }
 0x129   : > { %p9_p4 = scmp.ge.s32.totalorder %s12_s9, 8  }
 0x12b   :  { %11 = sbr.rel (!%p9_p4) target bundleno = 1 (0x1), region = 58 }

// kernel: glnet_forward.8
= control target key start
LH: loop header
LB: loop body
LE: loop exit
PB: predicated region body
PF: predicated region fallthrough
CT: control target
= control target key end

     0   :  { %s1325_s9 = smov 0   ;;  %s1545_s0 = inlined_call_operand.vmem [shape: bf16[1024,12], index: 0, kind: input, shape index: {}]   ;;  %s1546_s1 = inlined_call_operand.vmem [shape: bf16[12,4], index: 1, kind: input, shape index: {}]   ;;  %s1547_s2 = inlined_call_operand.vmem [shape: f32[1024,4], index: 2, kind: output, shape index: {}]  }
   0x1 LB: > { %s1082_s10 = sadd.s32 4294967295, %s1308_s9   ;;  %p1086_p0 = scmp.ge.s32.totalorder %s1308_s9, 1  ;;  %s1308_s9 = sphi %s1325_s9, %s12_s9  }
   0x2   : > { %p113_p1 = scmp.lt.s32.totalorder %s1308_s9, 3 }
   0x4   : > { %p114_p2 = pnand %p1086_p0, %p113_p1 }
   0x5   : > { %v1269_v0 = vld [vmem:[%s1546_s1] sm:$0x3f] (!%p114_p2)   ;;  %vm476_vm0 = vcmask (!%p114_p2), 1045504   ;;  %s1087_s13 = sshll.u32 (!%p114_p2), %s1082_s10, 6  ;;  %vm379_vm1 = vcmask (!%p114_p2), 97280   ;;  %vm961_vm3 = vcmask (!%p114_p2), 31744  }
   0x6   : > { %117 = sbr.rel (%p114_p2) target bundleno = 296 (0x128), region = 28  ;;  %1259 = vmatprep.subr.msk.bf16.mxu0 (!%p114_p2), %vm476_vm0, %v1269_v0  ;;  %1260 = vmatprep.subr.msk.bf16.mxu1 (!%p114_p2), %vm476_vm0, %v1269_v0  ;;  %v478_v1 = vsel (!%p114_p2), %vm476_vm0, %v1269_v0, 0  ;;  %p136_p3 = scmp.lt.s32.totalorder (!%p114_p2), %s1087_s13, 127 }
   0x7   : > { %1192 = vmatpush3.bf16.msra.mxu0 (!%p114_p2), %v478_v1  ;;  %1258 = vmatpush3.bf16.msra.mxu1 (!%p114_p2), %v478_v1 }
   0xd   : > { %s1549_s13 = smov (!%p136_p3, %s1087_s13), 127 }
   0xe   : > { %s1088_s14 = sshll.u32 %s1549_s13, 2  ;;  %s1090_s18 = sshll.u32 %s1549_s13, 3 }
   0xf   : > { %s1342_s17 = scalar_lea.vmem %s1545_s0, %s1088_s14  ;;  %s1412_s21 = scalar_lea.vmem %s1547_s2, %s1090_s18 }
  0x10   : > { %v1270_v2 = vld [vmem:[%s1342_s17] sm:$0xff]   ;;  %v1272_v4 = vld [vmem:[%s1342_s17 + $0x8] sm:$0xff]   ;;  %v1274_v6 = vld [vmem:[%s1342_s17 + $0x10] sm:$0xff]  }
  0x11   : > { %v1271_v3 = vld [vmem:[%s1342_s17 + $0x80] sm:$0xff]   ;;  %1193 = vmatprep.mubr.msk.bf16.mxu0 %vm379_vm1, %v1270_v2  ;;  %v1273_v5 = vld [vmem:[%s1342_s17 + $0x88] sm:$0xff]   ;;  %v1275_v7 = vld [vmem:[%s1342_s17 + $0x90] sm:$0xff]  }
  0x12   : > { %1225 = vmatprep.mubr.msk.bf16.mxu1 %vm379_vm1, %v1271_v3  ;;  %1194 = vmatmul.mubr.msk.bf16.vlgmr.msra.gmra.mrb[0].mxu0 %vm379_vm1, %v1272_v4  ;;  %v1276_v8 = vld [vmem:[%s1342_s17 + $0x18] sm:$0xff]   ;;  %v1278_v10 = vld [vmem:[%s1342_s17 + $0x20] sm:$0xff]   ;;  %v1280_v12 = vld [vmem:[%s1342_s17 + $0x28] sm:$0xff]  }
  0x13   : > { %1226 = vmatmul.mubr.msk.bf16.vlgmr.msra.gmra.mrb[0].mxu1 %vm379_vm1, %v1273_v5  ;;  %1197 = vmatprep.mubr.msk.bf16.mxu0 %vm379_vm1, %v1274_v6  ;;  %v1277_v9 = vld [vmem:[%s1342_s17 + $0x98] sm:$0xff]   ;;  %v1279_v11 = vld [vmem:[%s1342_s17 + $0xa0] sm:$0xff]   ;;  %v1281_v13 = vld [vmem:[%s1342_s17 + $0xa8] sm:$0xff]  }
  0x14   : > { %1229 = vmatprep.mubr.msk.bf16.mxu1 %vm379_vm1, %v1275_v7  ;;  %v1282_v14 = vld [vmem:[%s1342_s17 + $0x30] sm:$0xff]   ;;  %v1284_v16 = vld [vmem:[%s1342_s17 + $0x38] sm:$0xff]   ;;  %v1286_v18 = vld [vmem:[%s1342_s17 + $0x40] sm:$0xff]  }
  0x15   : > { %v1283_v15 = vld [vmem:[%s1342_s17 + $0xb0] sm:$0xff]   ;;  %v1285_v17 = vld [vmem:[%s1342_s17 + $0xb8] sm:$0xff]   ;;  %v1287_v19 = vld [vmem:[%s1342_s17 + $0xc0] sm:$0xff]  }
  0x16   : > { %v1288_v20 = vld [vmem:[%s1342_s17 + $0x48] sm:$0xff]   ;;  %v1290_v22 = vld [vmem:[%s1342_s17 + $0x50] sm:$0xff]   ;;  %v1292_v24 = vld [vmem:[%s1342_s17 + $0x58] sm:$0xff]  }
  0x17   : > { %v1289_v21 = vld [vmem:[%s1342_s17 + $0xc8] sm:$0xff]   ;;  %v1291_v23 = vld [vmem:[%s1342_s17 + $0xd0] sm:$0xff]   ;;  %v1293_v25 = vld [vmem:[%s1342_s17 + $0xd8] sm:$0xff]  }
  0x18   : > { %v1294_v26 = vld [vmem:[%s1342_s17 + $0x60] sm:$0xff]   ;;  %v1296_v28 = vld [vmem:[%s1342_s17 + $0x68] sm:$0xff]   ;;  %v1298_v30 = vld [vmem:[%s1342_s17 + $0x70] sm:$0xff]  }
  0x19   : > { %v1295_v27 = vld [vmem:[%s1342_s17 + $0xe0] sm:$0xff]   ;;  %v1297_v29 = vld [vmem:[%s1342_s17 + $0xe8] sm:$0xff]   ;;  %v1299_v31 = vld [vmem:[%s1342_s17 + $0xf0] sm:$0xff]  }
  0x1a   : > { %1198 = vmatmul.mubr.msk.bf16.gmra.mrb[4].mxu0 %vm379_vm1, %v1276_v8  ;;  %v1300_v32 = vld [vmem:[%s1342_s17 + $0x78] sm:$0xff]  }
  0x1b   : > { %1230 = vmatmul.mubr.msk.bf16.gmra.mrb[4].mxu1 %vm379_vm1, %v1277_v9  ;;  %1201 = vmatprep.mubr.msk.bf16.mxu0 %vm379_vm1, %v1278_v10  ;;  %v1301_v33 = vld [vmem:[%s1342_s17 + $0xf8] sm:$0xff]  }
  0x1c   : > { %1233 = vmatprep.mubr.msk.bf16.mxu1 %vm379_vm1, %v1279_v11 }
  0x22   : > { %1202 = vmatmul.mubr.msk.bf16.gmra.mrb[8].mxu0 %vm379_vm1, %v1280_v12 }
  0x23   : > { %1234 = vmatmul.mubr.msk.bf16.gmra.mrb[8].mxu1 %vm379_vm1, %v1281_v13  ;;  %1205 = vmatprep.mubr.msk.bf16.mxu0 %vm379_vm1, %v1282_v14 }
  0x24   : > { %1237 = vmatprep.mubr.msk.bf16.mxu1 %vm379_vm1, %v1283_v15 }
  0x2a   : > { %1206 = vmatmul.mubr.msk.bf16.gmra.mrb[12].mxu0 %vm379_vm1, %v1284_v16 }
  0x2b   : > { %1238 = vmatmul.mubr.msk.bf16.gmra.mrb[12].mxu1 %vm379_vm1, %v1285_v17  ;;  %1209 = vmatprep.mubr.msk.bf16.mxu0 %vm379_vm1, %v1286_v18 }
  0x2c   : > { %1241 = vmatprep.mubr.msk.bf16.mxu1 %vm379_vm1, %v1287_v19 }
  0x32   : > { %1210 = vmatmul.mubr.msk.bf16.gmra.mrb[16].mxu0 %vm379_vm1, %v1288_v20 }
  0x33   : > { %1242 = vmatmul.mubr.msk.bf16.gmra.mrb[16].mxu1 %vm379_vm1, %v1289_v21  ;;  %1213 = vmatprep.mubr.msk.bf16.mxu0 %vm379_vm1, %v1290_v22 }
  0x34   : > { %1245 = vmatprep.mubr.msk.bf16.mxu1 %vm379_vm1, %v1291_v23 }
  0x3a   : > { %1214 = vmatmul.mubr.msk.bf16.gmra.mrb[20].mxu0 %vm379_vm1, %v1292_v24 }
  0x3b   : > { %1246 = vmatmul.mubr.msk.bf16.gmra.mrb[20].mxu1 %vm379_vm1, %v1293_v25  ;;  %1217 = vmatprep.mubr.msk.bf16.mxu0 %vm379_vm1, %v1294_v26 }
  0x3c   : > { %1249 = vmatprep.mubr.msk.bf16.mxu1 %vm379_vm1, %v1295_v27 }
  0x42   : > { %1218 = vmatmul.mubr.msk.bf16.gmra.mrb[24].mxu0 %vm379_vm1, %v1296_v28 }
  0x43   : > { %1250 = vmatmul.mubr.msk.bf16.gmra.mrb[24].mxu1 %vm379_vm1, %v1297_v29  ;;  %1221 = vmatprep.mubr.msk.bf16.mxu0 %vm379_vm1, %v1298_v30 }
  0x44   : > { %1253 = vmatprep.mubr.msk.bf16.mxu1 %vm379_vm1, %v1299_v31 }
  0x4a   : > { %1222 = vmatmul.mubr.msk.bf16.gmra.mrb[28].mxu0 %vm379_vm1, %v1300_v32 }
  0x4b   : > { %1254 = vmatmul.mubr.msk.bf16.gmra.mrb[28].mxu1 %vm379_vm1, %v1301_v33 }
  0xe5   : > { %v1195_v34 = vpop.f32.mrb[0].mxu0 }
  0xe6   : > { %vm771_vm2 = vcmp.ge.f32.partialorder %v1195_v34, 0.0  ;;  %v835_v35 = vmul.f32 0.01, %v1195_v34  ;;  %v1227_v36 = vpop.f32.mrb[0].mxu1  ;;  %v514_v37 = vpop.f32.mrb[1].mxu0 }
  0xe7   : > { %vm803_vm4 = vcmp.ge.f32.partialorder %v1227_v36, 0.0  ;;  %v867_v38 = vmul.f32 0.01, %v1227_v36  ;;  %vm769_vm5 = vcmp.ge.f32.partialorder %v514_v37, 0.0  ;;  %v833_v39 = vmul.f32 0.01, %v514_v37 }
  0xe8   : > { %v899_v40 = vsel %vm771_vm2, %v1195_v34, %v835_v35  ;;  %v642_v41 = vpop.f32.mrb[1].mxu1  ;;  %v1196_v42 = vpop.f32.mrb[2].mxu0 }
  0xe9   : > { %964 = vst.msk [vmem:[%s1412_s21 + $0x10] sm:$0xff] %vm961_vm3, %v899_v40  ;;  %v931_v43 = vsel %vm803_vm4, %v1227_v36, %v867_v38  ;;  %v897_v44 = vsel %vm769_vm5, %v514_v37, %v833_v39  ;;  %vm801_vm6 = vcmp.ge.f32.partialorder %v642_v41, 0.0  ;;  %v865_v45 = vmul.f32 0.01, %v642_v41  ;;  %v1228_v46 = vpop.f32.mrb[2].mxu1  ;;  %v517_v47 = vpop.f32.mrb[3].mxu0 }
  0xea   : > { %996 = vst.msk [vmem:[%s1412_s21 + $0x110] sm:$0xff] %vm961_vm3, %v931_v43  ;;  %962 = vst.msk [vmem:[%s1412_s21] sm:$0xff] %vm961_vm3, %v897_v44  ;;  %vm772_vm7 = vcmp.ge.f32.partialorder %v1196_v42, 0.0  ;;  %v836_v48 = vmul.f32 0.01, %v1196_v42  ;;  %vm804_vm8 = vcmp.ge.f32.partialorder %v1228_v46, 0.0 }
  0xeb   : > { %v868_v49 = vmul.f32 0.01, %v1228_v46  ;;  %v929_v50 = vsel %vm801_vm6, %v642_v41, %v865_v45  ;;  %vm770_vm9 = vcmp.ge.f32.partialorder %v517_v47, 0.0  ;;  %v834_v51 = vmul.f32 0.01, %v517_v47  ;;  %v645_v52 = vpop.f32.mrb[3].mxu1 }
  0xec   : > { %994 = vst.msk [vmem:[%s1412_s21 + $0x100] sm:$0xff] %vm961_vm3, %v929_v50  ;;  %v900_v53 = vsel %vm772_vm7, %v1196_v42, %v836_v48  ;;  %vm802_vm10 = vcmp.ge.f32.partialorder %v645_v52, 0.0  ;;  %v866_v55 = vmul.f32 0.01, %v645_v52 }
  0xed   : > { %v932_v54 = vsel %vm804_vm8, %v1228_v46, %v868_v49  ;;  %965 = vst.msk [vmem:[%s1412_s21 + $0x18] sm:$0xff] %vm961_vm3, %v900_v53  ;;  %v898_v56 = vsel %vm770_vm9, %v517_v47, %v834_v51  ;;  %v1199_v57 = vpop.f32.mrb[4].mxu0 }
  0xee   : > { %997 = vst.msk [vmem:[%s1412_s21 + $0x118] sm:$0xff] %vm961_vm3, %v932_v54  ;;  %963 = vst.msk [vmem:[%s1412_s21 + $0x8] sm:$0xff] %vm961_vm3, %v898_v56  ;;  %v930_v58 = vsel %vm802_vm10, %v645_v52, %v866_v55  ;;  %vm775_vm11 = vcmp.ge.f32.partialorder %v1199_v57, 0.0  ;;  %v839_v59 = vmul.f32 0.01, %v1199_v57  ;;  %v1231_v60 = vpop.f32.mrb[4].mxu1 }
  0xef   : > { %v530_v61 = vpop.f32.mrb[5].mxu0  ;;  %995 = vst.msk [vmem:[%s1412_s21 + $0x108] sm:$0xff] %vm961_vm3, %v930_v58  ;;  %vm807_vm12 = vcmp.ge.f32.partialorder %v1231_v60, 0.0  ;;  %v871_v62 = vmul.f32 0.01, %v1231_v60  ;;  %v658_v1 = vpop.f32.mrb[5].mxu1 }
  0xf0   : > { %vm773_vm13 = vcmp.ge.f32.partialorder %v530_v61, 0.0  ;;  %v837_v63 = vmul.f32 0.01, %v530_v61  ;;  %v903_v0 = vsel %vm775_vm11, %v1199_v57, %v839_v59  ;;  %v1200_v2 = vpop.f32.mrb[6].mxu0  ;;  %vm805_vm14 = vcmp.ge.f32.partialorder %v658_v1, 0.0  ;;  %v1232_v6 = vpop.f32.mrb[6].mxu1 }
  0xf1   : > { %968 = vst.msk [vmem:[%s1412_s21 + $0x30] sm:$0xff] %vm961_vm3, %v903_v0  ;;  %v935_v3 = vsel %vm807_vm12, %v1231_v60, %v871_v62  ;;  %v869_v5 = vmul.f32 0.01, %v658_v1  ;;  %v533_v7 = vpop.f32.mrb[7].mxu0  ;;  %vm776_vm15 = vcmp.ge.f32.partialorder %v1200_v2, 0.0  ;;  %vm808_vm0 = vcmp.ge.f32.partialorder %v1232_v6, 0.0 }
  0xf2   : > { %v901_v4 = vsel %vm773_vm13, %v530_v61, %v837_v63  ;;  %1000 = vst.msk [vmem:[%s1412_s21 + $0x130] sm:$0xff] %vm961_vm3, %v935_v3  ;;  %v840_v8 = vmul.f32 0.01, %v1200_v2  ;;  %v872_v9 = vmul.f32 0.01, %v1232_v6  ;;  %vm774_vm1 = vcmp.ge.f32.partialorder %v533_v7, 0.0 }
  0xf3   : > { %966 = vst.msk [vmem:[%s1412_s21 + $0x20] sm:$0xff] %vm961_vm3, %v901_v4  ;;  %v933_v10 = vsel %vm805_vm14, %v658_v1, %v869_v5  ;;  %v838_v11 = vmul.f32 0.01, %v533_v7  ;;  %v661_v12 = vpop.f32.mrb[7].mxu1 }
  0xf4   : > { %998 = vst.msk [vmem:[%s1412_s21 + $0x120] sm:$0xff] %vm961_vm3, %v933_v10  ;;  %v904_v13 = vsel %vm776_vm15, %v1200_v2, %v840_v8  ;;  %v936_v14 = vsel %vm808_vm0, %v1232_v6, %v872_v9  ;;  %vm806_vm2 = vcmp.ge.f32.partialorder %v661_v12, 0.0  ;;  %v870_v15 = vmul.f32 0.01, %v661_v12 }
  0xf5   : > { %969 = vst.msk [vmem:[%s1412_s21 + $0x38] sm:$0xff] %vm961_vm3, %v904_v13  ;;  %1001 = vst.msk [vmem:[%s1412_s21 + $0x138] sm:$0xff] %vm961_vm3, %v936_v14  ;;  %v902_v16 = vsel %vm774_vm1, %v533_v7, %v838_v11  ;;  %v1203_v17 = vpop.f32.mrb[8].mxu0 }
  0xf6   : > { %967 = vst.msk [vmem:[%s1412_s21 + $0x28] sm:$0xff] %vm961_vm3, %v902_v16  ;;  %v934_v18 = vsel %vm806_vm2, %v661_v12, %v870_v15  ;;  %vm779_vm4 = vcmp.ge.f32.partialorder %v1203_v17, 0.0  ;;  %v843_v19 = vmul.f32 0.01, %v1203_v17  ;;  %v1235_v20 = vpop.f32.mrb[8].mxu1  ;;  %v546_v21 = vpop.f32.mrb[9].mxu0 }
  0xf7   : > { %999 = vst.msk [vmem:[%s1412_s21 + $0x128] sm:$0xff] %vm961_vm3, %v934_v18  ;;  %vm811_vm5 = vcmp.ge.f32.partialorder %v1235_v20, 0.0  ;;  %v875_v22 = vmul.f32 0.01, %v1235_v20  ;;  %vm777_vm6 = vcmp.ge.f32.partialorder %v546_v21, 0.0  ;;  %v674_v25 = vpop.f32.mrb[9].mxu1 }
  0xf8   : > { %v841_v23 = vmul.f32 0.01, %v546_v21  ;;  %v907_v24 = vsel %vm779_vm4, %v1203_v17, %v843_v19  ;;  %v1204_v26 = vpop.f32.mrb[10].mxu0  ;;  %vm809_vm7 = vcmp.ge.f32.partialorder %v674_v25, 0.0  ;;  %v873_v29 = vmul.f32 0.01, %v674_v25 }
  0xf9   : > { %972 = vst.msk [vmem:[%s1412_s21 + $0x50] sm:$0xff] %vm961_vm3, %v907_v24  ;;  %v939_v27 = vsel %vm811_vm5, %v1235_v20, %v875_v22  ;;  %v1236_v30 = vpop.f32.mrb[10].mxu1  ;;  %v549_v31 = vpop.f32.mrb[11].mxu0  ;;  %vm780_vm8 = vcmp.ge.f32.partialorder %v1204_v26, 0.0  ;;  %v844_v32 = vmul.f32 0.01, %v1204_v26 }
  0xfa   : > { %v905_v28 = vsel %vm777_vm6, %v546_v21, %v841_v23  ;;  %1004 = vst.msk [vmem:[%s1412_s21 + $0x150] sm:$0xff] %vm961_vm3, %v939_v27  ;;  %vm812_vm9 = vcmp.ge.f32.partialorder %v1236_v30, 0.0  ;;  %v876_v33 = vmul.f32 0.01, %v1236_v30  ;;  %v937_v34 = vsel %vm809_vm7, %v674_v25, %v873_v29  ;;  %v677_v36 = vpop.f32.mrb[11].mxu1 }
  0xfb   : > { %970 = vst.msk [vmem:[%s1412_s21 + $0x40] sm:$0xff] %vm961_vm3, %v905_v28  ;;  %vm778_vm10 = vcmp.ge.f32.partialorder %v549_v31, 0.0  ;;  %v842_v35 = vmul.f32 0.01, %v549_v31  ;;  %1002 = vst.msk [vmem:[%s1412_s21 + $0x140] sm:$0xff] %vm961_vm3, %v937_v34  ;;  %v908_v37 = vsel %vm780_vm8, %v1204_v26, %v844_v32  ;;  %vm810_vm11 = vcmp.ge.f32.partialorder %v677_v36, 0.0 }
  0xfc   : > { %v940_v38 = vsel %vm812_vm9, %v1236_v30, %v876_v33  ;;  %v874_v39 = vmul.f32 0.01, %v677_v36  ;;  %973 = vst.msk [vmem:[%s1412_s21 + $0x58] sm:$0xff] %vm961_vm3, %v908_v37 }
  0xfd   : > { %1005 = vst.msk [vmem:[%s1412_s21 + $0x158] sm:$0xff] %vm961_vm3, %v940_v38  ;;  %v906_v40 = vsel %vm778_vm10, %v549_v31, %v842_v35  ;;  %v1207_v41 = vpop.f32.mrb[12].mxu0 }
  0xfe   : > { %971 = vst.msk [vmem:[%s1412_s21 + $0x48] sm:$0xff] %vm961_vm3, %v906_v40  ;;  %v938_v42 = vsel %vm810_vm11, %v677_v36, %v874_v39  ;;  %vm783_vm12 = vcmp.ge.f32.partialorder %v1207_v41, 0.0  ;;  %v847_v43 = vmul.f32 0.01, %v1207_v41  ;;  %v1239_v44 = vpop.f32.mrb[12].mxu1  ;;  %v562_v45 = vpop.f32.mrb[13].mxu0 }
  0xff   : > { %1003 = vst.msk [vmem:[%s1412_s21 + $0x148] sm:$0xff] %vm961_vm3, %v938_v42  ;;  %vm815_vm13 = vcmp.ge.f32.partialorder %v1239_v44, 0.0  ;;  %v879_v46 = vmul.f32 0.01, %v1239_v44  ;;  %vm781_vm14 = vcmp.ge.f32.partialorder %v562_v45, 0.0  ;;  %v690_v49 = vpop.f32.mrb[13].mxu1 }
 0x100   : > { %v845_v47 = vmul.f32 0.01, %v562_v45  ;;  %v911_v48 = vsel %vm783_vm12, %v1207_v41, %v847_v43  ;;  %v1208_v50 = vpop.f32.mrb[14].mxu0  ;;  %vm813_vm15 = vcmp.ge.f32.partialorder %v690_v49, 0.0  ;;  %v877_v53 = vmul.f32 0.01, %v690_v49 }
 0x101   : > { %976 = vst.msk [vmem:[%s1412_s21 + $0x70] sm:$0xff] %vm961_vm3, %v911_v48  ;;  %v943_v51 = vsel %vm815_vm13, %v1239_v44, %v879_v46  ;;  %v1240_v54 = vpop.f32.mrb[14].mxu1  ;;  %v565_v55 = vpop.f32.mrb[15].mxu0  ;;  %vm784_vm0 = vcmp.ge.f32.partialorder %v1208_v50, 0.0  ;;  %v848_v56 = vmul.f32 0.01, %v1208_v50 }
 0x102   : > { %v909_v52 = vsel %vm781_vm14, %v562_v45, %v845_v47  ;;  %1008 = vst.msk [vmem:[%s1412_s21 + $0x170] sm:$0xff] %vm961_vm3, %v943_v51  ;;  %vm816_vm1 = vcmp.ge.f32.partialorder %v1240_v54, 0.0  ;;  %v880_v57 = vmul.f32 0.01, %v1240_v54  ;;  %v941_v58 = vsel %vm813_vm15, %v690_v49, %v877_v53  ;;  %v693_v60 = vpop.f32.mrb[15].mxu1 }
 0x103   : > { %974 = vst.msk [vmem:[%s1412_s21 + $0x60] sm:$0xff] %vm961_vm3, %v909_v52  ;;  %vm782_vm2 = vcmp.ge.f32.partialorder %v565_v55, 0.0  ;;  %v846_v59 = vmul.f32 0.01, %v565_v55  ;;  %1006 = vst.msk [vmem:[%s1412_s21 + $0x160] sm:$0xff] %vm961_vm3, %v941_v58  ;;  %v912_v61 = vsel %vm784_vm0, %v1208_v50, %v848_v56  ;;  %vm814_vm4 = vcmp.ge.f32.partialorder %v693_v60, 0.0 }
 0x104   : > { %v944_v62 = vsel %vm816_vm1, %v1240_v54, %v880_v57  ;;  %v878_v63 = vmul.f32 0.01, %v693_v60  ;;  %977 = vst.msk [vmem:[%s1412_s21 + $0x78] sm:$0xff] %vm961_vm3, %v912_v61 }
 0x105   : > { %1009 = vst.msk [vmem:[%s1412_s21 + $0x178] sm:$0xff] %vm961_vm3, %v944_v62  ;;  %v910_v0 = vsel %vm782_vm2, %v565_v55, %v846_v59  ;;  %v1211_v1 = vpop.f32.mrb[16].mxu0 }
 0x106   : > { %975 = vst.msk [vmem:[%s1412_s21 + $0x68] sm:$0xff] %vm961_vm3, %v910_v0  ;;  %v942_v2 = vsel %vm814_vm4, %v693_v60, %v878_v63  ;;  %vm787_vm5 = vcmp.ge.f32.partialorder %v1211_v1, 0.0  ;;  %v851_v3 = vmul.f32 0.01, %v1211_v1  ;;  %v1243_v4 = vpop.f32.mrb[16].mxu1  ;;  %v578_v5 = vpop.f32.mrb[17].mxu0 }
 0x107   : > { %1007 = vst.msk [vmem:[%s1412_s21 + $0x168] sm:$0xff] %vm961_vm3, %v942_v2  ;;  %vm819_vm6 = vcmp.ge.f32.partialorder %v1243_v4, 0.0  ;;  %v883_v6 = vmul.f32 0.01, %v1243_v4  ;;  %vm785_vm7 = vcmp.ge.f32.partialorder %v578_v5, 0.0  ;;  %v706_v9 = vpop.f32.mrb[17].mxu1 }
 0x108   : > { %v849_v7 = vmul.f32 0.01, %v578_v5  ;;  %v915_v8 = vsel %vm787_vm5, %v1211_v1, %v851_v3  ;;  %v1212_v10 = vpop.f32.mrb[18].mxu0  ;;  %vm817_vm8 = vcmp.ge.f32.partialorder %v706_v9, 0.0  ;;  %v881_v13 = vmul.f32 0.01, %v706_v9 }
 0x109   : > { %980 = vst.msk [vmem:[%s1412_s21 + $0x90] sm:$0xff] %vm961_vm3, %v915_v8  ;;  %v947_v11 = vsel %vm819_vm6, %v1243_v4, %v883_v6  ;;  %v1244_v14 = vpop.f32.mrb[18].mxu1  ;;  %v581_v15 = vpop.f32.mrb[19].mxu0  ;;  %vm788_vm9 = vcmp.ge.f32.partialorder %v1212_v10, 0.0  ;;  %v852_v16 = vmul.f32 0.01, %v1212_v10 }
 0x10a   : > { %v913_v12 = vsel %vm785_vm7, %v578_v5, %v849_v7  ;;  %1012 = vst.msk [vmem:[%s1412_s21 + $0x190] sm:$0xff] %vm961_vm3, %v947_v11  ;;  %vm820_vm10 = vcmp.ge.f32.partialorder %v1244_v14, 0.0  ;;  %v884_v17 = vmul.f32 0.01, %v1244_v14  ;;  %v945_v18 = vsel %vm817_vm8, %v706_v9, %v881_v13  ;;  %v709_v20 = vpop.f32.mrb[19].mxu1 }
 0x10b   : > { %978 = vst.msk [vmem:[%s1412_s21 + $0x80] sm:$0xff] %vm961_vm3, %v913_v12  ;;  %vm786_vm11 = vcmp.ge.f32.partialorder %v581_v15, 0.0  ;;  %v850_v19 = vmul.f32 0.01, %v581_v15  ;;  %1010 = vst.msk [vmem:[%s1412_s21 + $0x180] sm:$0xff] %vm961_vm3, %v945_v18  ;;  %v916_v21 = vsel %vm788_vm9, %v1212_v10, %v852_v16  ;;  %vm818_vm12 = vcmp.ge.f32.partialorder %v709_v20, 0.0 }
 0x10c   : > { %v948_v22 = vsel %vm820_vm10, %v1244_v14, %v884_v17  ;;  %v882_v23 = vmul.f32 0.01, %v709_v20  ;;  %981 = vst.msk [vmem:[%s1412_s21 + $0x98] sm:$0xff] %vm961_vm3, %v916_v21 }
 0x10d   : > { %1013 = vst.msk [vmem:[%s1412_s21 + $0x198] sm:$0xff] %vm961_vm3, %v948_v22  ;;  %v914_v24 = vsel %vm786_vm11, %v581_v15, %v850_v19  ;;  %v1215_v25 = vpop.f32.mrb[20].mxu0 }
 0x10e   : > { %979 = vst.msk [vmem:[%s1412_s21 + $0x88] sm:$0xff] %vm961_vm3, %v914_v24  ;;  %v946_v26 = vsel %vm818_vm12, %v709_v20, %v882_v23  ;;  %vm791_vm13 = vcmp.ge.f32.partialorder %v1215_v25, 0.0  ;;  %v855_v27 = vmul.f32 0.01, %v1215_v25  ;;  %v1247_v28 = vpop.f32.mrb[20].mxu1  ;;  %v594_v29 = vpop.f32.mrb[21].mxu0 }
 0x10f   : > { %1011 = vst.msk [vmem:[%s1412_s21 + $0x188] sm:$0xff] %vm961_vm3, %v946_v26  ;;  %vm823_vm14 = vcmp.ge.f32.partialorder %v1247_v28, 0.0  ;;  %v887_v30 = vmul.f32 0.01, %v1247_v28  ;;  %vm789_vm15 = vcmp.ge.f32.partialorder %v594_v29, 0.0  ;;  %v722_v33 = vpop.f32.mrb[21].mxu1 }
 0x110   : > { %v853_v31 = vmul.f32 0.01, %v594_v29  ;;  %v919_v32 = vsel %vm791_vm13, %v1215_v25, %v855_v27  ;;  %v1216_v34 = vpop.f32.mrb[22].mxu0  ;;  %vm821_vm0 = vcmp.ge.f32.partialorder %v722_v33, 0.0  ;;  %v885_v37 = vmul.f32 0.01, %v722_v33 }
 0x111   : > { %984 = vst.msk [vmem:[%s1412_s21 + $0xb0] sm:$0xff] %vm961_vm3, %v919_v32  ;;  %v951_v35 = vsel %vm823_vm14, %v1247_v28, %v887_v30  ;;  %v1248_v38 = vpop.f32.mrb[22].mxu1  ;;  %v597_v39 = vpop.f32.mrb[23].mxu0  ;;  %vm792_vm1 = vcmp.ge.f32.partialorder %v1216_v34, 0.0  ;;  %v856_v40 = vmul.f32 0.01, %v1216_v34 }
 0x112   : > { %v917_v36 = vsel %vm789_vm15, %v594_v29, %v853_v31  ;;  %1016 = vst.msk [vmem:[%s1412_s21 + $0x1b0] sm:$0xff] %vm961_vm3, %v951_v35  ;;  %vm824_vm2 = vcmp.ge.f32.partialorder %v1248_v38, 0.0  ;;  %v888_v41 = vmul.f32 0.01, %v1248_v38  ;;  %v949_v42 = vsel %vm821_vm0, %v722_v33, %v885_v37  ;;  %v725_v44 = vpop.f32.mrb[23].mxu1 }
 0x113   : > { %982 = vst.msk [vmem:[%s1412_s21 + $0xa0] sm:$0xff] %vm961_vm3, %v917_v36  ;;  %vm790_vm4 = vcmp.ge.f32.partialorder %v597_v39, 0.0  ;;  %v854_v43 = vmul.f32 0.01, %v597_v39  ;;  %1014 = vst.msk [vmem:[%s1412_s21 + $0x1a0] sm:$0xff] %vm961_vm3, %v949_v42  ;;  %v920_v45 = vsel %vm792_vm1, %v1216_v34, %v856_v40  ;;  %vm822_vm5 = vcmp.ge.f32.partialorder %v725_v44, 0.0 }
 0x114   : > { %v952_v46 = vsel %vm824_vm2, %v1248_v38, %v888_v41  ;;  %v886_v47 = vmul.f32 0.01, %v725_v44  ;;  %985 = vst.msk [vmem:[%s1412_s21 + $0xb8] sm:$0xff] %vm961_vm3, %v920_v45 }
 0x115   : > { %1017 = vst.msk [vmem:[%s1412_s21 + $0x1b8] sm:$0xff] %vm961_vm3, %v952_v46  ;;  %v918_v48 = vsel %vm790_vm4, %v597_v39, %v854_v43  ;;  %v1219_v49 = vpop.f32.mrb[24].mxu0 }
 0x116   : > { %983 = vst.msk [vmem:[%s1412_s21 + $0xa8] sm:$0xff] %vm961_vm3, %v918_v48  ;;  %v950_v50 = vsel %vm822_vm5, %v725_v44, %v886_v47  ;;  %vm795_vm6 = vcmp.ge.f32.partialorder %v1219_v49, 0.0  ;;  %v859_v51 = vmul.f32 0.01, %v1219_v49  ;;  %v1251_v52 = vpop.f32.mrb[24].mxu1  ;;  %v610_v53 = vpop.f32.mrb[25].mxu0 }
 0x117   : > { %1015 = vst.msk [vmem:[%s1412_s21 + $0x1a8] sm:$0xff] %vm961_vm3, %v950_v50  ;;  %vm827_vm7 = vcmp.ge.f32.partialorder %v1251_v52, 0.0  ;;  %v891_v54 = vmul.f32 0.01, %v1251_v52  ;;  %vm793_vm8 = vcmp.ge.f32.partialorder %v610_v53, 0.0  ;;  %v738_v57 = vpop.f32.mrb[25].mxu1 }
 0x118   : > { %v857_v55 = vmul.f32 0.01, %v610_v53  ;;  %v923_v56 = vsel %vm795_vm6, %v1219_v49, %v859_v51  ;;  %v1220_v58 = vpop.f32.mrb[26].mxu0  ;;  %vm825_vm9 = vcmp.ge.f32.partialorder %v738_v57, 0.0  ;;  %v889_v61 = vmul.f32 0.01, %v738_v57 }
 0x119   : > { %988 = vst.msk [vmem:[%s1412_s21 + $0xd0] sm:$0xff] %vm961_vm3, %v923_v56  ;;  %v955_v59 = vsel %vm827_vm7, %v1251_v52, %v891_v54  ;;  %v1252_v62 = vpop.f32.mrb[26].mxu1  ;;  %v613_v63 = vpop.f32.mrb[27].mxu0  ;;  %vm796_vm10 = vcmp.ge.f32.partialorder %v1220_v58, 0.0  ;;  %v860_v0 = vmul.f32 0.01, %v1220_v58 }
 0x11a   : > { %v921_v60 = vsel %vm793_vm8, %v610_v53, %v857_v55  ;;  %1020 = vst.msk [vmem:[%s1412_s21 + $0x1d0] sm:$0xff] %vm961_vm3, %v955_v59  ;;  %vm828_vm11 = vcmp.ge.f32.partialorder %v1252_v62, 0.0  ;;  %v892_v1 = vmul.f32 0.01, %v1252_v62  ;;  %v953_v2 = vsel %vm825_vm9, %v738_v57, %v889_v61  ;;  %v741_v4 = vpop.f32.mrb[27].mxu1 }
 0x11b   : > { %986 = vst.msk [vmem:[%s1412_s21 + $0xc0] sm:$0xff] %vm961_vm3, %v921_v60  ;;  %vm794_vm12 = vcmp.ge.f32.partialorder %v613_v63, 0.0  ;;  %v858_v3 = vmul.f32 0.01, %v613_v63  ;;  %1018 = vst.msk [vmem:[%s1412_s21 + $0x1c0] sm:$0xff] %vm961_vm3, %v953_v2  ;;  %v924_v5 = vsel %vm796_vm10, %v1220_v58, %v860_v0  ;;  %vm826_vm13 = vcmp.ge.f32.partialorder %v741_v4, 0.0 }
 0x11c   : > { %v956_v6 = vsel %vm828_vm11, %v1252_v62, %v892_v1  ;;  %v890_v7 = vmul.f32 0.01, %v741_v4  ;;  %989 = vst.msk [vmem:[%s1412_s21 + $0xd8] sm:$0xff] %vm961_vm3, %v924_v5 }
 0x11d   : > { %1021 = vst.msk [vmem:[%s1412_s21 + $0x1d8] sm:$0xff] %vm961_vm3, %v956_v6  ;;  %v922_v8 = vsel %vm794_vm12, %v613_v63, %v858_v3  ;;  %v1223_v9 = vpop.f32.mrb[28].mxu0 }
 0x11e   : > { %987 = vst.msk [vmem:[%s1412_s21 + $0xc8] sm:$0xff] %vm961_vm3, %v922_v8  ;;  %v954_v10 = vsel %vm826_vm13, %v741_v4, %v890_v7  ;;  %vm799_vm14 = vcmp.ge.f32.partialorder %v1223_v9, 0.0  ;;  %v863_v11 = vmul.f32 0.01, %v1223_v9  ;;  %v1255_v12 = vpop.f32.mrb[28].mxu1  ;;  %v626_v13 = vpop.f32.mrb[29].mxu0 }
 0x11f   : > { %1019 = vst.msk [vmem:[%s1412_s21 + $0x1c8] sm:$0xff] %vm961_vm3, %v954_v10  ;;  %vm831_vm15 = vcmp.ge.f32.partialorder %v1255_v12, 0.0  ;;  %v895_v14 = vmul.f32 0.01, %v1255_v12  ;;  %vm797_vm0 = vcmp.ge.f32.partialorder %v626_v13, 0.0  ;;  %v754_v17 = vpop.f32.mrb[29].mxu1 }
 0x120   : > { %v861_v15 = vmul.f32 0.01, %v626_v13  ;;  %v927_v16 = vsel %vm799_vm14, %v1223_v9, %v863_v11  ;;  %v1224_v18 = vpop.f32.mrb[30].mxu0  ;;  %vm829_vm1 = vcmp.ge.f32.partialorder %v754_v17, 0.0  ;;  %v893_v21 = vmul.f32 0.01, %v754_v17 }
 0x121   : > { %992 = vst.msk [vmem:[%s1412_s21 + $0xf0] sm:$0xff] %vm961_vm3, %v927_v16  ;;  %v959_v19 = vsel %vm831_vm15, %v1255_v12, %v895_v14  ;;  %v1256_v22 = vpop.f32.mrb[30].mxu1  ;;  %v629_v23 = vpop.f32.mrb[31].mxu0  ;;  %vm800_vm2 = vcmp.ge.f32.partialorder %v1224_v18, 0.0  ;;  %v864_v24 = vmul.f32 0.01, %v1224_v18 }
 0x122   : > { %v925_v20 = vsel %vm797_vm0, %v626_v13, %v861_v15  ;;  %1024 = vst.msk [vmem:[%s1412_s21 + $0x1f0] sm:$0xff] %vm961_vm3, %v959_v19  ;;  %vm832_vm4 = vcmp.ge.f32.partialorder %v1256_v22, 0.0  ;;  %v896_v25 = vmul.f32 0.01, %v1256_v22  ;;  %v957_v26 = vsel %vm829_vm1, %v754_v17, %v893_v21  ;;  %v757_v28 = vpop.f32.mrb[31].mxu1 }
 0x123   : > { %990 = vst.msk [vmem:[%s1412_s21 + $0xe0] sm:$0xff] %vm961_vm3, %v925_v20  ;;  %vm798_vm5 = vcmp.ge.f32.partialorder %v629_v23, 0.0  ;;  %v862_v27 = vmul.f32 0.01, %v629_v23  ;;  %1022 = vst.msk [vmem:[%s1412_s21 + $0x1e0] sm:$0xff] %vm961_vm3, %v957_v26  ;;  %v928_v29 = vsel %vm800_vm2, %v1224_v18, %v864_v24  ;;  %vm830_vm6 = vcmp.ge.f32.partialorder %v757_v28, 0.0 }
 0x124   : > { %v960_v30 = vsel %vm832_vm4, %v1256_v22, %v896_v25  ;;  %v894_v31 = vmul.f32 0.01, %v757_v28  ;;  %993 = vst.msk [vmem:[%s1412_s21 + $0xf8] sm:$0xff] %vm961_vm3, %v928_v29 }
 0x125   : > { %1025 = vst.msk [vmem:[%s1412_s21 + $0x1f8] sm:$0xff] %vm961_vm3, %v960_v30  ;;  %v926_v32 = vsel %vm798_vm5, %v629_v23, %v862_v27 }
 0x126   : > { %991 = vst.msk [vmem:[%s1412_s21 + $0xe8] sm:$0xff] %vm961_vm3, %v926_v32  ;;  %v958_v33 = vsel %vm830_vm6, %v757_v28, %v894_v31 }
 0x127   : > { %1023 = vst.msk [vmem:[%s1412_s21 + $0x1e8] sm:$0xff] %vm961_vm3, %v958_v33 }
 0x128 PF: > { %s12_s9 = sadd.s32 1, %s1308_s9  }
 0x129   : > { %p9_p4 = scmp.ge.s32.totalorder %s12_s9, 4  }
 0x12b   :  { %11 = sbr.rel (!%p9_p4) target bundleno = 1 (0x1), region = 58 }

// kernel: glnet_forward.10
= control target key start
LH: loop header
LB: loop body
LE: loop exit
PB: predicated region body
PF: predicated region fallthrough
CT: control target
= control target key end

     0   :  { %s302_s22 = smov 120   ;;  %vm264_vm0 = vcmask 64512   ;;  %s793_s0 = inlined_call_operand.vmem [shape: f32[32,2,8,16], index: 0, kind: input, shape index: {}]   ;;  %s794_s1 = inlined_call_operand.vmem [shape: f32[32,8,8], index: 1, kind: output, shape index: {}]  }
   0x1   :  { %v12_v0 = vld [vmem:[%s793_s0 + $0x20] sm:$0xff]  ;;  %v13_v1 = vld [vmem:[%s793_s0 + $0x28] sm:$0xff]  ;;  %v14_v5 = vld [vmem:[%s793_s0 + $0x30] sm:$0xff] }
   0x2   :  { %v8_v2 = vld [vmem:[%s793_s0] sm:$0xff]  ;;  %v322_v3 = vmax.f32 %v12_v0, %v13_v1  ;;  %v9_v4 = vld [vmem:[%s793_s0 + $0x8] sm:$0xff]  ;;  %v15_v6 = vld [vmem:[%s793_s0 + $0x38] sm:$0xff] }
   0x3   :  { %v333_v7 = vmax.f32 %v8_v2, %v9_v4  ;;  %v10_v8 = vld [vmem:[%s793_s0 + $0x10] sm:$0xff]  ;;  %v11_v9 = vld [vmem:[%s793_s0 + $0x18] sm:$0xff]  ;;  %v343_v10 = vmax.f32 %v14_v5, %v15_v6  ;;  %v16_v14 = vld [vmem:[%s793_s0 + $0x40] sm:$0xff] }
   0x4   :  { %140 = vrot.lane.b32.xlu1 %v322_v3, %s302_s22  ;;  %v347_v11 = vmax.f32 %v10_v8, %v11_v9  ;;  %v18_v12 = vld [vmem:[%s793_s0 + $0x50] sm:$0xff]  ;;  %v19_v13 = vld [vmem:[%s793_s0 + $0x58] sm:$0xff]  ;;  %v17_v15 = vld [vmem:[%s793_s0 + $0x48] sm:$0xff] }
   0x5   :  { %136 = vrot.lane.b32.xlu0 %v333_v7, %s302_s22  ;;  %v363_v16 = vmax.f32 %v18_v12, %v19_v13  ;;  %v367_v17 = vmax.f32 %v16_v14, %v17_v15  ;;  %v22_v18 = vld [vmem:[%s793_s0 + $0x70] sm:$0xff]  ;;  %v23_v19 = vld [vmem:[%s793_s0 + $0x78] sm:$0xff]  ;;  %v20_v20 = vld [vmem:[%s793_s0 + $0x60] sm:$0xff] }
   0x6   :  { %v21_v21 = vld [vmem:[%s793_s0 + $0x68] sm:$0xff]  ;;  %v383_v22 = vmax.f32 %v22_v18, %v23_v19  ;;  %v26_v24 = vld [vmem:[%s793_s0 + $0x90] sm:$0xff]  ;;  %v27_v25 = vld [vmem:[%s793_s0 + $0x98] sm:$0xff] }
   0x7   :  { %v387_v23 = vmax.f32 %v20_v20, %v21_v21  ;;  %v24_v26 = vld [vmem:[%s793_s0 + $0x80] sm:$0xff]  ;;  %v25_v27 = vld [vmem:[%s793_s0 + $0x88] sm:$0xff]  ;;  %v403_v28 = vmax.f32 %v26_v24, %v27_v25  ;;  %v30_v30 = vld [vmem:[%s793_s0 + $0xb0] sm:$0xff] }
   0x8   :  { %142 = vrot.lane.b32.xlu1 %v343_v10, %s302_s22  ;;  %v407_v29 = vmax.f32 %v24_v26, %v25_v27  ;;  %v31_v31 = vld [vmem:[%s793_s0 + $0xb8] sm:$0xff]  ;;  %v28_v32 = vld [vmem:[%s793_s0 + $0xa0] sm:$0xff]  ;;  %v29_v33 = vld [vmem:[%s793_s0 + $0xa8] sm:$0xff] }
   0x9   :  { %138 = vrot.lane.b32.xlu0 %v347_v11, %s302_s22  ;;  %v423_v34 = vmax.f32 %v30_v30, %v31_v31  ;;  %v427_v35 = vmax.f32 %v28_v32, %v29_v33  ;;  %v34_v36 = vld [vmem:[%s793_s0 + $0xd0] sm:$0xff]  ;;  %v35_v37 = vld [vmem:[%s793_s0 + $0xd8] sm:$0xff]  ;;  %v32_v38 = vld [vmem:[%s793_s0 + $0xc0] sm:$0xff] }
   0xa   :  { %v33_v39 = vld [vmem:[%s793_s0 + $0xc8] sm:$0xff]  ;;  %v443_v40 = vmax.f32 %v34_v36, %v35_v37  ;;  %v38_v42 = vld [vmem:[%s793_s0 + $0xf0] sm:$0xff]  ;;  %v39_v43 = vld [vmem:[%s793_s0 + $0xf8] sm:$0xff] }
   0xb   :  { %v447_v41 = vmax.f32 %v32_v38, %v33_v39  ;;  %v36_v44 = vld [vmem:[%s793_s0 + $0xe0] sm:$0xff]  ;;  %v37_v45 = vld [vmem:[%s793_s0 + $0xe8] sm:$0xff]  ;;  %v463_v46 = vmax.f32 %v38_v42, %v39_v43  ;;  %v42_v48 = vld [vmem:[%s793_s0 + $0x110] sm:$0xff] }
   0xc   :  { %146 = vrot.lane.b32.xlu1 %v363_v16, %s302_s22  ;;  %v467_v47 = vmax.f32 %v36_v44, %v37_v45  ;;  %v43_v49 = vld [vmem:[%s793_s0 + $0x118] sm:$0xff]  ;;  %v40_v50 = vld [vmem:[%s793_s0 + $0x100] sm:$0xff]  ;;  %v41_v51 = vld [vmem:[%s793_s0 + $0x108] sm:$0xff] }
   0xd   :  { %144 = vrot.lane.b32.xlu0 %v367_v17, %s302_s22  ;;  %v483_v52 = vmax.f32 %v42_v48, %v43_v49  ;;  %v487_v53 = vmax.f32 %v40_v50, %v41_v51  ;;  %v46_v54 = vld [vmem:[%s793_s0 + $0x130] sm:$0xff]  ;;  %v47_v55 = vld [vmem:[%s793_s0 + $0x138] sm:$0xff]  ;;  %v44_v56 = vld [vmem:[%s793_s0 + $0x120] sm:$0xff] }
   0xe   :  { %v45_v57 = vld [vmem:[%s793_s0 + $0x128] sm:$0xff]  ;;  %v503_v58 = vmax.f32 %v46_v54, %v47_v55  ;;  %v50_v60 = vld [vmem:[%s793_s0 + $0x150] sm:$0xff]  ;;  %v51_v61 = vld [vmem:[%s793_s0 + $0x158] sm:$0xff] }
   0xf   :  { %v507_v59 = vmax.f32 %v44_v56, %v45_v57  ;;  %v48_v62 = vld [vmem:[%s793_s0 + $0x140] sm:$0xff]  ;;  %v49_v63 = vld [vmem:[%s793_s0 + $0x148] sm:$0xff]  ;;  %v523_v0 = vmax.f32 %v50_v60, %v51_v61  ;;  %v54_v2 = vld [vmem:[%s793_s0 + $0x170] sm:$0xff] }
  0x10   :  { %150 = vrot.lane.b32.xlu1 %v383_v22, %s302_s22  ;;  %v527_v1 = vmax.f32 %v48_v62, %v49_v63  ;;  %v55_v4 = vld [vmem:[%s793_s0 + $0x178] sm:$0xff]  ;;  %v52_v5 = vld [vmem:[%s793_s0 + $0x160] sm:$0xff]  ;;  %v53_v6 = vld [vmem:[%s793_s0 + $0x168] sm:$0xff] }
  0x11   :  { %148 = vrot.lane.b32.xlu0 %v387_v23, %s302_s22  ;;  %v543_v8 = vmax.f32 %v54_v2, %v55_v4  ;;  %v547_v9 = vmax.f32 %v52_v5, %v53_v6  ;;  %v58_v12 = vld [vmem:[%s793_s0 + $0x190] sm:$0xff]  ;;  %v59_v13 = vld [vmem:[%s793_s0 + $0x198] sm:$0xff]  ;;  %v56_v14 = vld [vmem:[%s793_s0 + $0x180] sm:$0xff] }
  0x12   :  { %v57_v15 = vld [vmem:[%s793_s0 + $0x188] sm:$0xff]  ;;  %v563_v18 = vmax.f32 %v58_v12, %v59_v13  ;;  %v62_v20 = vld [vmem:[%s793_s0 + $0x1b0] sm:$0xff]  ;;  %v63_v21 = vld [vmem:[%s793_s0 + $0x1b8] sm:$0xff] }
  0x13   :  { %v567_v19 = vmax.f32 %v56_v14, %v57_v15  ;;  %v60_v24 = vld [vmem:[%s793_s0 + $0x1a0] sm:$0xff]  ;;  %v61_v25 = vld [vmem:[%s793_s0 + $0x1a8] sm:$0xff]  ;;  %v583_v26 = vmax.f32 %v62_v20, %v63_v21  ;;  %v66_v30 = vld [vmem:[%s793_s0 + $0x1d0] sm:$0xff] }
  0x14   :  { %154 = vrot.lane.b32.xlu1 %v403_v28, %s302_s22  ;;  %v587_v27 = vmax.f32 %v60_v24, %v61_v25  ;;  %v67_v31 = vld [vmem:[%s793_s0 + $0x1d8] sm:$0xff]  ;;  %v64_v32 = vld [vmem:[%s793_s0 + $0x1c0] sm:$0xff]  ;;  %v65_v33 = vld [vmem:[%s793_s0 + $0x1c8] sm:$0xff] }
  0x15   :  { %152 = vrot.lane.b32.xlu0 %v407_v29, %s302_s22  ;;  %v603_v36 = vmax.f32 %v66_v30, %v67_v31  ;;  %v607_v37 = vmax.f32 %v64_v32, %v65_v33  ;;  %v70_v38 = vld [vmem:[%s793_s0 + $0x1f0] sm:$0xff]  ;;  %v71_v39 = vld [vmem:[%s793_s0 + $0x1f8] sm:$0xff]  ;;  %v68_v42 = vld [vmem:[%s793_s0 + $0x1e0] sm:$0xff] }
  0x16   :  { %v69_v43 = vld [vmem:[%s793_s0 + $0x1e8] sm:$0xff]  ;;  %v623_v44 = vmax.f32 %v70_v38, %v71_v39 }
  0x17   :  { %v627_v45 = vmax.f32 %v68_v42, %v69_v43 }
  0x18   :  { %158 = vrot.lane.b32.xlu1 %v423_v34, %s302_s22 }
  0x19   :  { %156 = vrot.lane.b32.xlu0 %v427_v35, %s302_s22 }
  0x1c   :  { %162 = vrot.lane.b32.xlu1 %v443_v40, %s302_s22 }
  0x1d   :  { %160 = vrot.lane.b32.xlu0 %v447_v41, %s302_s22 }
  0x20   :  { %166 = vrot.lane.b32.xlu1 %v463_v46, %s302_s22 }
  0x21   :  { %164 = vrot.lane.b32.xlu0 %v467_v47, %s302_s22 }
  0x24   :  { %170 = vrot.lane.b32.xlu1 %v483_v52, %s302_s22 }
  0x25   :  { %168 = vrot.lane.b32.xlu0 %v487_v53, %s302_s22 }
  0x28   :  { %174 = vrot.lane.b32.xlu1 %v503_v58, %s302_s22 }
  0x29   :  { %172 = vrot.lane.b32.xlu0 %v507_v59, %s302_s22 }
  0x2c   :  { %178 = vrot.lane.b32.xlu1 %v523_v0, %s302_s22 }
  0x2d   :  { %176 = vrot.lane.b32.xlu0 %v527_v1, %s302_s22 }
  0x30   :  { %182 = vrot.lane.b32.xlu1 %v543_v8, %s302_s22 }
  0x31   :  { %180 = vrot.lane.b32.xlu0 %v547_v9, %s302_s22 }
  0x34   :  { %186 = vrot.lane.b32.xlu1 %v563_v18, %s302_s22 }
  0x35   :  { %184 = vrot.lane.b32.xlu0 %v567_v19, %s302_s22 }
  0x38   :  { %190 = vrot.lane.b32.xlu1 %v583_v26, %s302_s22 }
  0x39   :  { %188 = vrot.lane.b32.xlu0 %v587_v27, %s302_s22 }
  0x3c   :  { %194 = vrot.lane.b32.xlu1 %v603_v36, %s302_s22 }
  0x3d   :  { %192 = vrot.lane.b32.xlu0 %v607_v37, %s302_s22 }
  0x40   :  { %198 = vrot.lane.b32.xlu1 %v623_v44, %s302_s22 }
  0x41   :  { %196 = vrot.lane.b32.xlu0 %v627_v45, %s302_s22 }
  0x76   :  { %v141_v48 = vpop.permute.xlu1 %140 }
  0x77   :  { %v234_v49 = vmax.f32 %v322_v3, %v141_v48  ;;  %v137_v50 = vpop.permute.xlu0 %136 }
  0x78   :  { %v232_v51 = vmax.f32 %v333_v7, %v137_v50 }
  0x79   :  { %267 = vst.msk [vmem:[%s794_s1 + $0x10] sm:$0xff] %vm264_vm0, %v234_v49 }
  0x7a   :  { %265 = vst.msk [vmem:[%s794_s1] sm:$0xff] %vm264_vm0, %v232_v51  ;;  %v143_v54 = vpop.permute.xlu1 %142 }
  0x7b   :  { %v235_v55 = vmax.f32 %v343_v10, %v143_v54  ;;  %v139_v56 = vpop.permute.xlu0 %138 }
  0x7c   :  { %v233_v57 = vmax.f32 %v347_v11, %v139_v56 }
  0x7d   :  { %268 = vst.msk [vmem:[%s794_s1 + $0x18] sm:$0xff] %vm264_vm0, %v235_v55 }
  0x7e   :  { %266 = vst.msk [vmem:[%s794_s1 + $0x8] sm:$0xff] %vm264_vm0, %v233_v57  ;;  %v147_v3 = vpop.permute.xlu1 %146 }
  0x7f   :  { %v237_v7 = vmax.f32 %v363_v16, %v147_v3  ;;  %v145_v60 = vpop.permute.xlu0 %144 }
  0x80   :  { %v236_v61 = vmax.f32 %v367_v17, %v145_v60 }
  0x81   :  { %270 = vst.msk [vmem:[%s794_s1 + $0x28] sm:$0xff] %vm264_vm0, %v237_v7 }
  0x82   :  { %269 = vst.msk [vmem:[%s794_s1 + $0x20] sm:$0xff] %vm264_vm0, %v236_v61  ;;  %v151_v10 = vpop.permute.xlu1 %150 }
  0x83   :  { %v239_v11 = vmax.f32 %v383_v22, %v151_v10  ;;  %v149_v62 = vpop.permute.xlu0 %148 }
  0x84   :  { %v238_v63 = vmax.f32 %v387_v23, %v149_v62 }
  0x85   :  { %272 = vst.msk [vmem:[%s794_s1 + $0x38] sm:$0xff] %vm264_vm0, %v239_v11 }
  0x86   :  { %271 = vst.msk [vmem:[%s794_s1 + $0x30] sm:$0xff] %vm264_vm0, %v238_v63  ;;  %v155_v16 = vpop.permute.xlu1 %154 }
  0x87   :  { %v241_v17 = vmax.f32 %v403_v28, %v155_v16  ;;  %v153_v2 = vpop.permute.xlu0 %152 }
  0x88   :  { %v240_v4 = vmax.f32 %v407_v29, %v153_v2 }
  0x89   :  { %274 = vst.msk [vmem:[%s794_s1 + $0x48] sm:$0xff] %vm264_vm0, %v241_v17 }
  0x8a   :  { %273 = vst.msk [vmem:[%s794_s1 + $0x40] sm:$0xff] %vm264_vm0, %v240_v4  ;;  %v159_v22 = vpop.permute.xlu1 %158 }
  0x8b   :  { %v243_v23 = vmax.f32 %v423_v34, %v159_v22  ;;  %v157_v5 = vpop.permute.xlu0 %156 }
  0x8c   :  { %v242_v6 = vmax.f32 %v427_v35, %v157_v5 }
  0x8d   :  { %276 = vst.msk [vmem:[%s794_s1 + $0x58] sm:$0xff] %vm264_vm0, %v243_v23 }
  0x8e   :  { %275 = vst.msk [vmem:[%s794_s1 + $0x50] sm:$0xff] %vm264_vm0, %v242_v6  ;;  %v163_v28 = vpop.permute.xlu1 %162 }
  0x8f   :  { %v245_v29 = vmax.f32 %v443_v40, %v163_v28  ;;  %v161_v12 = vpop.permute.xlu0 %160 }
  0x90   :  { %v244_v13 = vmax.f32 %v447_v41, %v161_v12 }
  0x91   :  { %278 = vst.msk [vmem:[%s794_s1 + $0x68] sm:$0xff] %vm264_vm0, %v245_v29 }
  0x92   :  { %277 = vst.msk [vmem:[%s794_s1 + $0x60] sm:$0xff] %vm264_vm0, %v244_v13  ;;  %v167_v34 = vpop.permute.xlu1 %166 }
  0x93   :  { %v247_v35 = vmax.f32 %v463_v46, %v167_v34  ;;  %v165_v14 = vpop.permute.xlu0 %164 }
  0x94   :  { %v246_v15 = vmax.f32 %v467_v47, %v165_v14 }
  0x95   :  { %280 = vst.msk [vmem:[%s794_s1 + $0x78] sm:$0xff] %vm264_vm0, %v247_v35 }
  0x96   :  { %279 = vst.msk [vmem:[%s794_s1 + $0x70] sm:$0xff] %vm264_vm0, %v246_v15  ;;  %v171_v40 = vpop.permute.xlu1 %170 }
  0x97   :  { %v249_v41 = vmax.f32 %v483_v52, %v171_v40  ;;  %v169_v20 = vpop.permute.xlu0 %168 }
  0x98   :  { %v248_v21 = vmax.f32 %v487_v53, %v169_v20 }
  0x99   :  { %282 = vst.msk [vmem:[%s794_s1 + $0x88] sm:$0xff] %vm264_vm0, %v249_v41 }
  0x9a   :  { %281 = vst.msk [vmem:[%s794_s1 + $0x80] sm:$0xff] %vm264_vm0, %v248_v21  ;;  %v175_v46 = vpop.permute.xlu1 %174 }
  0x9b   :  { %v251_v47 = vmax.f32 %v503_v58, %v175_v46  ;;  %v173_v24 = vpop.permute.xlu0 %172 }
  0x9c   :  { %v250_v25 = vmax.f32 %v507_v59, %v173_v24 }
  0x9d   :  { %284 = vst.msk [vmem:[%s794_s1 + $0x98] sm:$0xff] %vm264_vm0, %v251_v47 }
  0x9e   :  { %283 = vst.msk [vmem:[%s794_s1 + $0x90] sm:$0xff] %vm264_vm0, %v250_v25  ;;  %v179_v52 = vpop.permute.xlu1 %178 }
  0x9f   :  { %v253_v53 = vmax.f32 %v523_v0, %v179_v52  ;;  %v177_v30 = vpop.permute.xlu0 %176 }
  0xa0   :  { %v252_v31 = vmax.f32 %v527_v1, %v177_v30 }
  0xa1   :  { %286 = vst.msk [vmem:[%s794_s1 + $0xa8] sm:$0xff] %vm264_vm0, %v253_v53 }
  0xa2   :  { %285 = vst.msk [vmem:[%s794_s1 + $0xa0] sm:$0xff] %vm264_vm0, %v252_v31  ;;  %v183_v58 = vpop.permute.xlu1 %182 }
  0xa3   :  { %v255_v59 = vmax.f32 %v543_v8, %v183_v58  ;;  %v181_v32 = vpop.permute.xlu0 %180 }
  0xa4   :  { %v254_v33 = vmax.f32 %v547_v9, %v181_v32 }
  0xa5   :  { %288 = vst.msk [vmem:[%s794_s1 + $0xb8] sm:$0xff] %vm264_vm0, %v255_v59 }
  0xa6   :  { %287 = vst.msk [vmem:[%s794_s1 + $0xb0] sm:$0xff] %vm264_vm0, %v254_v33  ;;  %v187_v0 = vpop.permute.xlu1 %186 }
  0xa7   :  { %v257_v1 = vmax.f32 %v563_v18, %v187_v0  ;;  %v185_v38 = vpop.permute.xlu0 %184 }
  0xa8   :  { %v256_v39 = vmax.f32 %v567_v19, %v185_v38 }
  0xa9   :  { %290 = vst.msk [vmem:[%s794_s1 + $0xc8] sm:$0xff] %vm264_vm0, %v257_v1 }
  0xaa   :  { %289 = vst.msk [vmem:[%s794_s1 + $0xc0] sm:$0xff] %vm264_vm0, %v256_v39  ;;  %v191_v8 = vpop.permute.xlu1 %190 }
  0xab   :  { %v259_v9 = vmax.f32 %v583_v26, %v191_v8  ;;  %v189_v42 = vpop.permute.xlu0 %188 }
  0xac   :  { %v258_v43 = vmax.f32 %v587_v27, %v189_v42 }
  0xad   :  { %292 = vst.msk [vmem:[%s794_s1 + $0xd8] sm:$0xff] %vm264_vm0, %v259_v9 }
  0xae   :  { %291 = vst.msk [vmem:[%s794_s1 + $0xd0] sm:$0xff] %vm264_vm0, %v258_v43  ;;  %v195_v18 = vpop.permute.xlu1 %194 }
  0xaf   :  { %v261_v19 = vmax.f32 %v603_v36, %v195_v18  ;;  %v193_v48 = vpop.permute.xlu0 %192 }
  0xb0   :  { %v260_v49 = vmax.f32 %v607_v37, %v193_v48 }
  0xb1   :  { %294 = vst.msk [vmem:[%s794_s1 + $0xe8] sm:$0xff] %vm264_vm0, %v261_v19 }
  0xb2   :  { %293 = vst.msk [vmem:[%s794_s1 + $0xe0] sm:$0xff] %vm264_vm0, %v260_v49  ;;  %v199_v26 = vpop.permute.xlu1 %198 }
  0xb3   :  { %v263_v27 = vmax.f32 %v623_v44, %v199_v26  ;;  %v197_v50 = vpop.permute.xlu0 %196 }
  0xb4   :  { %v262_v51 = vmax.f32 %v627_v45, %v197_v50 }
  0xb5   :  { %296 = vst.msk [vmem:[%s794_s1 + $0xf8] sm:$0xff] %vm264_vm0, %v263_v27 }
  0xb6   :  { %295 = vst.msk [vmem:[%s794_s1 + $0xf0] sm:$0xff] %vm264_vm0, %v262_v51 }

// kernel: glnet_forward.9
= control target key start
LH: loop header
LB: loop body
LE: loop exit
PB: predicated region body
PF: predicated region fallthrough
CT: control target
= control target key end

     0   :  { %s2651_s15 = smov 0   ;;  %s2994_s0 = inlined_call_operand.vmem [shape: bf16[1024,108], index: 0, kind: input, shape index: {}]   ;;  %s2995_s1 = inlined_call_operand.vmem [shape: bf16[108,8], index: 1, kind: input, shape index: {}]   ;;  %s2996_s2 = inlined_call_operand.vmem [shape: bf16[1024,108], index: 2, kind: input, shape index: {}]   ;;  %s2997_s3 = inlined_call_operand.vmem [shape: bf16[108,8], index: 3, kind: input, shape index: {}]   ;;  %s2998_s4 = inlined_call_operand.vmem [shape: f32[1024,8], index: 4, kind: output, shape index: {}]  }
   0x1 LB: > { %s2141_s16 = sadd.s32 4294967295, %s2624_s15   ;;  %p2145_p0 = scmp.ge.s32.totalorder %s2624_s15, 1  ;;  %s2624_s15 = sphi %s2651_s15, %s14_s15  }
   0x2   : > { %p174_p1 = scmp.lt.s32.totalorder %s2624_s15, 3 }
   0x4   : > { %p175_p2 = pnand %p2145_p0, %p174_p1 }
   0x5   : > { %v2540_v0 = vld [vmem:[%s2995_s1] sm:$0xff] (!%p175_p2)   ;;  %s2146_s21 = sshll.u32 (!%p175_p2), %s2141_s16, 6  ;;  %v2542_v2 = vld [vmem:[%s2995_s1 + $0x8] sm:$0xff] (!%p175_p2)   ;;  %v2544_v4 = vld [vmem:[%s2995_s1 + $0x10] sm:$0xff] (!%p175_p2)   ;;  %vm503_vm0 = vcmask (!%p175_p2), 883712   ;;  %vm600_vm1 = vcmask (!%p175_p2), 1045504  }
   0x6   : > { %178 = sbr.rel (%p175_p2) target bundleno = 378 (0x17a), region = 36  ;;  %v2541_v1 = vld [vmem:[%s2997_s3] sm:$0xff] (!%p175_p2)   ;;  %2374 = vmatprep.subr.bf16.mxu0 (!%p175_p2), %v2540_v0  ;;  %p206_p3 = scmp.lt.s32.totalorder (!%p175_p2), %s2146_s21, 127  ;;  %v2543_v3 = vld [vmem:[%s2997_s3 + $0x8] sm:$0xff] (!%p175_p2)   ;;  %v2545_v5 = vld [vmem:[%s2997_s3 + $0x10] sm:$0xff] (!%p175_p2)   ;;  %vm2008_vm5 = vcmask (!%p175_p2), 64512  }
   0x7   : > { %2452 = vmatprep.subr.bf16.mxu1 (!%p175_p2), %v2541_v1  ;;  %2375 = vmatpush3.bf16.msra.mxu0 (!%p175_p2), %v2540_v0  ;;  %v2546_v6 = vld [vmem:[%s2995_s1 + $0x18] sm:$0xff] (!%p175_p2)   ;;  %v2548_v8 = vld [vmem:[%s2995_s1 + $0x20] sm:$0xff] (!%p175_p2)   ;;  %v2550_v12 = vld [vmem:[%s2995_s1 + $0x28] sm:$0xff] (!%p175_p2)  }
   0x8   : > { %2453 = vmatpush3.bf16.msra.mxu1 (!%p175_p2), %v2541_v1  ;;  %2376 = vmatprep.subr.bf16.mxu0 (!%p175_p2), %v2542_v2  ;;  %v2547_v7 = vld [vmem:[%s2997_s3 + $0x18] sm:$0xff] (!%p175_p2)   ;;  %v2549_v9 = vld [vmem:[%s2997_s3 + $0x20] sm:$0xff] (!%p175_p2)   ;;  %v2551_v13 = vld [vmem:[%s2997_s3 + $0x28] sm:$0xff] (!%p175_p2)  }
   0x9   : > { %2454 = vmatprep.subr.bf16.mxu1 (!%p175_p2), %v2543_v3  ;;  %v2552_v14 = vld [vmem:[%s2995_s1 + $0x30] sm:$0x3f] (!%p175_p2)  }
   0xa   : > { %v2553_v15 = vld [vmem:[%s2997_s3 + $0x30] sm:$0x3f] (!%p175_p2)   ;;  %v602_v16 = vsel (!%p175_p2), %vm600_vm1, %v2552_v14, 0 }
   0xb   : > { %2377 = vmatpush3.bf16.msra.mxu0 (!%p175_p2), %v2542_v2  ;;  %v1269_v17 = vsel (!%p175_p2), %vm600_vm1, %v2553_v15, 0 }
   0xc   : > { %2455 = vmatpush3.bf16.msra.mxu1 (!%p175_p2), %v2543_v3  ;;  %2378 = vmatprep.subr.bf16.mxu0 (!%p175_p2), %v2544_v4 }
   0xd   : > { %s3000_s21 = smov (!%p206_p3, %s2146_s21), 127  ;;  %2456 = vmatprep.subr.bf16.mxu1 %v2545_v5 }
   0xe   : > { %s2147_s6 = sshll.u32 %s3000_s21, 2  ;;  %s2151_s29 = sshll.u32 %s3000_s21, 3 }
   0xf   : > { %2379 = vmatpush3.bf16.msra.mxu0 %v2544_v4  ;;  %s2689_s11 = scalar_lea.vmem %s2994_s0, %s2147_s6  ;;  %s2697_s17 = scalar_lea.vmem %s2996_s2, %s2147_s6 }
  0x10   : > { %2457 = vmatpush3.bf16.msra.mxu1 %v2545_v5  ;;  %2380 = vmatprep.subr.bf16.mxu0 %v2546_v6  ;;  %v2554_v10 = vld [vmem:[%s2689_s11] sm:$0xff]   ;;  %v2556_v18 = vld [vmem:[%s2689_s11 + $0x8] sm:$0xff]   ;;  %v2558_v20 = vld [vmem:[%s2689_s11 + $0x10] sm:$0xff]   ;;  %s2846_s6 = scalar_lea.vmem %s2998_s4, %s2151_s29 }
  0x11   : > { %2458 = vmatprep.subr.bf16.mxu1 %v2547_v7  ;;  %v2555_v11 = vld [vmem:[%s2697_s17] sm:$0xff]   ;;  %2388 = vmatprep.mubr.msk.bf16.mxu0 %vm503_vm0, %v2554_v10  ;;  %v2557_v19 = vld [vmem:[%s2697_s17 + $0x8] sm:$0xff]   ;;  %v2559_v21 = vld [vmem:[%s2697_s17 + $0x10] sm:$0xff]  }
  0x12   : > { %2466 = vmatprep.mubr.msk.bf16.mxu1 %vm503_vm0, %v2555_v11  ;;  %v2560_v22 = vld [vmem:[%s2689_s11 + $0x18] sm:$0xff]   ;;  %v2562_v24 = vld [vmem:[%s2689_s11 + $0x20] sm:$0xff]   ;;  %v2564_v26 = vld [vmem:[%s2689_s11 + $0x28] sm:$0xff]  }
  0x13   : > { %2381 = vmatpush3.bf16.msra.mxu0 %v2546_v6  ;;  %v2561_v23 = vld [vmem:[%s2697_s17 + $0x18] sm:$0xff]   ;;  %v2563_v25 = vld [vmem:[%s2697_s17 + $0x20] sm:$0xff]   ;;  %v2565_v27 = vld [vmem:[%s2697_s17 + $0x28] sm:$0xff]  }
  0x14   : > { %2459 = vmatpush3.bf16.msra.mxu1 %v2547_v7  ;;  %2382 = vmatprep.subr.bf16.mxu0 %v2548_v8  ;;  %v2566_v28 = vld [vmem:[%s2689_s11 + $0x30] sm:$0xff]   ;;  %v2568_v30 = vld [vmem:[%s2689_s11 + $0x38] sm:$0xff]   ;;  %v2570_v32 = vld [vmem:[%s2689_s11 + $0x40] sm:$0xff]  }
  0x15   : > { %2460 = vmatprep.subr.bf16.mxu1 %v2549_v9  ;;  %v2567_v29 = vld [vmem:[%s2697_s17 + $0x30] sm:$0xff]   ;;  %v2569_v31 = vld [vmem:[%s2697_s17 + $0x38] sm:$0xff]   ;;  %v2571_v33 = vld [vmem:[%s2697_s17 + $0x40] sm:$0xff]  }
  0x16   : > { %v2572_v34 = vld [vmem:[%s2689_s11 + $0x48] sm:$0xff]   ;;  %v2574_v36 = vld [vmem:[%s2689_s11 + $0x50] sm:$0xff]   ;;  %v2576_v38 = vld [vmem:[%s2689_s11 + $0x58] sm:$0xff]  }
  0x17   : > { %2383 = vmatpush3.bf16.msra.mxu0 %v2548_v8  ;;  %v2573_v35 = vld [vmem:[%s2697_s17 + $0x48] sm:$0xff]   ;;  %v2575_v37 = vld [vmem:[%s2697_s17 + $0x50] sm:$0xff]   ;;  %v2577_v39 = vld [vmem:[%s2697_s17 + $0x58] sm:$0xff]  }
  0x18   : > { %2461 = vmatpush3.bf16.msra.mxu1 %v2549_v9  ;;  %2384 = vmatprep.subr.bf16.mxu0 %v2550_v12  ;;  %v2578_v40 = vld [vmem:[%s2689_s11 + $0x60] sm:$0xff]   ;;  %v2580_v42 = vld [vmem:[%s2689_s11 + $0x68] sm:$0xff]   ;;  %v2582_v44 = vld [vmem:[%s2689_s11 + $0x70] sm:$0xff]  }
  0x19   : > { %2462 = vmatprep.subr.bf16.mxu1 %v2551_v13  ;;  %v2579_v41 = vld [vmem:[%s2697_s17 + $0x60] sm:$0xff]   ;;  %v2581_v43 = vld [vmem:[%s2697_s17 + $0x68] sm:$0xff]   ;;  %v2583_v45 = vld [vmem:[%s2697_s17 + $0x70] sm:$0xff]  }
  0x1a   : > { %v2584_v46 = vld [vmem:[%s2689_s11 + $0x78] sm:$0xff]   ;;  %v2586_v48 = vld [vmem:[%s2689_s11 + $0x80] sm:$0xff]   ;;  %v2588_v50 = vld [vmem:[%s2689_s11 + $0x88] sm:$0xff]  }
  0x1b   : > { %2385 = vmatpush3.bf16.msra.mxu0 %v2550_v12  ;;  %v2585_v47 = vld [vmem:[%s2697_s17 + $0x78] sm:$0xff]   ;;  %v2587_v49 = vld [vmem:[%s2697_s17 + $0x80] sm:$0xff]   ;;  %v2589_v51 = vld [vmem:[%s2697_s17 + $0x88] sm:$0xff]  }
  0x1c   : > { %2463 = vmatpush3.bf16.msra.mxu1 %v2551_v13  ;;  %2530 = vmatprep.subr.msk.bf16.mxu0 %vm600_vm1, %v2552_v14  ;;  %v2590_v52 = vld [vmem:[%s2689_s11 + $0x90] sm:$0xff]   ;;  %v2592_v54 = vld [vmem:[%s2689_s11 + $0x98] sm:$0xff]   ;;  %v2594_v56 = vld [vmem:[%s2689_s11 + $0xa0] sm:$0xff]  }
  0x1d   : > { %2531 = vmatprep.subr.msk.bf16.mxu1 %vm600_vm1, %v2553_v15  ;;  %v2591_v53 = vld [vmem:[%s2697_s17 + $0x90] sm:$0xff]   ;;  %v2593_v55 = vld [vmem:[%s2697_s17 + $0x98] sm:$0xff]   ;;  %v2595_v57 = vld [vmem:[%s2697_s17 + $0xa0] sm:$0xff]  }
  0x1e   : > { %v2596_v58 = vld [vmem:[%s2689_s11 + $0xa8] sm:$0xff]   ;;  %v2598_v60 = vld [vmem:[%s2689_s11 + $0xb0] sm:$0xff]   ;;  %v2600_v62 = vld [vmem:[%s2689_s11 + $0xb8] sm:$0xff]  }
  0x1f   : > { %2387 = vmatpush3.bf16.msra.mxu0 %v602_v16  ;;  %v2597_v59 = vld [vmem:[%s2697_s17 + $0xa8] sm:$0xff]   ;;  %v2599_v61 = vld [vmem:[%s2697_s17 + $0xb0] sm:$0xff]   ;;  %v2601_v63 = vld [vmem:[%s2697_s17 + $0xb8] sm:$0xff]  }
  0x20   : > { %2465 = vmatpush3.bf16.msra.mxu1 %v1269_v17  ;;  %v2602_v0 = vld [vmem:[%s2689_s11 + $0xc0] sm:$0xff]   ;;  %v2604_v2 = vld [vmem:[%s2689_s11 + $0xc8] sm:$0xff]   ;;  %v2606_v4 = vld [vmem:[%s2689_s11 + $0xd0] sm:$0xff]  }
  0x21   : > { %v2603_v1 = vld [vmem:[%s2697_s17 + $0xc0] sm:$0xff]   ;;  %v2605_v3 = vld [vmem:[%s2697_s17 + $0xc8] sm:$0xff]   ;;  %v2607_v5 = vld [vmem:[%s2697_s17 + $0xd0] sm:$0xff]  }
  0x22   : > { %2389 = vmatmul.mubr.msk.bf16.vlgmr.msra.gmra.mrb[0].mxu0 %vm503_vm0, %v2556_v18  ;;  %v2608_v6 = vld [vmem:[%s2689_s11 + $0xd8] sm:$0xff]   ;;  %v2610_v8 = vld [vmem:[%s2689_s11 + $0xe0] sm:$0xff]   ;;  %v2612_v10 = vld [vmem:[%s2689_s11 + $0xe8] sm:$0xff]  }
  0x23   : > { %2467 = vmatmul.mubr.msk.bf16.vlgmr.msra.gmra.mrb[0].mxu1 %vm503_vm0, %v2557_v19  ;;  %2392 = vmatprep.mubr.msk.bf16.mxu0 %vm503_vm0, %v2558_v20  ;;  %v2609_v7 = vld [vmem:[%s2697_s17 + $0xd8] sm:$0xff]   ;;  %v2611_v9 = vld [vmem:[%s2697_s17 + $0xe0] sm:$0xff]   ;;  %v2613_v11 = vld [vmem:[%s2697_s17 + $0xe8] sm:$0xff]  }
  0x24   : > { %2470 = vmatprep.mubr.msk.bf16.mxu1 %vm503_vm0, %v2559_v21  ;;  %v2614_v12 = vld [vmem:[%s2689_s11 + $0xf0] sm:$0xff]   ;;  %v2616_v14 = vld [vmem:[%s2689_s11 + $0xf8] sm:$0xff]  }
  0x25   : > { %v2615_v13 = vld [vmem:[%s2697_s17 + $0xf0] sm:$0xff]   ;;  %v2617_v15 = vld [vmem:[%s2697_s17 + $0xf8] sm:$0xff]  }
  0x2a   : > { %2393 = vmatmul.mubr.msk.bf16.gmra.mrb[4].mxu0 %vm503_vm0, %v2560_v22 }
  0x2b   : > { %2471 = vmatmul.mubr.msk.bf16.gmra.mrb[4].mxu1 %vm503_vm0, %v2561_v23  ;;  %2396 = vmatprep.mubr.msk.bf16.mxu0 %vm503_vm0, %v2562_v24 }
  0x2c   : > { %2474 = vmatprep.mubr.msk.bf16.mxu1 %vm503_vm0, %v2563_v25 }
  0x32   : > { %2397 = vmatmul.mubr.msk.bf16.gmra.mrb[8].mxu0 %vm503_vm0, %v2564_v26 }
  0x33   : > { %2475 = vmatmul.mubr.msk.bf16.gmra.mrb[8].mxu1 %vm503_vm0, %v2565_v27  ;;  %2400 = vmatprep.mubr.msk.bf16.mxu0 %vm503_vm0, %v2566_v28 }
  0x34   : > { %2478 = vmatprep.mubr.msk.bf16.mxu1 %vm503_vm0, %v2567_v29 }
  0x3a   : > { %2401 = vmatmul.mubr.msk.bf16.gmra.mrb[12].mxu0 %vm503_vm0, %v2568_v30 }
  0x3b   : > { %2479 = vmatmul.mubr.msk.bf16.gmra.mrb[12].mxu1 %vm503_vm0, %v2569_v31  ;;  %2404 = vmatprep.mubr.msk.bf16.mxu0 %vm503_vm0, %v2570_v32 }
  0x3c   : > { %2482 = vmatprep.mubr.msk.bf16.mxu1 %vm503_vm0, %v2571_v33 }
  0x42   : > { %2405 = vmatmul.mubr.msk.bf16.gmra.mrb[16].mxu0 %vm503_vm0, %v2572_v34 }
  0x43   : > { %2483 = vmatmul.mubr.msk.bf16.gmra.mrb[16].mxu1 %vm503_vm0, %v2573_v35  ;;  %2408 = vmatprep.mubr.msk.bf16.mxu0 %vm503_vm0, %v2574_v36 }
  0x44   : > { %2486 = vmatprep.mubr.msk.bf16.mxu1 %vm503_vm0, %v2575_v37 }
  0x4a   : > { %2409 = vmatmul.mubr.msk.bf16.gmra.mrb[20].mxu0 %vm503_vm0, %v2576_v38 }
  0x4b   : > { %2487 = vmatmul.mubr.msk.bf16.gmra.mrb[20].mxu1 %vm503_vm0, %v2577_v39  ;;  %2412 = vmatprep.mubr.msk.bf16.mxu0 %vm503_vm0, %v2578_v40 }
  0x4c   : > { %2490 = vmatprep.mubr.msk.bf16.mxu1 %vm503_vm0, %v2579_v41 }
  0x52   : > { %2413 = vmatmul.mubr.msk.bf16.gmra.mrb[24].mxu0 %vm503_vm0, %v2580_v42 }
  0x53   : > { %2491 = vmatmul.mubr.msk.bf16.gmra.mrb[24].mxu1 %vm503_vm0, %v2581_v43  ;;  %2416 = vmatprep.mubr.msk.bf16.mxu0 %vm503_vm0, %v2582_v44 }
  0x54   : > { %2494 = vmatprep.mubr.msk.bf16.mxu1 %vm503_vm0, %v2583_v45 }
  0x5a   : > { %2417 = vmatmul.mubr.msk.bf16.gmra.mrb[28].mxu0 %vm503_vm0, %v2584_v46 }
  0x5b   : > { %2495 = vmatmul.mubr.msk.bf16.gmra.mrb[28].mxu1 %vm503_vm0, %v2585_v47  ;;  %2420 = vmatprep.mubr.msk.bf16.mxu0 %vm503_vm0, %v2586_v48 }
  0x5c   : > { %2498 = vmatprep.mubr.msk.bf16.mxu1 %vm503_vm0, %v2587_v49 }
  0x62   : > { %2421 = vmatmul.mubr.msk.bf16.gmra.mrb[32].mxu0 %vm503_vm0, %v2588_v50 }
  0x63   : > { %2499 = vmatmul.mubr.msk.bf16.gmra.mrb[32].mxu1 %vm503_vm0, %v2589_v51  ;;  %2424 = vmatprep.mubr.msk.bf16.mxu0 %vm503_vm0, %v2590_v52 }
  0x64   : > { %2502 = vmatprep.mubr.msk.bf16.mxu1 %vm503_vm0, %v2591_v53 }
  0x6a   : > { %2425 = vmatmul.mubr.msk.bf16.gmra.mrb[36].mxu0 %vm503_vm0, %v2592_v54 }
  0x6b   : > { %2503 = vmatmul.mubr.msk.bf16.gmra.mrb[36].mxu1 %vm503_vm0, %v2593_v55  ;;  %2428 = vmatprep.mubr.msk.bf16.mxu0 %vm503_vm0, %v2594_v56 }
  0x6c   : > { %2506 = vmatprep.mubr.msk.bf16.mxu1 %vm503_vm0, %v2595_v57 }
  0x72   : > { %2429 = vmatmul.mubr.msk.bf16.gmra.mrb[40].mxu0 %vm503_vm0, %v2596_v58 }
  0x73   : > { %2507 = vmatmul.mubr.msk.bf16.gmra.mrb[40].mxu1 %vm503_vm0, %v2597_v59  ;;  %2432 = vmatprep.mubr.msk.bf16.mxu0 %vm503_vm0, %v2598_v60 }
  0x74   : > { %2510 = vmatprep.mubr.msk.bf16.mxu1 %vm503_vm0, %v2599_v61 }
  0x7a   : > { %2433 = vmatmul.mubr.msk.bf16.gmra.mrb[44].mxu0 %vm503_vm0, %v2600_v62 }
  0x7b   : > { %2511 = vmatmul.mubr.msk.bf16.gmra.mrb[44].mxu1 %vm503_vm0, %v2601_v63  ;;  %2436 = vmatprep.mubr.msk.bf16.mxu0 %vm503_vm0, %v2602_v0 }
  0x7c   : > { %2514 = vmatprep.mubr.msk.bf16.mxu1 %vm503_vm0, %v2603_v1 }
  0x82   : > { %2437 = vmatmul.mubr.msk.bf16.gmra.mrb[48].mxu0 %vm503_vm0, %v2604_v2 }
  0x83   : > { %2515 = vmatmul.mubr.msk.bf16.gmra.mrb[48].mxu1 %vm503_vm0, %v2605_v3  ;;  %2440 = vmatprep.mubr.msk.bf16.mxu0 %vm503_vm0, %v2606_v4 }
  0x84   : > { %2518 = vmatprep.mubr.msk.bf16.mxu1 %vm503_vm0, %v2607_v5 }
  0x8a   : > { %2441 = vmatmul.mubr.msk.bf16.gmra.mrb[52].mxu0 %vm503_vm0, %v2608_v6 }
  0x8b   : > { %2519 = vmatmul.mubr.msk.bf16.gmra.mrb[52].mxu1 %vm503_vm0, %v2609_v7  ;;  %2444 = vmatprep.mubr.msk.bf16.mxu0 %vm503_vm0, %v2610_v8 }
  0x8c   : > { %2522 = vmatprep.mubr.msk.bf16.mxu1 %vm503_vm0, %v2611_v9 }
  0x92   : > { %2445 = vmatmul.mubr.msk.bf16.gmra.mrb[56].mxu0 %vm503_vm0, %v2612_v10 }
  0x93   : > { %2523 = vmatmul.mubr.msk.bf16.gmra.mrb[56].mxu1 %vm503_vm0, %v2613_v11  ;;  %2448 = vmatprep.mubr.msk.bf16.mxu0 %vm503_vm0, %v2614_v12 }
  0x94   : > { %2526 = vmatprep.mubr.msk.bf16.mxu1 %vm503_vm0, %v2615_v13 }
  0x9a   : > { %2449 = vmatmul.mubr.msk.bf16.gmra.mrb[60].mxu0 %vm503_vm0, %v2616_v14 }
  0x9b   : > { %2527 = vmatmul.mubr.msk.bf16.gmra.mrb[60].mxu1 %vm503_vm0, %v2617_v15 }
  0xf5   : > { %v2390_v16 = vpop.f32.mrb[0].mxu0 }
  0xf6   : > { %vm1562_vm2 = vcmp.ge.f32.partialorder %v2390_v16, 0.0  ;;  %v1626_v17 = vmul.f32 0.01, %v2390_v16  ;;  %v2468_v18 = vpop.f32.mrb[0].mxu1  ;;  %v638_v19 = vpop.f32.mrb[1].mxu0 }
  0xf7   : > { %vm1754_vm3 = vcmp.ge.f32.partialorder %v2468_v18, 0.0  ;;  %v1818_v20 = vmul.f32 0.01, %v2468_v18  ;;  %vm1560_vm4 = vcmp.ge.f32.partialorder %v638_v19, 0.0  ;;  %v1624_v21 = vmul.f32 0.01, %v638_v19 }
  0xf8   : > { %v1690_v22 = vsel %vm1562_vm2, %v2390_v16, %v1626_v17  ;;  %v1305_v23 = vpop.f32.mrb[1].mxu1  ;;  %v2391_v24 = vpop.f32.mrb[2].mxu0 }
  0xf9   : > { %v1882_v25 = vsel %vm1754_vm3, %v2468_v18, %v1818_v20  ;;  %v1688_v26 = vsel %vm1560_vm4, %v638_v19, %v1624_v21  ;;  %vm1752_vm6 = vcmp.ge.f32.partialorder %v1305_v23, 0.0  ;;  %v1816_v27 = vmul.f32 0.01, %v1305_v23  ;;  %v2469_v28 = vpop.f32.mrb[2].mxu1  ;;  %v641_v29 = vpop.f32.mrb[3].mxu0 }
  0xfa   : > { %v1946_v30 = vadd.f32 %v1882_v25, %v1690_v22  ;;  %vm1563_vm7 = vcmp.ge.f32.partialorder %v2391_v24, 0.0  ;;  %v1627_v31 = vmul.f32 0.01, %v2391_v24  ;;  %vm1755_vm8 = vcmp.ge.f32.partialorder %v2469_v28, 0.0  ;;  %v1308_v32 = vpop.f32.mrb[3].mxu1 }
  0xfb   : > { %v1880_v33 = vsel %vm1752_vm6, %v1305_v23, %v1816_v27  ;;  %v1819_v34 = vmul.f32 0.01, %v2469_v28  ;;  %vm1561_vm9 = vcmp.ge.f32.partialorder %v641_v29, 0.0  ;;  %v1625_v35 = vmul.f32 0.01, %v641_v29 }
  0xfc   : > { %2011 = vst.msk [vmem:[%s2846_s6 + $0x10] sm:$0xff] %vm2008_vm5, %v1946_v30  ;;  %v1944_v36 = vadd.f32 %v1880_v33, %v1688_v26  ;;  %v1691_v37 = vsel %vm1563_vm7, %v2391_v24, %v1627_v31  ;;  %vm1753_vm10 = vcmp.ge.f32.partialorder %v1308_v32, 0.0  ;;  %v1817_v38 = vmul.f32 0.01, %v1308_v32 }
  0xfd   : > { %v1883_v39 = vsel %vm1755_vm8, %v2469_v28, %v1819_v34  ;;  %v1689_v40 = vsel %vm1561_vm9, %v641_v29, %v1625_v35  ;;  %v2394_v41 = vpop.f32.mrb[4].mxu0 }
  0xfe   : > { %2009 = vst.msk [vmem:[%s2846_s6] sm:$0xff] %vm2008_vm5, %v1944_v36  ;;  %v1947_v42 = vadd.f32 %v1883_v39, %v1691_v37  ;;  %v1881_v43 = vsel %vm1753_vm10, %v1308_v32, %v1817_v38  ;;  %vm1566_vm11 = vcmp.ge.f32.partialorder %v2394_v41, 0.0  ;;  %v1630_v44 = vmul.f32 0.01, %v2394_v41  ;;  %v2472_v45 = vpop.f32.mrb[4].mxu1  ;;  %v654_v46 = vpop.f32.mrb[5].mxu0 }
  0xff   : > { %v1945_v47 = vadd.f32 %v1881_v43, %v1689_v40  ;;  %vm1758_vm12 = vcmp.ge.f32.partialorder %v2472_v45, 0.0  ;;  %v1822_v48 = vmul.f32 0.01, %v2472_v45  ;;  %vm1564_vm13 = vcmp.ge.f32.partialorder %v654_v46, 0.0  ;;  %v1321_v49 = vpop.f32.mrb[5].mxu1  ;;  %v2395_v50 = vpop.f32.mrb[6].mxu0 }
 0x100   : > { %2012 = vst.msk [vmem:[%s2846_s6 + $0x18] sm:$0xff] %vm2008_vm5, %v1947_v42  ;;  %v1694_v51 = vsel %vm1566_vm11, %v2394_v41, %v1630_v44  ;;  %v1628_v52 = vmul.f32 0.01, %v654_v46  ;;  %vm1756_vm14 = vcmp.ge.f32.partialorder %v1321_v49, 0.0  ;;  %v1820_v53 = vmul.f32 0.01, %v1321_v49 }
 0x101   : > { %v2473_v54 = vpop.f32.mrb[6].mxu1  ;;  %2010 = vst.msk [vmem:[%s2846_s6 + $0x8] sm:$0xff] %vm2008_vm5, %v1945_v47  ;;  %v1886_v55 = vsel %vm1758_vm12, %v2472_v45, %v1822_v48  ;;  %vm1567_vm15 = vcmp.ge.f32.partialorder %v2395_v50, 0.0  ;;  %v1631_v56 = vmul.f32 0.01, %v2395_v50  ;;  %v657_v57 = vpop.f32.mrb[7].mxu0 }
 0x102   : > { %vm1759_vm0 = vcmp.ge.f32.partialorder %v2473_v54, 0.0  ;;  %v1324_v58 = vpop.f32.mrb[7].mxu1  ;;  %v1950_v59 = vadd.f32 %v1886_v55, %v1694_v51  ;;  %v1692_v60 = vsel %vm1564_vm13, %v654_v46, %v1628_v52  ;;  %v1884_v61 = vsel %vm1756_vm14, %v1321_v49, %v1820_v53 }
 0x103   : > { %v1823_v62 = vmul.f32 0.01, %v2473_v54  ;;  %v1948_v63 = vadd.f32 %v1884_v61, %v1692_v60  ;;  %v1695_v0 = vsel %vm1567_vm15, %v2395_v50, %v1631_v56  ;;  %vm1565_vm1 = vcmp.ge.f32.partialorder %v657_v57, 0.0 }
 0x104   : > { %v1629_v1 = vmul.f32 0.01, %v657_v57  ;;  %2015 = vst.msk [vmem:[%s2846_s6 + $0x30] sm:$0xff] %vm2008_vm5, %v1950_v59  ;;  %vm1757_vm2 = vcmp.ge.f32.partialorder %v1324_v58, 0.0  ;;  %v1821_v3 = vmul.f32 0.01, %v1324_v58 }
 0x105   : > { %v1887_v2 = vsel %vm1759_vm0, %v2473_v54, %v1823_v62  ;;  %2013 = vst.msk [vmem:[%s2846_s6 + $0x20] sm:$0xff] %vm2008_vm5, %v1948_v63  ;;  %v2398_v6 = vpop.f32.mrb[8].mxu0 }
 0x106   : > { %v1951_v4 = vadd.f32 %v1887_v2, %v1695_v0  ;;  %v1693_v5 = vsel %vm1565_vm1, %v657_v57, %v1629_v1  ;;  %v1885_v7 = vsel %vm1757_vm2, %v1324_v58, %v1821_v3  ;;  %vm1570_vm3 = vcmp.ge.f32.partialorder %v2398_v6, 0.0  ;;  %v2476_v9 = vpop.f32.mrb[8].mxu1  ;;  %v670_v10 = vpop.f32.mrb[9].mxu0 }
 0x107   : > { %v1634_v8 = vmul.f32 0.01, %v2398_v6  ;;  %v1949_v11 = vadd.f32 %v1885_v7, %v1693_v5  ;;  %vm1762_vm4 = vcmp.ge.f32.partialorder %v2476_v9, 0.0  ;;  %v1826_v12 = vmul.f32 0.01, %v2476_v9  ;;  %v1337_v13 = vpop.f32.mrb[9].mxu1 }
 0x108   : > { %2016 = vst.msk [vmem:[%s2846_s6 + $0x38] sm:$0xff] %vm2008_vm5, %v1951_v4  ;;  %vm1568_vm6 = vcmp.ge.f32.partialorder %v670_v10, 0.0  ;;  %v2399_v14 = vpop.f32.mrb[10].mxu0  ;;  %v1632_v16 = vmul.f32 0.01, %v670_v10  ;;  %vm1760_vm7 = vcmp.ge.f32.partialorder %v1337_v13, 0.0 }
 0x109   : > { %v1698_v15 = vsel %vm1570_vm3, %v2398_v6, %v1634_v8  ;;  %v1824_v17 = vmul.f32 0.01, %v1337_v13  ;;  %v2477_v18 = vpop.f32.mrb[10].mxu1  ;;  %2014 = vst.msk [vmem:[%s2846_s6 + $0x28] sm:$0xff] %vm2008_vm5, %v1949_v11  ;;  %v1890_v19 = vsel %vm1762_vm4, %v2476_v9, %v1826_v12  ;;  %vm1571_vm8 = vcmp.ge.f32.partialorder %v2399_v14, 0.0  ;;  %v673_v21 = vpop.f32.mrb[11].mxu0 }
 0x10a   : > { %v1635_v20 = vmul.f32 0.01, %v2399_v14  ;;  %vm1763_vm9 = vcmp.ge.f32.partialorder %v2477_v18, 0.0  ;;  %v1340_v22 = vpop.f32.mrb[11].mxu1  ;;  %v1954_v23 = vadd.f32 %v1890_v19, %v1698_v15  ;;  %v1696_v24 = vsel %vm1568_vm6, %v670_v10, %v1632_v16 }
 0x10b   : > { %v1888_v25 = vsel %vm1760_vm7, %v1337_v13, %v1824_v17  ;;  %v1827_v26 = vmul.f32 0.01, %v2477_v18  ;;  %vm1569_vm10 = vcmp.ge.f32.partialorder %v673_v21, 0.0  ;;  %v1633_v29 = vmul.f32 0.01, %v673_v21 }
 0x10c   : > { %v1952_v27 = vadd.f32 %v1888_v25, %v1696_v24  ;;  %v1699_v28 = vsel %vm1571_vm8, %v2399_v14, %v1635_v20  ;;  %2019 = vst.msk [vmem:[%s2846_s6 + $0x50] sm:$0xff] %vm2008_vm5, %v1954_v23  ;;  %vm1761_vm11 = vcmp.ge.f32.partialorder %v1340_v22, 0.0  ;;  %v1825_v31 = vmul.f32 0.01, %v1340_v22 }
 0x10d   : > { %v1891_v30 = vsel %vm1763_vm9, %v2477_v18, %v1827_v26  ;;  %v1697_v33 = vsel %vm1569_vm10, %v673_v21, %v1633_v29  ;;  %v2402_v34 = vpop.f32.mrb[12].mxu0 }
 0x10e   : > { %2017 = vst.msk [vmem:[%s2846_s6 + $0x40] sm:$0xff] %vm2008_vm5, %v1952_v27  ;;  %v1955_v32 = vadd.f32 %v1891_v30, %v1699_v28  ;;  %v1889_v35 = vsel %vm1761_vm11, %v1340_v22, %v1825_v31  ;;  %vm1574_vm12 = vcmp.ge.f32.partialorder %v2402_v34, 0.0  ;;  %v1638_v36 = vmul.f32 0.01, %v2402_v34  ;;  %v2480_v37 = vpop.f32.mrb[12].mxu1  ;;  %v686_v38 = vpop.f32.mrb[13].mxu0 }
 0x10f   : > { %v1953_v39 = vadd.f32 %v1889_v35, %v1697_v33  ;;  %vm1766_vm13 = vcmp.ge.f32.partialorder %v2480_v37, 0.0  ;;  %v1830_v40 = vmul.f32 0.01, %v2480_v37  ;;  %vm1572_vm14 = vcmp.ge.f32.partialorder %v686_v38, 0.0  ;;  %v1353_v41 = vpop.f32.mrb[13].mxu1  ;;  %v2403_v42 = vpop.f32.mrb[14].mxu0 }
 0x110   : > { %2020 = vst.msk [vmem:[%s2846_s6 + $0x58] sm:$0xff] %vm2008_vm5, %v1955_v32  ;;  %v1702_v43 = vsel %vm1574_vm12, %v2402_v34, %v1638_v36  ;;  %v1636_v44 = vmul.f32 0.01, %v686_v38  ;;  %vm1764_vm15 = vcmp.ge.f32.partialorder %v1353_v41, 0.0  ;;  %v1828_v45 = vmul.f32 0.01, %v1353_v41 }
 0x111   : > { %v2481_v46 = vpop.f32.mrb[14].mxu1  ;;  %2018 = vst.msk [vmem:[%s2846_s6 + $0x48] sm:$0xff] %vm2008_vm5, %v1953_v39  ;;  %v1894_v47 = vsel %vm1766_vm13, %v2480_v37, %v1830_v40  ;;  %vm1575_vm0 = vcmp.ge.f32.partialorder %v2403_v42, 0.0  ;;  %v1639_v48 = vmul.f32 0.01, %v2403_v42  ;;  %v689_v49 = vpop.f32.mrb[15].mxu0 }
 0x112   : > { %vm1767_vm1 = vcmp.ge.f32.partialorder %v2481_v46, 0.0  ;;  %v1356_v50 = vpop.f32.mrb[15].mxu1  ;;  %v1958_v51 = vadd.f32 %v1894_v47, %v1702_v43  ;;  %v1700_v52 = vsel %vm1572_vm14, %v686_v38, %v1636_v44  ;;  %v1892_v53 = vsel %vm1764_vm15, %v1353_v41, %v1828_v45 }
 0x113   : > { %v1831_v54 = vmul.f32 0.01, %v2481_v46  ;;  %v1956_v55 = vadd.f32 %v1892_v53, %v1700_v52  ;;  %v1703_v56 = vsel %vm1575_vm0, %v2403_v42, %v1639_v48  ;;  %vm1573_vm2 = vcmp.ge.f32.partialorder %v689_v49, 0.0 }
 0x114   : > { %v1637_v57 = vmul.f32 0.01, %v689_v49  ;;  %2023 = vst.msk [vmem:[%s2846_s6 + $0x70] sm:$0xff] %vm2008_vm5, %v1958_v51  ;;  %vm1765_vm3 = vcmp.ge.f32.partialorder %v1356_v50, 0.0  ;;  %v1829_v59 = vmul.f32 0.01, %v1356_v50 }
 0x115   : > { %v1895_v58 = vsel %vm1767_vm1, %v2481_v46, %v1831_v54  ;;  %2021 = vst.msk [vmem:[%s2846_s6 + $0x60] sm:$0xff] %vm2008_vm5, %v1956_v55  ;;  %v2406_v62 = vpop.f32.mrb[16].mxu0 }
 0x116   : > { %v1959_v60 = vadd.f32 %v1895_v58, %v1703_v56  ;;  %v1701_v61 = vsel %vm1573_vm2, %v689_v49, %v1637_v57  ;;  %v1893_v63 = vsel %vm1765_vm3, %v1356_v50, %v1829_v59  ;;  %vm1578_vm4 = vcmp.ge.f32.partialorder %v2406_v62, 0.0  ;;  %v2484_v1 = vpop.f32.mrb[16].mxu1  ;;  %v702_v2 = vpop.f32.mrb[17].mxu0 }
 0x117   : > { %v1642_v0 = vmul.f32 0.01, %v2406_v62  ;;  %v1957_v3 = vadd.f32 %v1893_v63, %v1701_v61  ;;  %vm1770_vm6 = vcmp.ge.f32.partialorder %v2484_v1, 0.0  ;;  %v1834_v4 = vmul.f32 0.01, %v2484_v1  ;;  %v1369_v5 = vpop.f32.mrb[17].mxu1 }
 0x118   : > { %2024 = vst.msk [vmem:[%s2846_s6 + $0x78] sm:$0xff] %vm2008_vm5, %v1959_v60  ;;  %vm1576_vm7 = vcmp.ge.f32.partialorder %v702_v2, 0.0  ;;  %v2407_v6 = vpop.f32.mrb[18].mxu0  ;;  %v1640_v8 = vmul.f32 0.01, %v702_v2  ;;  %vm1768_vm8 = vcmp.ge.f32.partialorder %v1369_v5, 0.0 }
 0x119   : > { %v1706_v7 = vsel %vm1578_vm4, %v2406_v62, %v1642_v0  ;;  %v1832_v9 = vmul.f32 0.01, %v1369_v5  ;;  %v2485_v10 = vpop.f32.mrb[18].mxu1  ;;  %2022 = vst.msk [vmem:[%s2846_s6 + $0x68] sm:$0xff] %vm2008_vm5, %v1957_v3  ;;  %v1898_v11 = vsel %vm1770_vm6, %v2484_v1, %v1834_v4  ;;  %vm1579_vm9 = vcmp.ge.f32.partialorder %v2407_v6, 0.0  ;;  %v705_v13 = vpop.f32.mrb[19].mxu0 }
 0x11a   : > { %v1643_v12 = vmul.f32 0.01, %v2407_v6  ;;  %vm1771_vm10 = vcmp.ge.f32.partialorder %v2485_v10, 0.0  ;;  %v1372_v14 = vpop.f32.mrb[19].mxu1  ;;  %v1962_v15 = vadd.f32 %v1898_v11, %v1706_v7  ;;  %v1704_v16 = vsel %vm1576_vm7, %v702_v2, %v1640_v8 }
 0x11b   : > { %v1896_v17 = vsel %vm1768_vm8, %v1369_v5, %v1832_v9  ;;  %v1835_v18 = vmul.f32 0.01, %v2485_v10  ;;  %vm1577_vm11 = vcmp.ge.f32.partialorder %v705_v13, 0.0  ;;  %v1641_v21 = vmul.f32 0.01, %v705_v13 }
 0x11c   : > { %v1960_v19 = vadd.f32 %v1896_v17, %v1704_v16  ;;  %v1707_v20 = vsel %vm1579_vm9, %v2407_v6, %v1643_v12  ;;  %2027 = vst.msk [vmem:[%s2846_s6 + $0x90] sm:$0xff] %vm2008_vm5, %v1962_v15  ;;  %vm1769_vm12 = vcmp.ge.f32.partialorder %v1372_v14, 0.0  ;;  %v1833_v23 = vmul.f32 0.01, %v1372_v14 }
 0x11d   : > { %v1899_v22 = vsel %vm1771_vm10, %v2485_v10, %v1835_v18  ;;  %v1705_v25 = vsel %vm1577_vm11, %v705_v13, %v1641_v21  ;;  %v2410_v26 = vpop.f32.mrb[20].mxu0 }
 0x11e   : > { %2025 = vst.msk [vmem:[%s2846_s6 + $0x80] sm:$0xff] %vm2008_vm5, %v1960_v19  ;;  %v1963_v24 = vadd.f32 %v1899_v22, %v1707_v20  ;;  %v1897_v27 = vsel %vm1769_vm12, %v1372_v14, %v1833_v23  ;;  %vm1582_vm13 = vcmp.ge.f32.partialorder %v2410_v26, 0.0  ;;  %v1646_v28 = vmul.f32 0.01, %v2410_v26  ;;  %v2488_v29 = vpop.f32.mrb[20].mxu1  ;;  %v718_v30 = vpop.f32.mrb[21].mxu0 }
 0x11f   : > { %v1961_v31 = vadd.f32 %v1897_v27, %v1705_v25  ;;  %vm1774_vm14 = vcmp.ge.f32.partialorder %v2488_v29, 0.0  ;;  %v1838_v32 = vmul.f32 0.01, %v2488_v29  ;;  %vm1580_vm15 = vcmp.ge.f32.partialorder %v718_v30, 0.0  ;;  %v1385_v33 = vpop.f32.mrb[21].mxu1  ;;  %v2411_v34 = vpop.f32.mrb[22].mxu0 }
 0x120   : > { %2028 = vst.msk [vmem:[%s2846_s6 + $0x98] sm:$0xff] %vm2008_vm5, %v1963_v24  ;;  %v1710_v35 = vsel %vm1582_vm13, %v2410_v26, %v1646_v28  ;;  %v1644_v36 = vmul.f32 0.01, %v718_v30  ;;  %vm1772_vm0 = vcmp.ge.f32.partialorder %v1385_v33, 0.0  ;;  %v1836_v37 = vmul.f32 0.01, %v1385_v33 }
 0x121   : > { %v2489_v38 = vpop.f32.mrb[22].mxu1  ;;  %2026 = vst.msk [vmem:[%s2846_s6 + $0x88] sm:$0xff] %vm2008_vm5, %v1961_v31  ;;  %v1902_v39 = vsel %vm1774_vm14, %v2488_v29, %v1838_v32  ;;  %vm1583_vm1 = vcmp.ge.f32.partialorder %v2411_v34, 0.0  ;;  %v1647_v40 = vmul.f32 0.01, %v2411_v34  ;;  %v721_v41 = vpop.f32.mrb[23].mxu0 }
 0x122   : > { %vm1775_vm2 = vcmp.ge.f32.partialorder %v2489_v38, 0.0  ;;  %v1388_v42 = vpop.f32.mrb[23].mxu1  ;;  %v1966_v43 = vadd.f32 %v1902_v39, %v1710_v35  ;;  %v1708_v44 = vsel %vm1580_vm15, %v718_v30, %v1644_v36  ;;  %v1900_v45 = vsel %vm1772_vm0, %v1385_v33, %v1836_v37 }
 0x123   : > { %v1839_v46 = vmul.f32 0.01, %v2489_v38  ;;  %v1964_v47 = vadd.f32 %v1900_v45, %v1708_v44  ;;  %v1711_v48 = vsel %vm1583_vm1, %v2411_v34, %v1647_v40  ;;  %vm1581_vm3 = vcmp.ge.f32.partialorder %v721_v41, 0.0 }
 0x124   : > { %v1645_v49 = vmul.f32 0.01, %v721_v41  ;;  %2031 = vst.msk [vmem:[%s2846_s6 + $0xb0] sm:$0xff] %vm2008_vm5, %v1966_v43  ;;  %vm1773_vm4 = vcmp.ge.f32.partialorder %v1388_v42, 0.0  ;;  %v1837_v51 = vmul.f32 0.01, %v1388_v42 }
 0x125   : > { %v1903_v50 = vsel %vm1775_vm2, %v2489_v38, %v1839_v46  ;;  %2029 = vst.msk [vmem:[%s2846_s6 + $0xa0] sm:$0xff] %vm2008_vm5, %v1964_v47  ;;  %v2414_v54 = vpop.f32.mrb[24].mxu0 }
 0x126   : > { %v1967_v52 = vadd.f32 %v1903_v50, %v1711_v48  ;;  %v1709_v53 = vsel %vm1581_vm3, %v721_v41, %v1645_v49  ;;  %v1901_v55 = vsel %vm1773_vm4, %v1388_v42, %v1837_v51  ;;  %vm1586_vm6 = vcmp.ge.f32.partialorder %v2414_v54, 0.0  ;;  %v2492_v57 = vpop.f32.mrb[24].mxu1  ;;  %v734_v58 = vpop.f32.mrb[25].mxu0 }
 0x127   : > { %v1650_v56 = vmul.f32 0.01, %v2414_v54  ;;  %v1965_v59 = vadd.f32 %v1901_v55, %v1709_v53  ;;  %vm1778_vm7 = vcmp.ge.f32.partialorder %v2492_v57, 0.0  ;;  %v1842_v60 = vmul.f32 0.01, %v2492_v57  ;;  %v1401_v61 = vpop.f32.mrb[25].mxu1 }
 0x128   : > { %2032 = vst.msk [vmem:[%s2846_s6 + $0xb8] sm:$0xff] %vm2008_vm5, %v1967_v52  ;;  %vm1584_vm8 = vcmp.ge.f32.partialorder %v734_v58, 0.0  ;;  %v2415_v62 = vpop.f32.mrb[26].mxu0  ;;  %v1648_v0 = vmul.f32 0.01, %v734_v58  ;;  %vm1776_vm9 = vcmp.ge.f32.partialorder %v1401_v61, 0.0 }
 0x129   : > { %v1714_v63 = vsel %vm1586_vm6, %v2414_v54, %v1650_v56  ;;  %v1840_v1 = vmul.f32 0.01, %v1401_v61  ;;  %v2493_v2 = vpop.f32.mrb[26].mxu1  ;;  %2030 = vst.msk [vmem:[%s2846_s6 + $0xa8] sm:$0xff] %vm2008_vm5, %v1965_v59  ;;  %v1906_v3 = vsel %vm1778_vm7, %v2492_v57, %v1842_v60  ;;  %vm1587_vm10 = vcmp.ge.f32.partialorder %v2415_v62, 0.0  ;;  %v737_v5 = vpop.f32.mrb[27].mxu0 }
 0x12a   : > { %v1651_v4 = vmul.f32 0.01, %v2415_v62  ;;  %vm1779_vm11 = vcmp.ge.f32.partialorder %v2493_v2, 0.0  ;;  %v1404_v6 = vpop.f32.mrb[27].mxu1  ;;  %v1970_v7 = vadd.f32 %v1906_v3, %v1714_v63  ;;  %v1712_v8 = vsel %vm1584_vm8, %v734_v58, %v1648_v0 }
 0x12b   : > { %v1904_v9 = vsel %vm1776_vm9, %v1401_v61, %v1840_v1  ;;  %v1843_v10 = vmul.f32 0.01, %v2493_v2  ;;  %vm1585_vm12 = vcmp.ge.f32.partialorder %v737_v5, 0.0  ;;  %v1649_v13 = vmul.f32 0.01, %v737_v5 }
 0x12c   : > { %v1968_v11 = vadd.f32 %v1904_v9, %v1712_v8  ;;  %v1715_v12 = vsel %vm1587_vm10, %v2415_v62, %v1651_v4  ;;  %2035 = vst.msk [vmem:[%s2846_s6 + $0xd0] sm:$0xff] %vm2008_vm5, %v1970_v7  ;;  %vm1777_vm13 = vcmp.ge.f32.partialorder %v1404_v6, 0.0  ;;  %v1841_v15 = vmul.f32 0.01, %v1404_v6 }
 0x12d   : > { %v1907_v14 = vsel %vm1779_vm11, %v2493_v2, %v1843_v10  ;;  %v1713_v17 = vsel %vm1585_vm12, %v737_v5, %v1649_v13  ;;  %v2418_v18 = vpop.f32.mrb[28].mxu0 }
 0x12e   : > { %2033 = vst.msk [vmem:[%s2846_s6 + $0xc0] sm:$0xff] %vm2008_vm5, %v1968_v11  ;;  %v1971_v16 = vadd.f32 %v1907_v14, %v1715_v12  ;;  %v1905_v19 = vsel %vm1777_vm13, %v1404_v6, %v1841_v15  ;;  %vm1590_vm14 = vcmp.ge.f32.partialorder %v2418_v18, 0.0  ;;  %v1654_v20 = vmul.f32 0.01, %v2418_v18  ;;  %v2496_v21 = vpop.f32.mrb[28].mxu1  ;;  %v750_v22 = vpop.f32.mrb[29].mxu0 }
 0x12f   : > { %v1969_v23 = vadd.f32 %v1905_v19, %v1713_v17  ;;  %vm1782_vm15 = vcmp.ge.f32.partialorder %v2496_v21, 0.0  ;;  %v1846_v24 = vmul.f32 0.01, %v2496_v21  ;;  %vm1588_vm0 = vcmp.ge.f32.partialorder %v750_v22, 0.0  ;;  %v1417_v25 = vpop.f32.mrb[29].mxu1  ;;  %v2419_v26 = vpop.f32.mrb[30].mxu0 }
 0x130   : > { %2036 = vst.msk [vmem:[%s2846_s6 + $0xd8] sm:$0xff] %vm2008_vm5, %v1971_v16  ;;  %v1718_v27 = vsel %vm1590_vm14, %v2418_v18, %v1654_v20  ;;  %v1652_v28 = vmul.f32 0.01, %v750_v22  ;;  %vm1780_vm1 = vcmp.ge.f32.partialorder %v1417_v25, 0.0  ;;  %v1844_v29 = vmul.f32 0.01, %v1417_v25 }
 0x131   : > { %v2497_v30 = vpop.f32.mrb[30].mxu1  ;;  %2034 = vst.msk [vmem:[%s2846_s6 + $0xc8] sm:$0xff] %vm2008_vm5, %v1969_v23  ;;  %v1910_v31 = vsel %vm1782_vm15, %v2496_v21, %v1846_v24  ;;  %vm1591_vm2 = vcmp.ge.f32.partialorder %v2419_v26, 0.0  ;;  %v1655_v32 = vmul.f32 0.01, %v2419_v26  ;;  %v753_v33 = vpop.f32.mrb[31].mxu0 }
 0x132   : > { %vm1783_vm3 = vcmp.ge.f32.partialorder %v2497_v30, 0.0  ;;  %v1420_v34 = vpop.f32.mrb[31].mxu1  ;;  %v1974_v35 = vadd.f32 %v1910_v31, %v1718_v27  ;;  %v1716_v36 = vsel %vm1588_vm0, %v750_v22, %v1652_v28  ;;  %v1908_v37 = vsel %vm1780_vm1, %v1417_v25, %v1844_v29 }
 0x133   : > { %v1847_v38 = vmul.f32 0.01, %v2497_v30  ;;  %v1972_v39 = vadd.f32 %v1908_v37, %v1716_v36  ;;  %v1719_v40 = vsel %vm1591_vm2, %v2419_v26, %v1655_v32  ;;  %vm1589_vm4 = vcmp.ge.f32.partialorder %v753_v33, 0.0 }
 0x134   : > { %v1653_v41 = vmul.f32 0.01, %v753_v33  ;;  %2039 = vst.msk [vmem:[%s2846_s6 + $0xf0] sm:$0xff] %vm2008_vm5, %v1974_v35  ;;  %vm1781_vm6 = vcmp.ge.f32.partialorder %v1420_v34, 0.0  ;;  %v1845_v43 = vmul.f32 0.01, %v1420_v34 }
 0x135   : > { %v1911_v42 = vsel %vm1783_vm3, %v2497_v30, %v1847_v38  ;;  %2037 = vst.msk [vmem:[%s2846_s6 + $0xe0] sm:$0xff] %vm2008_vm5, %v1972_v39  ;;  %v2422_v46 = vpop.f32.mrb[32].mxu0 }
 0x136   : > { %v1975_v44 = vadd.f32 %v1911_v42, %v1719_v40  ;;  %v1717_v45 = vsel %vm1589_vm4, %v753_v33, %v1653_v41  ;;  %v1909_v47 = vsel %vm1781_vm6, %v1420_v34, %v1845_v43  ;;  %vm1594_vm7 = vcmp.ge.f32.partialorder %v2422_v46, 0.0  ;;  %v2500_v49 = vpop.f32.mrb[32].mxu1  ;;  %v766_v50 = vpop.f32.mrb[33].mxu0 }
 0x137   : > { %v1658_v48 = vmul.f32 0.01, %v2422_v46  ;;  %v1973_v51 = vadd.f32 %v1909_v47, %v1717_v45  ;;  %vm1786_vm8 = vcmp.ge.f32.partialorder %v2500_v49, 0.0  ;;  %v1850_v52 = vmul.f32 0.01, %v2500_v49  ;;  %v1433_v53 = vpop.f32.mrb[33].mxu1 }
 0x138   : > { %2040 = vst.msk [vmem:[%s2846_s6 + $0xf8] sm:$0xff] %vm2008_vm5, %v1975_v44  ;;  %vm1592_vm9 = vcmp.ge.f32.partialorder %v766_v50, 0.0  ;;  %v2423_v54 = vpop.f32.mrb[34].mxu0  ;;  %v1656_v56 = vmul.f32 0.01, %v766_v50  ;;  %vm1784_vm10 = vcmp.ge.f32.partialorder %v1433_v53, 0.0 }
 0x139   : > { %v1722_v55 = vsel %vm1594_vm7, %v2422_v46, %v1658_v48  ;;  %v1848_v57 = vmul.f32 0.01, %v1433_v53  ;;  %v2501_v58 = vpop.f32.mrb[34].mxu1  ;;  %2038 = vst.msk [vmem:[%s2846_s6 + $0xe8] sm:$0xff] %vm2008_vm5, %v1973_v51  ;;  %v1914_v59 = vsel %vm1786_vm8, %v2500_v49, %v1850_v52  ;;  %vm1595_vm11 = vcmp.ge.f32.partialorder %v2423_v54, 0.0  ;;  %v769_v61 = vpop.f32.mrb[35].mxu0 }
 0x13a   : > { %v1659_v60 = vmul.f32 0.01, %v2423_v54  ;;  %vm1787_vm12 = vcmp.ge.f32.partialorder %v2501_v58, 0.0  ;;  %v1436_v62 = vpop.f32.mrb[35].mxu1  ;;  %v1978_v63 = vadd.f32 %v1914_v59, %v1722_v55  ;;  %v1720_v0 = vsel %vm1592_vm9, %v766_v50, %v1656_v56 }
 0x13b   : > { %v1912_v1 = vsel %vm1784_vm10, %v1433_v53, %v1848_v57  ;;  %v1851_v2 = vmul.f32 0.01, %v2501_v58  ;;  %vm1593_vm13 = vcmp.ge.f32.partialorder %v769_v61, 0.0  ;;  %v1657_v5 = vmul.f32 0.01, %v769_v61 }
 0x13c   : > { %v1976_v3 = vadd.f32 %v1912_v1, %v1720_v0  ;;  %v1723_v4 = vsel %vm1595_vm11, %v2423_v54, %v1659_v60  ;;  %2043 = vst.msk [vmem:[%s2846_s6 + $0x110] sm:$0xff] %vm2008_vm5, %v1978_v63  ;;  %vm1785_vm14 = vcmp.ge.f32.partialorder %v1436_v62, 0.0  ;;  %v1849_v7 = vmul.f32 0.01, %v1436_v62 }
 0x13d   : > { %v1915_v6 = vsel %vm1787_vm12, %v2501_v58, %v1851_v2  ;;  %v1721_v9 = vsel %vm1593_vm13, %v769_v61, %v1657_v5  ;;  %v2426_v10 = vpop.f32.mrb[36].mxu0 }
 0x13e   : > { %2041 = vst.msk [vmem:[%s2846_s6 + $0x100] sm:$0xff] %vm2008_vm5, %v1976_v3  ;;  %v1979_v8 = vadd.f32 %v1915_v6, %v1723_v4  ;;  %v1913_v11 = vsel %vm1785_vm14, %v1436_v62, %v1849_v7  ;;  %vm1598_vm15 = vcmp.ge.f32.partialorder %v2426_v10, 0.0  ;;  %v1662_v12 = vmul.f32 0.01, %v2426_v10  ;;  %v2504_v13 = vpop.f32.mrb[36].mxu1  ;;  %v782_v14 = vpop.f32.mrb[37].mxu0 }
 0x13f   : > { %v1977_v15 = vadd.f32 %v1913_v11, %v1721_v9  ;;  %vm1790_vm0 = vcmp.ge.f32.partialorder %v2504_v13, 0.0  ;;  %v1854_v16 = vmul.f32 0.01, %v2504_v13  ;;  %vm1596_vm1 = vcmp.ge.f32.partialorder %v782_v14, 0.0  ;;  %v1449_v17 = vpop.f32.mrb[37].mxu1  ;;  %v2427_v18 = vpop.f32.mrb[38].mxu0 }
 0x140   : > { %2044 = vst.msk [vmem:[%s2846_s6 + $0x118] sm:$0xff] %vm2008_vm5, %v1979_v8  ;;  %v1726_v19 = vsel %vm1598_vm15, %v2426_v10, %v1662_v12  ;;  %v1660_v20 = vmul.f32 0.01, %v782_v14  ;;  %vm1788_vm2 = vcmp.ge.f32.partialorder %v1449_v17, 0.0  ;;  %v1852_v21 = vmul.f32 0.01, %v1449_v17 }
 0x141   : > { %v2505_v22 = vpop.f32.mrb[38].mxu1  ;;  %2042 = vst.msk [vmem:[%s2846_s6 + $0x108] sm:$0xff] %vm2008_vm5, %v1977_v15  ;;  %v1918_v23 = vsel %vm1790_vm0, %v2504_v13, %v1854_v16  ;;  %vm1599_vm3 = vcmp.ge.f32.partialorder %v2427_v18, 0.0  ;;  %v1663_v24 = vmul.f32 0.01, %v2427_v18  ;;  %v785_v25 = vpop.f32.mrb[39].mxu0 }
 0x142   : > { %vm1791_vm4 = vcmp.ge.f32.partialorder %v2505_v22, 0.0  ;;  %v1452_v26 = vpop.f32.mrb[39].mxu1  ;;  %v1982_v27 = vadd.f32 %v1918_v23, %v1726_v19  ;;  %v1724_v28 = vsel %vm1596_vm1, %v782_v14, %v1660_v20  ;;  %v1916_v29 = vsel %vm1788_vm2, %v1449_v17, %v1852_v21 }
 0x143   : > { %v1855_v30 = vmul.f32 0.01, %v2505_v22  ;;  %v1980_v31 = vadd.f32 %v1916_v29, %v1724_v28  ;;  %v1727_v32 = vsel %vm1599_vm3, %v2427_v18, %v1663_v24  ;;  %vm1597_vm6 = vcmp.ge.f32.partialorder %v785_v25, 0.0 }
 0x144   : > { %v1661_v33 = vmul.f32 0.01, %v785_v25  ;;  %2047 = vst.msk [vmem:[%s2846_s6 + $0x130] sm:$0xff] %vm2008_vm5, %v1982_v27  ;;  %vm1789_vm7 = vcmp.ge.f32.partialorder %v1452_v26, 0.0  ;;  %v1853_v35 = vmul.f32 0.01, %v1452_v26 }
 0x145   : > { %v1919_v34 = vsel %vm1791_vm4, %v2505_v22, %v1855_v30  ;;  %2045 = vst.msk [vmem:[%s2846_s6 + $0x120] sm:$0xff] %vm2008_vm5, %v1980_v31  ;;  %v2430_v38 = vpop.f32.mrb[40].mxu0 }
 0x146   : > { %v1983_v36 = vadd.f32 %v1919_v34, %v1727_v32  ;;  %v1725_v37 = vsel %vm1597_vm6, %v785_v25, %v1661_v33  ;;  %v1917_v39 = vsel %vm1789_vm7, %v1452_v26, %v1853_v35  ;;  %vm1602_vm8 = vcmp.ge.f32.partialorder %v2430_v38, 0.0  ;;  %v2508_v41 = vpop.f32.mrb[40].mxu1  ;;  %v798_v42 = vpop.f32.mrb[41].mxu0 }
 0x147   : > { %v1666_v40 = vmul.f32 0.01, %v2430_v38  ;;  %v1981_v43 = vadd.f32 %v1917_v39, %v1725_v37  ;;  %vm1794_vm9 = vcmp.ge.f32.partialorder %v2508_v41, 0.0  ;;  %v1858_v44 = vmul.f32 0.01, %v2508_v41  ;;  %v1465_v45 = vpop.f32.mrb[41].mxu1 }
 0x148   : > { %2048 = vst.msk [vmem:[%s2846_s6 + $0x138] sm:$0xff] %vm2008_vm5, %v1983_v36  ;;  %vm1600_vm10 = vcmp.ge.f32.partialorder %v798_v42, 0.0  ;;  %v2431_v46 = vpop.f32.mrb[42].mxu0  ;;  %v1664_v48 = vmul.f32 0.01, %v798_v42  ;;  %vm1792_vm11 = vcmp.ge.f32.partialorder %v1465_v45, 0.0 }
 0x149   : > { %v1730_v47 = vsel %vm1602_vm8, %v2430_v38, %v1666_v40  ;;  %v1856_v49 = vmul.f32 0.01, %v1465_v45  ;;  %v2509_v50 = vpop.f32.mrb[42].mxu1  ;;  %2046 = vst.msk [vmem:[%s2846_s6 + $0x128] sm:$0xff] %vm2008_vm5, %v1981_v43  ;;  %v1922_v51 = vsel %vm1794_vm9, %v2508_v41, %v1858_v44  ;;  %vm1603_vm12 = vcmp.ge.f32.partialorder %v2431_v46, 0.0  ;;  %v801_v53 = vpop.f32.mrb[43].mxu0 }
 0x14a   : > { %v1667_v52 = vmul.f32 0.01, %v2431_v46  ;;  %vm1795_vm13 = vcmp.ge.f32.partialorder %v2509_v50, 0.0  ;;  %v1468_v54 = vpop.f32.mrb[43].mxu1  ;;  %v1986_v55 = vadd.f32 %v1922_v51, %v1730_v47  ;;  %v1728_v56 = vsel %vm1600_vm10, %v798_v42, %v1664_v48 }
 0x14b   : > { %v1920_v57 = vsel %vm1792_vm11, %v1465_v45, %v1856_v49  ;;  %v1859_v58 = vmul.f32 0.01, %v2509_v50  ;;  %vm1601_vm14 = vcmp.ge.f32.partialorder %v801_v53, 0.0  ;;  %v1665_v61 = vmul.f32 0.01, %v801_v53 }
 0x14c   : > { %v1984_v59 = vadd.f32 %v1920_v57, %v1728_v56  ;;  %v1731_v60 = vsel %vm1603_vm12, %v2431_v46, %v1667_v52  ;;  %2051 = vst.msk [vmem:[%s2846_s6 + $0x150] sm:$0xff] %vm2008_vm5, %v1986_v55  ;;  %vm1793_vm15 = vcmp.ge.f32.partialorder %v1468_v54, 0.0  ;;  %v1857_v63 = vmul.f32 0.01, %v1468_v54 }
 0x14d   : > { %v1923_v62 = vsel %vm1795_vm13, %v2509_v50, %v1859_v58  ;;  %v1729_v1 = vsel %vm1601_vm14, %v801_v53, %v1665_v61  ;;  %v2434_v2 = vpop.f32.mrb[44].mxu0 }
 0x14e   : > { %2049 = vst.msk [vmem:[%s2846_s6 + $0x140] sm:$0xff] %vm2008_vm5, %v1984_v59  ;;  %v1987_v0 = vadd.f32 %v1923_v62, %v1731_v60  ;;  %v1921_v3 = vsel %vm1793_vm15, %v1468_v54, %v1857_v63  ;;  %vm1606_vm0 = vcmp.ge.f32.partialorder %v2434_v2, 0.0  ;;  %v1670_v4 = vmul.f32 0.01, %v2434_v2  ;;  %v2512_v5 = vpop.f32.mrb[44].mxu1  ;;  %v814_v6 = vpop.f32.mrb[45].mxu0 }
 0x14f   : > { %v1985_v7 = vadd.f32 %v1921_v3, %v1729_v1  ;;  %vm1798_vm1 = vcmp.ge.f32.partialorder %v2512_v5, 0.0  ;;  %v1862_v8 = vmul.f32 0.01, %v2512_v5  ;;  %vm1604_vm2 = vcmp.ge.f32.partialorder %v814_v6, 0.0  ;;  %v1481_v9 = vpop.f32.mrb[45].mxu1  ;;  %v2435_v10 = vpop.f32.mrb[46].mxu0 }
 0x150   : > { %2052 = vst.msk [vmem:[%s2846_s6 + $0x158] sm:$0xff] %vm2008_vm5, %v1987_v0  ;;  %v1734_v11 = vsel %vm1606_vm0, %v2434_v2, %v1670_v4  ;;  %v1668_v12 = vmul.f32 0.01, %v814_v6  ;;  %vm1796_vm3 = vcmp.ge.f32.partialorder %v1481_v9, 0.0  ;;  %v1860_v13 = vmul.f32 0.01, %v1481_v9 }
 0x151   : > { %v2513_v14 = vpop.f32.mrb[46].mxu1  ;;  %2050 = vst.msk [vmem:[%s2846_s6 + $0x148] sm:$0xff] %vm2008_vm5, %v1985_v7  ;;  %v1926_v15 = vsel %vm1798_vm1, %v2512_v5, %v1862_v8  ;;  %vm1607_vm4 = vcmp.ge.f32.partialorder %v2435_v10, 0.0  ;;  %v1671_v16 = vmul.f32 0.01, %v2435_v10  ;;  %v817_v17 = vpop.f32.mrb[47].mxu0 }
 0x152   : > { %vm1799_vm6 = vcmp.ge.f32.partialorder %v2513_v14, 0.0  ;;  %v1484_v18 = vpop.f32.mrb[47].mxu1  ;;  %v1990_v19 = vadd.f32 %v1926_v15, %v1734_v11  ;;  %v1732_v20 = vsel %vm1604_vm2, %v814_v6, %v1668_v12  ;;  %v1924_v21 = vsel %vm1796_vm3, %v1481_v9, %v1860_v13 }
 0x153   : > { %v1863_v22 = vmul.f32 0.01, %v2513_v14  ;;  %v1988_v23 = vadd.f32 %v1924_v21, %v1732_v20  ;;  %v1735_v24 = vsel %vm1607_vm4, %v2435_v10, %v1671_v16  ;;  %vm1605_vm7 = vcmp.ge.f32.partialorder %v817_v17, 0.0 }
 0x154   : > { %v1669_v25 = vmul.f32 0.01, %v817_v17  ;;  %2055 = vst.msk [vmem:[%s2846_s6 + $0x170] sm:$0xff] %vm2008_vm5, %v1990_v19  ;;  %vm1797_vm8 = vcmp.ge.f32.partialorder %v1484_v18, 0.0  ;;  %v1861_v27 = vmul.f32 0.01, %v1484_v18 }
 0x155   : > { %v1927_v26 = vsel %vm1799_vm6, %v2513_v14, %v1863_v22  ;;  %2053 = vst.msk [vmem:[%s2846_s6 + $0x160] sm:$0xff] %vm2008_vm5, %v1988_v23  ;;  %v2438_v30 = vpop.f32.mrb[48].mxu0 }
 0x156   : > { %v1991_v28 = vadd.f32 %v1927_v26, %v1735_v24  ;;  %v1733_v29 = vsel %vm1605_vm7, %v817_v17, %v1669_v25  ;;  %v1925_v31 = vsel %vm1797_vm8, %v1484_v18, %v1861_v27  ;;  %vm1610_vm9 = vcmp.ge.f32.partialorder %v2438_v30, 0.0  ;;  %v2516_v33 = vpop.f32.mrb[48].mxu1  ;;  %v830_v34 = vpop.f32.mrb[49].mxu0 }
 0x157   : > { %v1674_v32 = vmul.f32 0.01, %v2438_v30  ;;  %v1989_v35 = vadd.f32 %v1925_v31, %v1733_v29  ;;  %vm1802_vm10 = vcmp.ge.f32.partialorder %v2516_v33, 0.0  ;;  %v1866_v36 = vmul.f32 0.01, %v2516_v33  ;;  %v1497_v37 = vpop.f32.mrb[49].mxu1 }
 0x158   : > { %2056 = vst.msk [vmem:[%s2846_s6 + $0x178] sm:$0xff] %vm2008_vm5, %v1991_v28  ;;  %vm1608_vm11 = vcmp.ge.f32.partialorder %v830_v34, 0.0  ;;  %v2439_v38 = vpop.f32.mrb[50].mxu0  ;;  %v1672_v40 = vmul.f32 0.01, %v830_v34  ;;  %vm1800_vm12 = vcmp.ge.f32.partialorder %v1497_v37, 0.0 }
 0x159   : > { %v1738_v39 = vsel %vm1610_vm9, %v2438_v30, %v1674_v32  ;;  %v1864_v41 = vmul.f32 0.01, %v1497_v37  ;;  %v2517_v42 = vpop.f32.mrb[50].mxu1  ;;  %2054 = vst.msk [vmem:[%s2846_s6 + $0x168] sm:$0xff] %vm2008_vm5, %v1989_v35  ;;  %v1930_v43 = vsel %vm1802_vm10, %v2516_v33, %v1866_v36  ;;  %vm1611_vm13 = vcmp.ge.f32.partialorder %v2439_v38, 0.0  ;;  %v833_v45 = vpop.f32.mrb[51].mxu0 }
 0x15a   : > { %v1675_v44 = vmul.f32 0.01, %v2439_v38  ;;  %vm1803_vm14 = vcmp.ge.f32.partialorder %v2517_v42, 0.0  ;;  %v1500_v46 = vpop.f32.mrb[51].mxu1  ;;  %v1994_v47 = vadd.f32 %v1930_v43, %v1738_v39  ;;  %v1736_v48 = vsel %vm1608_vm11, %v830_v34, %v1672_v40 }
 0x15b   : > { %v1928_v49 = vsel %vm1800_vm12, %v1497_v37, %v1864_v41  ;;  %v1867_v50 = vmul.f32 0.01, %v2517_v42  ;;  %vm1609_vm15 = vcmp.ge.f32.partialorder %v833_v45, 0.0  ;;  %v1673_v53 = vmul.f32 0.01, %v833_v45 }
 0x15c   : > { %v1992_v51 = vadd.f32 %v1928_v49, %v1736_v48  ;;  %v1739_v52 = vsel %vm1611_vm13, %v2439_v38, %v1675_v44  ;;  %2059 = vst.msk [vmem:[%s2846_s6 + $0x190] sm:$0xff] %vm2008_vm5, %v1994_v47  ;;  %vm1801_vm0 = vcmp.ge.f32.partialorder %v1500_v46, 0.0  ;;  %v1865_v55 = vmul.f32 0.01, %v1500_v46 }
 0x15d   : > { %v1931_v54 = vsel %vm1803_vm14, %v2517_v42, %v1867_v50  ;;  %v1737_v57 = vsel %vm1609_vm15, %v833_v45, %v1673_v53  ;;  %v2442_v58 = vpop.f32.mrb[52].mxu0 }
 0x15e   : > { %2057 = vst.msk [vmem:[%s2846_s6 + $0x180] sm:$0xff] %vm2008_vm5, %v1992_v51  ;;  %v1995_v56 = vadd.f32 %v1931_v54, %v1739_v52  ;;  %v1929_v59 = vsel %vm1801_vm0, %v1500_v46, %v1865_v55  ;;  %vm1614_vm1 = vcmp.ge.f32.partialorder %v2442_v58, 0.0  ;;  %v1678_v60 = vmul.f32 0.01, %v2442_v58  ;;  %v2520_v61 = vpop.f32.mrb[52].mxu1  ;;  %v846_v62 = vpop.f32.mrb[53].mxu0 }
 0x15f   : > { %v1993_v63 = vadd.f32 %v1929_v59, %v1737_v57  ;;  %vm1806_vm2 = vcmp.ge.f32.partialorder %v2520_v61, 0.0  ;;  %v1870_v0 = vmul.f32 0.01, %v2520_v61  ;;  %vm1612_vm3 = vcmp.ge.f32.partialorder %v846_v62, 0.0  ;;  %v1513_v1 = vpop.f32.mrb[53].mxu1  ;;  %v2443_v2 = vpop.f32.mrb[54].mxu0 }
 0x160   : > { %2060 = vst.msk [vmem:[%s2846_s6 + $0x198] sm:$0xff] %vm2008_vm5, %v1995_v56  ;;  %v1742_v3 = vsel %vm1614_vm1, %v2442_v58, %v1678_v60  ;;  %v1676_v4 = vmul.f32 0.01, %v846_v62  ;;  %vm1804_vm4 = vcmp.ge.f32.partialorder %v1513_v1, 0.0  ;;  %v1868_v5 = vmul.f32 0.01, %v1513_v1 }
 0x161   : > { %v2521_v6 = vpop.f32.mrb[54].mxu1  ;;  %2058 = vst.msk [vmem:[%s2846_s6 + $0x188] sm:$0xff] %vm2008_vm5, %v1993_v63  ;;  %v1934_v7 = vsel %vm1806_vm2, %v2520_v61, %v1870_v0  ;;  %vm1615_vm6 = vcmp.ge.f32.partialorder %v2443_v2, 0.0  ;;  %v1679_v8 = vmul.f32 0.01, %v2443_v2  ;;  %v849_v9 = vpop.f32.mrb[55].mxu0 }
 0x162   : > { %vm1807_vm7 = vcmp.ge.f32.partialorder %v2521_v6, 0.0  ;;  %v1516_v10 = vpop.f32.mrb[55].mxu1  ;;  %v1998_v11 = vadd.f32 %v1934_v7, %v1742_v3  ;;  %v1740_v12 = vsel %vm1612_vm3, %v846_v62, %v1676_v4  ;;  %v1932_v13 = vsel %vm1804_vm4, %v1513_v1, %v1868_v5 }
 0x163   : > { %v1871_v14 = vmul.f32 0.01, %v2521_v6  ;;  %v1996_v15 = vadd.f32 %v1932_v13, %v1740_v12  ;;  %v1743_v16 = vsel %vm1615_vm6, %v2443_v2, %v1679_v8  ;;  %vm1613_vm8 = vcmp.ge.f32.partialorder %v849_v9, 0.0 }
 0x164   : > { %v1677_v17 = vmul.f32 0.01, %v849_v9  ;;  %2063 = vst.msk [vmem:[%s2846_s6 + $0x1b0] sm:$0xff] %vm2008_vm5, %v1998_v11  ;;  %vm1805_vm9 = vcmp.ge.f32.partialorder %v1516_v10, 0.0  ;;  %v1869_v19 = vmul.f32 0.01, %v1516_v10 }
 0x165   : > { %v1935_v18 = vsel %vm1807_vm7, %v2521_v6, %v1871_v14  ;;  %2061 = vst.msk [vmem:[%s2846_s6 + $0x1a0] sm:$0xff] %vm2008_vm5, %v1996_v15  ;;  %v2446_v22 = vpop.f32.mrb[56].mxu0 }
 0x166   : > { %v1999_v20 = vadd.f32 %v1935_v18, %v1743_v16  ;;  %v1741_v21 = vsel %vm1613_vm8, %v849_v9, %v1677_v17  ;;  %v1933_v23 = vsel %vm1805_vm9, %v1516_v10, %v1869_v19  ;;  %vm1618_vm10 = vcmp.ge.f32.partialorder %v2446_v22, 0.0  ;;  %v2524_v25 = vpop.f32.mrb[56].mxu1  ;;  %v862_v26 = vpop.f32.mrb[57].mxu0 }
 0x167   : > { %v1682_v24 = vmul.f32 0.01, %v2446_v22  ;;  %v1997_v27 = vadd.f32 %v1933_v23, %v1741_v21  ;;  %vm1810_vm11 = vcmp.ge.f32.partialorder %v2524_v25, 0.0  ;;  %v1874_v28 = vmul.f32 0.01, %v2524_v25  ;;  %v1529_v29 = vpop.f32.mrb[57].mxu1 }
 0x168   : > { %2064 = vst.msk [vmem:[%s2846_s6 + $0x1b8] sm:$0xff] %vm2008_vm5, %v1999_v20  ;;  %vm1616_vm12 = vcmp.ge.f32.partialorder %v862_v26, 0.0  ;;  %v2447_v30 = vpop.f32.mrb[58].mxu0  ;;  %v1680_v32 = vmul.f32 0.01, %v862_v26  ;;  %vm1808_vm13 = vcmp.ge.f32.partialorder %v1529_v29, 0.0 }
 0x169   : > { %v1746_v31 = vsel %vm1618_vm10, %v2446_v22, %v1682_v24  ;;  %v1872_v33 = vmul.f32 0.01, %v1529_v29  ;;  %v2525_v34 = vpop.f32.mrb[58].mxu1  ;;  %2062 = vst.msk [vmem:[%s2846_s6 + $0x1a8] sm:$0xff] %vm2008_vm5, %v1997_v27  ;;  %v1938_v35 = vsel %vm1810_vm11, %v2524_v25, %v1874_v28  ;;  %vm1619_vm14 = vcmp.ge.f32.partialorder %v2447_v30, 0.0  ;;  %v865_v37 = vpop.f32.mrb[59].mxu0 }
 0x16a   : > { %v1683_v36 = vmul.f32 0.01, %v2447_v30  ;;  %vm1811_vm15 = vcmp.ge.f32.partialorder %v2525_v34, 0.0  ;;  %v1532_v38 = vpop.f32.mrb[59].mxu1  ;;  %v2002_v39 = vadd.f32 %v1938_v35, %v1746_v31  ;;  %v1744_v40 = vsel %vm1616_vm12, %v862_v26, %v1680_v32 }
 0x16b   : > { %v1936_v41 = vsel %vm1808_vm13, %v1529_v29, %v1872_v33  ;;  %v1875_v42 = vmul.f32 0.01, %v2525_v34  ;;  %vm1617_vm0 = vcmp.ge.f32.partialorder %v865_v37, 0.0  ;;  %v1681_v45 = vmul.f32 0.01, %v865_v37 }
 0x16c   : > { %v2000_v43 = vadd.f32 %v1936_v41, %v1744_v40  ;;  %v1747_v44 = vsel %vm1619_vm14, %v2447_v30, %v1683_v36  ;;  %2067 = vst.msk [vmem:[%s2846_s6 + $0x1d0] sm:$0xff] %vm2008_vm5, %v2002_v39  ;;  %vm1809_vm1 = vcmp.ge.f32.partialorder %v1532_v38, 0.0  ;;  %v1873_v47 = vmul.f32 0.01, %v1532_v38 }
 0x16d   : > { %v1939_v46 = vsel %vm1811_vm15, %v2525_v34, %v1875_v42  ;;  %v1745_v49 = vsel %vm1617_vm0, %v865_v37, %v1681_v45  ;;  %v2450_v50 = vpop.f32.mrb[60].mxu0 }
 0x16e   : > { %2065 = vst.msk [vmem:[%s2846_s6 + $0x1c0] sm:$0xff] %vm2008_vm5, %v2000_v43  ;;  %v2003_v48 = vadd.f32 %v1939_v46, %v1747_v44  ;;  %v1937_v51 = vsel %vm1809_vm1, %v1532_v38, %v1873_v47  ;;  %vm1622_vm2 = vcmp.ge.f32.partialorder %v2450_v50, 0.0  ;;  %v1686_v52 = vmul.f32 0.01, %v2450_v50  ;;  %v2528_v53 = vpop.f32.mrb[60].mxu1  ;;  %v878_v54 = vpop.f32.mrb[61].mxu0 }
 0x16f   : > { %v2001_v55 = vadd.f32 %v1937_v51, %v1745_v49  ;;  %vm1814_vm3 = vcmp.ge.f32.partialorder %v2528_v53, 0.0  ;;  %v1878_v56 = vmul.f32 0.01, %v2528_v53  ;;  %vm1620_vm4 = vcmp.ge.f32.partialorder %v878_v54, 0.0  ;;  %v1545_v57 = vpop.f32.mrb[61].mxu1  ;;  %v2451_v58 = vpop.f32.mrb[62].mxu0 }
 0x170   : > { %2068 = vst.msk [vmem:[%s2846_s6 + $0x1d8] sm:$0xff] %vm2008_vm5, %v2003_v48  ;;  %v1750_v59 = vsel %vm1622_vm2, %v2450_v50, %v1686_v52  ;;  %v1684_v60 = vmul.f32 0.01, %v878_v54  ;;  %vm1812_vm6 = vcmp.ge.f32.partialorder %v1545_v57, 0.0  ;;  %v1876_v61 = vmul.f32 0.01, %v1545_v57 }
 0x171   : > { %v2529_v62 = vpop.f32.mrb[62].mxu1  ;;  %2066 = vst.msk [vmem:[%s2846_s6 + $0x1c8] sm:$0xff] %vm2008_vm5, %v2001_v55  ;;  %v1942_v63 = vsel %vm1814_vm3, %v2528_v53, %v1878_v56  ;;  %vm1623_vm7 = vcmp.ge.f32.partialorder %v2451_v58, 0.0  ;;  %v1687_v0 = vmul.f32 0.01, %v2451_v58  ;;  %v881_v1 = vpop.f32.mrb[63].mxu0 }
 0x172   : > { %vm1815_vm8 = vcmp.ge.f32.partialorder %v2529_v62, 0.0  ;;  %v1548_v2 = vpop.f32.mrb[63].mxu1  ;;  %v2006_v3 = vadd.f32 %v1942_v63, %v1750_v59  ;;  %v1748_v4 = vsel %vm1620_vm4, %v878_v54, %v1684_v60  ;;  %v1940_v5 = vsel %vm1812_vm6, %v1545_v57, %v1876_v61 }
 0x173   : > { %v1879_v6 = vmul.f32 0.01, %v2529_v62  ;;  %v2004_v7 = vadd.f32 %v1940_v5, %v1748_v4  ;;  %v1751_v8 = vsel %vm1623_vm7, %v2451_v58, %v1687_v0  ;;  %vm1621_vm9 = vcmp.ge.f32.partialorder %v881_v1, 0.0 }
 0x174   : > { %v1685_v9 = vmul.f32 0.01, %v881_v1  ;;  %2071 = vst.msk [vmem:[%s2846_s6 + $0x1f0] sm:$0xff] %vm2008_vm5, %v2006_v3  ;;  %vm1813_vm10 = vcmp.ge.f32.partialorder %v1548_v2, 0.0  ;;  %v1877_v11 = vmul.f32 0.01, %v1548_v2 }
 0x175   : > { %v1943_v10 = vsel %vm1815_vm8, %v2529_v62, %v1879_v6  ;;  %2069 = vst.msk [vmem:[%s2846_s6 + $0x1e0] sm:$0xff] %vm2008_vm5, %v2004_v7 }
 0x176   : > { %v2007_v12 = vadd.f32 %v1943_v10, %v1751_v8  ;;  %v1749_v13 = vsel %vm1621_vm9, %v881_v1, %v1685_v9  ;;  %v1941_v14 = vsel %vm1813_vm10, %v1548_v2, %v1877_v11 }
 0x177   : > { %v2005_v15 = vadd.f32 %v1941_v14, %v1749_v13 }
 0x178   : > { %2072 = vst.msk [vmem:[%s2846_s6 + $0x1f8] sm:$0xff] %vm2008_vm5, %v2007_v12 }
 0x179   : > { %2070 = vst.msk [vmem:[%s2846_s6 + $0x1e8] sm:$0xff] %vm2008_vm5, %v2005_v15 }
 0x17a PF: > { %s14_s15 = sadd.s32 1, %s2624_s15  }
 0x17b   : > { %p11_p4 = scmp.ge.s32.totalorder %s14_s15, 4  }
 0x17d   :  { %13 = sbr.rel (!%p11_p4) target bundleno = 1 (0x1), region = 69 }

// kernel: glnet_forward.11
= control target key start
LH: loop header
LB: loop body
LE: loop exit
PB: predicated region body
PF: predicated region fallthrough
CT: control target
= control target key end

     0   :  { %v1522_v0 = vmov 0   ;;  %vm302_vm0 = vcmask 719872   ;;  %vm351_vm1 = vcmask 1043456   ;;  %vm1236_vm5 = vcmask 64512   ;;  %s2012_s1 = inlined_call_operand.vmem [shape: bf16[216,8], index: 1, kind: input, shape index: {}]   ;;  %s2013_s3 = inlined_call_operand.vmem [shape: bf16[216,8], index: 3, kind: input, shape index: {}]   ;;  %s2014_s0 = inlined_call_operand.vmem [shape: bf16[256,216], index: 0, kind: input, shape index: {}]   ;;  %s2015_s2 = inlined_call_operand.vmem [shape: bf16[256,216], index: 2, kind: input, shape index: {}]   ;;  %s2016_s4 = inlined_call_operand.vmem [shape: f32[256,8], index: 4, kind: output, shape index: {}]  }
   0x1   :  { %355 = vmatprep.subr.bf16.mxu0 %v1522_v0  ;;  %851 = vmatprep.subr.bf16.mxu1 %v1522_v0  ;;  %v1398_v1 = vld [vmem:[%s2012_s1] sm:$0xff]   ;;  %v1400_v3 = vld [vmem:[%s2012_s1 + $0x8] sm:$0xff]   ;;  %v1402_v5 = vld [vmem:[%s2012_s1 + $0x10] sm:$0xff]  }
   0x2   :  { %v1399_v2 = vld [vmem:[%s2013_s3] sm:$0xff]   ;;  %356 = vmatpush1.bf16.msra.mxu0 %v1398_v1  ;;  %v1401_v4 = vld [vmem:[%s2013_s3 + $0x8] sm:$0xff]   ;;  %v1403_v6 = vld [vmem:[%s2013_s3 + $0x10] sm:$0xff]  }
   0x3   :  { %852 = vmatpush1.bf16.msra.mxu1 %v1399_v2  ;;  %357 = vmatprep.subr.bf16.mxu0 %v1522_v0  ;;  %v1404_v7 = vld [vmem:[%s2012_s1 + $0x18] sm:$0xff]   ;;  %v1406_v9 = vld [vmem:[%s2012_s1 + $0x20] sm:$0xff]   ;;  %v1408_v11 = vld [vmem:[%s2012_s1 + $0x28] sm:$0xff]  }
   0x4   :  { %853 = vmatprep.subr.bf16.mxu1 %v1522_v0  ;;  %v1405_v8 = vld [vmem:[%s2013_s3 + $0x18] sm:$0xff]   ;;  %v1407_v10 = vld [vmem:[%s2013_s3 + $0x20] sm:$0xff]   ;;  %v1409_v12 = vld [vmem:[%s2013_s3 + $0x28] sm:$0xff]  }
   0x5   :  { %v1410_v13 = vld [vmem:[%s2012_s1 + $0x30] sm:$0xff]   ;;  %v1412_v15 = vld [vmem:[%s2012_s1 + $0x38] sm:$0xff]   ;;  %v1428_v17 = vld [vmem:[%s2014_s0 + $0x4] ss:$8 sps:$4 sm:$0xff]  }
   0x6   :  { %358 = vmatpush1.bf16.msra.mxu0 %v1400_v3  ;;  %v1411_v14 = vld [vmem:[%s2013_s3 + $0x30] sm:$0xff]   ;;  %v1413_v16 = vld [vmem:[%s2013_s3 + $0x38] sm:$0xff]   ;;  %v1431_v18 = vld [vmem:[%s2015_s2 + $0x4] ss:$8 sps:$4 sm:$0xff]   ;;  %1319 = vmatprep.mubr.msk.bf16.mxu0 %vm302_vm0, %v1428_v17 }
   0x7   :  { %854 = vmatpush1.bf16.msra.mxu1 %v1401_v4  ;;  %359 = vmatprep.subr.bf16.mxu0 %v1522_v0  ;;  %v1414_v19 = vld [vmem:[%s2012_s1 + $0x40] sm:$0xff]   ;;  %v1416_v21 = vld [vmem:[%s2012_s1 + $0x48] sm:$0xff]   ;;  %v1418_v23 = vld [vmem:[%s2012_s1 + $0x50] sm:$0xff]  }
   0x8   :  { %855 = vmatprep.subr.bf16.mxu1 %v1522_v0  ;;  %v1415_v20 = vld [vmem:[%s2013_s3 + $0x40] sm:$0xff]   ;;  %1381 = vmatprep.mubr.msk.bf16.mxu1 %vm302_vm0, %v1431_v18  ;;  %v1417_v22 = vld [vmem:[%s2013_s3 + $0x48] sm:$0xff]   ;;  %v1419_v24 = vld [vmem:[%s2013_s3 + $0x50] sm:$0xff]  }
   0x9   :  { %v1420_v25 = vld [vmem:[%s2012_s1 + $0x58] sm:$0xff]   ;;  %v1422_v27 = vld [vmem:[%s2012_s1 + $0x60] sm:$0xff]   ;;  %v1424_v29 = vld [vmem:[%s2012_s1 + $0x68] ss:$0 sps:$4 sm:$0xff]  }
   0xa   :  { %360 = vmatpush1.bf16.msra.mxu0 %v1402_v5  ;;  %v1421_v26 = vld [vmem:[%s2013_s3 + $0x58] sm:$0xff]   ;;  %v1423_v28 = vld [vmem:[%s2013_s3 + $0x60] sm:$0xff]   ;;  %v1425_v30 = vld [vmem:[%s2013_s3 + $0x68] ss:$0 sps:$4 sm:$0xff]   ;;  %v353_v31 = vsel %vm351_vm1, %v1424_v29, 0 }
   0xb   :  { %856 = vmatpush1.bf16.msra.mxu1 %v1403_v6  ;;  %361 = vmatprep.subr.bf16.mxu0 %v1522_v0  ;;  %v849_v32 = vsel %vm351_vm1, %v1425_v30, 0  ;;  %v1426_v33 = vld [vmem:[%s2014_s0] ss:$8 sps:$4 sm:$0xff]   ;;  %v1432_v35 = vld [vmem:[%s2014_s0 + $0x14] ss:$8 sps:$4 sm:$0xff]  }
   0xc   :  { %857 = vmatprep.subr.bf16.mxu1 %v1522_v0  ;;  %v1429_v34 = vld [vmem:[%s2015_s2] ss:$8 sps:$4 sm:$0xff]   ;;  %v1434_v36 = vld [vmem:[%s2015_s2 + $0x14] ss:$8 sps:$4 sm:$0xff]   ;;  %v1436_v37 = vld [vmem:[%s2014_s0 + $0x10] ss:$8 sps:$4 sm:$0xff]  }
   0xd   :  { %v1437_v38 = vld [vmem:[%s2015_s2 + $0x10] ss:$8 sps:$4 sm:$0xff]   ;;  %v1438_v39 = vld [vmem:[%s2014_s0 + $0x24] ss:$8 sps:$4 sm:$0xff]   ;;  %v1442_v41 = vld [vmem:[%s2014_s0 + $0x20] ss:$8 sps:$4 sm:$0xff]  }
   0xe   :  { %362 = vmatpush1.bf16.msra.mxu0 %v1404_v7  ;;  %v1440_v40 = vld [vmem:[%s2015_s2 + $0x24] ss:$8 sps:$4 sm:$0xff]   ;;  %v1443_v42 = vld [vmem:[%s2015_s2 + $0x20] ss:$8 sps:$4 sm:$0xff]   ;;  %v1444_v43 = vld [vmem:[%s2014_s0 + $0x34] ss:$8 sps:$4 sm:$0xff]  }
   0xf   :  { %858 = vmatpush1.bf16.msra.mxu1 %v1405_v8  ;;  %363 = vmatprep.subr.bf16.mxu0 %v1522_v0  ;;  %v1446_v44 = vld [vmem:[%s2015_s2 + $0x34] ss:$8 sps:$4 sm:$0xff]   ;;  %v1448_v45 = vld [vmem:[%s2014_s0 + $0x30] ss:$8 sps:$4 sm:$0xff]   ;;  %v1450_v47 = vld [vmem:[%s2014_s0 + $0x44] ss:$8 sps:$4 sm:$0xff]  }
  0x10   :  { %859 = vmatprep.subr.bf16.mxu1 %v1522_v0  ;;  %v1449_v46 = vld [vmem:[%s2015_s2 + $0x30] ss:$8 sps:$4 sm:$0xff]   ;;  %v1452_v48 = vld [vmem:[%s2015_s2 + $0x44] ss:$8 sps:$4 sm:$0xff]   ;;  %v1454_v49 = vld [vmem:[%s2014_s0 + $0x40] ss:$8 sps:$4 sm:$0xff]  }
  0x11   :  { %v1455_v50 = vld [vmem:[%s2015_s2 + $0x40] ss:$8 sps:$4 sm:$0xff]   ;;  %v1456_v51 = vld [vmem:[%s2014_s0 + $0x54] ss:$8 sps:$4 sm:$0xff]   ;;  %v1460_v53 = vld [vmem:[%s2014_s0 + $0x50] ss:$8 sps:$4 sm:$0xff]  }
  0x12   :  { %364 = vmatpush1.bf16.msra.mxu0 %v1406_v9  ;;  %v1458_v52 = vld [vmem:[%s2015_s2 + $0x54] ss:$8 sps:$4 sm:$0xff]   ;;  %v1461_v54 = vld [vmem:[%s2015_s2 + $0x50] ss:$8 sps:$4 sm:$0xff]   ;;  %v1462_v55 = vld [vmem:[%s2014_s0 + $0x64] ss:$8 sps:$4 sm:$0xff]  }
  0x13   :  { %860 = vmatpush1.bf16.msra.mxu1 %v1407_v10  ;;  %365 = vmatprep.subr.bf16.mxu0 %v1522_v0  ;;  %v1464_v56 = vld [vmem:[%s2015_s2 + $0x64] ss:$8 sps:$4 sm:$0xff]   ;;  %v1466_v57 = vld [vmem:[%s2014_s0 + $0x60] ss:$8 sps:$4 sm:$0xff]   ;;  %v1468_v59 = vld [vmem:[%s2014_s0 + $0x74] ss:$8 sps:$4 sm:$0xff]  }
  0x14   :  { %861 = vmatprep.subr.bf16.mxu1 %v1522_v0  ;;  %v1467_v58 = vld [vmem:[%s2015_s2 + $0x60] ss:$8 sps:$4 sm:$0xff]   ;;  %v1470_v60 = vld [vmem:[%s2015_s2 + $0x74] ss:$8 sps:$4 sm:$0xff]   ;;  %v1472_v61 = vld [vmem:[%s2014_s0 + $0x70] ss:$8 sps:$4 sm:$0xff]  }
  0x15   :  { %v1473_v62 = vld [vmem:[%s2015_s2 + $0x70] ss:$8 sps:$4 sm:$0xff]   ;;  %v1474_v63 = vld [vmem:[%s2014_s0 + $0x84] ss:$8 sps:$4 sm:$0xff]   ;;  %v1478_v1 = vld [vmem:[%s2014_s0 + $0x80] ss:$8 sps:$4 sm:$0xff]  }
  0x16   :  { %366 = vmatpush1.bf16.msra.mxu0 %v1408_v11  ;;  %v1479_v2 = vld [vmem:[%s2015_s2 + $0x80] ss:$8 sps:$4 sm:$0xff]   ;;  %v1480_v3 = vld [vmem:[%s2014_s0 + $0x94] ss:$8 sps:$4 sm:$0xff]   ;;  %v1484_v5 = vld [vmem:[%s2014_s0 + $0x90] ss:$8 sps:$4 sm:$0xff]  }
  0x17   :  { %862 = vmatpush1.bf16.msra.mxu1 %v1409_v12  ;;  %367 = vmatprep.subr.bf16.mxu0 %v1522_v0  ;;  %v1482_v4 = vld [vmem:[%s2015_s2 + $0x94] ss:$8 sps:$4 sm:$0xff]   ;;  %v1485_v6 = vld [vmem:[%s2015_s2 + $0x90] ss:$8 sps:$4 sm:$0xff]   ;;  %v1486_v7 = vld [vmem:[%s2014_s0 + $0xa4] ss:$8 sps:$4 sm:$0xff]  }
  0x18   :  { %863 = vmatprep.subr.bf16.mxu1 %v1522_v0  ;;  %v1488_v8 = vld [vmem:[%s2015_s2 + $0xa4] ss:$8 sps:$4 sm:$0xff]   ;;  %v1490_v9 = vld [vmem:[%s2014_s0 + $0xa0] ss:$8 sps:$4 sm:$0xff]   ;;  %v1492_v11 = vld [vmem:[%s2014_s0 + $0xb4] ss:$8 sps:$4 sm:$0xff]  }
  0x19   :  { %v1491_v10 = vld [vmem:[%s2015_s2 + $0xa0] ss:$8 sps:$4 sm:$0xff]   ;;  %v1494_v12 = vld [vmem:[%s2015_s2 + $0xb4] ss:$8 sps:$4 sm:$0xff]   ;;  %v1520_v29 = vld [vmem:[%s2014_s0 + $0xf0] ss:$8 sps:$4 sm:$0xff]  }
  0x1a   :  { %368 = vmatpush1.bf16.msra.mxu0 %v1410_v13  ;;  %v1496_v13 = vld [vmem:[%s2014_s0 + $0xb0] ss:$8 sps:$4 sm:$0xff]   ;;  %v1502_v17 = vld [vmem:[%s2014_s0 + $0xc0] ss:$8 sps:$4 sm:$0xff]  }
  0x1b   :  { %864 = vmatpush1.bf16.msra.mxu1 %v1411_v14  ;;  %369 = vmatprep.subr.bf16.mxu0 %v1522_v0  ;;  %v1497_v14 = vld [vmem:[%s2015_s2 + $0xb0] ss:$8 sps:$4 sm:$0xff]   ;;  %v1503_v18 = vld [vmem:[%s2015_s2 + $0xc0] ss:$8 sps:$4 sm:$0xff]  }
  0x1c   :  { %865 = vmatprep.subr.bf16.mxu1 %v1522_v0  ;;  %v1521_v30 = vld [vmem:[%s2015_s2 + $0xf0] ss:$8 sps:$4 sm:$0xff]  }
  0x1e   :  { %370 = vmatpush1.bf16.msra.mxu0 %v1412_v15  ;;  %v1498_v15 = vld [vmem:[%s2014_s0 + $0xc4] ss:$8 sps:$4 sm:$0xff]  }
  0x1f   :  { %866 = vmatpush1.bf16.msra.mxu1 %v1413_v16  ;;  %371 = vmatprep.subr.bf16.mxu0 %v1522_v0  ;;  %v1500_v16 = vld [vmem:[%s2015_s2 + $0xc4] ss:$8 sps:$4 sm:$0xff]  }
  0x20   :  { %867 = vmatprep.subr.bf16.mxu1 %v1522_v0 }
  0x22   :  { %372 = vmatpush1.bf16.msra.mxu0 %v1414_v19  ;;  %v1504_v19 = vld [vmem:[%s2014_s0 + $0xd4] ss:$8 sps:$4 sm:$0xff]  }
  0x23   :  { %868 = vmatpush1.bf16.msra.mxu1 %v1415_v20  ;;  %373 = vmatprep.subr.bf16.mxu0 %v1522_v0  ;;  %v1506_v20 = vld [vmem:[%s2015_s2 + $0xd4] ss:$8 sps:$4 sm:$0xff]  }
  0x24   :  { %869 = vmatprep.subr.bf16.mxu1 %v1522_v0 }
  0x26   :  { %374 = vmatpush1.bf16.msra.mxu0 %v1416_v21  ;;  %v1508_v21 = vld [vmem:[%s2014_s0 + $0xd0] ss:$8 sps:$4 sm:$0xff]  }
  0x27   :  { %870 = vmatpush1.bf16.msra.mxu1 %v1417_v22  ;;  %375 = vmatprep.subr.bf16.mxu0 %v1522_v0  ;;  %v1509_v22 = vld [vmem:[%s2015_s2 + $0xd0] ss:$8 sps:$4 sm:$0xff]  }
  0x28   :  { %871 = vmatprep.subr.bf16.mxu1 %v1522_v0 }
  0x2a   :  { %376 = vmatpush1.bf16.msra.mxu0 %v1418_v23  ;;  %v1510_v23 = vld [vmem:[%s2014_s0 + $0xe4] ss:$8 sps:$4 sm:$0xff]  }
  0x2b   :  { %872 = vmatpush1.bf16.msra.mxu1 %v1419_v24  ;;  %377 = vmatprep.subr.bf16.mxu0 %v1522_v0  ;;  %v1512_v24 = vld [vmem:[%s2015_s2 + $0xe4] ss:$8 sps:$4 sm:$0xff]  }
  0x2c   :  { %873 = vmatprep.subr.bf16.mxu1 %v1522_v0 }
  0x2e   :  { %378 = vmatpush1.bf16.msra.mxu0 %v1420_v25  ;;  %v1514_v25 = vld [vmem:[%s2014_s0 + $0xe0] ss:$8 sps:$4 sm:$0xff]  }
  0x2f   :  { %874 = vmatpush1.bf16.msra.mxu1 %v1421_v26  ;;  %379 = vmatprep.subr.bf16.mxu0 %v1522_v0  ;;  %v1515_v26 = vld [vmem:[%s2015_s2 + $0xe0] ss:$8 sps:$4 sm:$0xff]  }
  0x30   :  { %875 = vmatprep.subr.bf16.mxu1 %v1522_v0 }
  0x32   :  { %380 = vmatpush1.bf16.msra.mxu0 %v1422_v27  ;;  %v1516_v27 = vld [vmem:[%s2014_s0 + $0xf4] ss:$8 sps:$4 sm:$0xff]  }
  0x33   :  { %876 = vmatpush1.bf16.msra.mxu1 %v1423_v28  ;;  %381 = vmatprep.subr.bf16.mxu0 %v1522_v0  ;;  %v1518_v28 = vld [vmem:[%s2015_s2 + $0xf4] ss:$8 sps:$4 sm:$0xff]  }
  0x34   :  { %877 = vmatprep.subr.bf16.mxu1 %v1522_v0  ;;  %v1476_v0 = vld [vmem:[%s2015_s2 + $0x84] ss:$8 sps:$4 sm:$0xff]  }
  0x36   :  { %382 = vmatpush1.bf16.msra.mxu0 %v353_v31 }
  0x37   :  { %878 = vmatpush1.bf16.msra.mxu1 %v849_v32 }
  0x39   :  { %388 = vmatmul.mubr.bf16.vlgmr.msra.gmra.mrb[0].mxu0 %v1426_v33 }
  0x3a   :  { %884 = vmatmul.mubr.bf16.vlgmr.msra.gmra.mrb[0].mxu1 %v1429_v34  ;;  %1320 = vmatprep.mubr.msk.bf16.mxu0 %vm302_vm0, %v1432_v35 }
  0x3b   :  { %1382 = vmatprep.mubr.msk.bf16.mxu1 %vm302_vm0, %v1434_v36 }
  0x41   :  { %396 = vmatmul.mubr.bf16.gmra.mrb[4].mxu0 %v1436_v37 }
  0x42   :  { %892 = vmatmul.mubr.bf16.gmra.mrb[4].mxu1 %v1437_v38  ;;  %1321 = vmatprep.mubr.msk.bf16.mxu0 %vm302_vm0, %v1438_v39 }
  0x43   :  { %1383 = vmatprep.mubr.msk.bf16.mxu1 %vm302_vm0, %v1440_v40 }
  0x49   :  { %404 = vmatmul.mubr.bf16.gmra.mrb[8].mxu0 %v1442_v41 }
  0x4a   :  { %900 = vmatmul.mubr.bf16.gmra.mrb[8].mxu1 %v1443_v42  ;;  %1322 = vmatprep.mubr.msk.bf16.mxu0 %vm302_vm0, %v1444_v43 }
  0x4b   :  { %1384 = vmatprep.mubr.msk.bf16.mxu1 %vm302_vm0, %v1446_v44 }
  0x51   :  { %412 = vmatmul.mubr.bf16.gmra.mrb[12].mxu0 %v1448_v45 }
  0x52   :  { %908 = vmatmul.mubr.bf16.gmra.mrb[12].mxu1 %v1449_v46  ;;  %1323 = vmatprep.mubr.msk.bf16.mxu0 %vm302_vm0, %v1450_v47 }
  0x53   :  { %1385 = vmatprep.mubr.msk.bf16.mxu1 %vm302_vm0, %v1452_v48 }
  0x59   :  { %420 = vmatmul.mubr.bf16.gmra.mrb[16].mxu0 %v1454_v49 }
  0x5a   :  { %916 = vmatmul.mubr.bf16.gmra.mrb[16].mxu1 %v1455_v50  ;;  %1324 = vmatprep.mubr.msk.bf16.mxu0 %vm302_vm0, %v1456_v51 }
  0x5b   :  { %1386 = vmatprep.mubr.msk.bf16.mxu1 %vm302_vm0, %v1458_v52 }
  0x61   :  { %428 = vmatmul.mubr.bf16.gmra.mrb[20].mxu0 %v1460_v53 }
  0x62   :  { %924 = vmatmul.mubr.bf16.gmra.mrb[20].mxu1 %v1461_v54  ;;  %1325 = vmatprep.mubr.msk.bf16.mxu0 %vm302_vm0, %v1462_v55 }
  0x63   :  { %1387 = vmatprep.mubr.msk.bf16.mxu1 %vm302_vm0, %v1464_v56 }
  0x69   :  { %436 = vmatmul.mubr.bf16.gmra.mrb[24].mxu0 %v1466_v57 }
  0x6a   :  { %932 = vmatmul.mubr.bf16.gmra.mrb[24].mxu1 %v1467_v58  ;;  %1326 = vmatprep.mubr.msk.bf16.mxu0 %vm302_vm0, %v1468_v59 }
  0x6b   :  { %1388 = vmatprep.mubr.msk.bf16.mxu1 %vm302_vm0, %v1470_v60 }
  0x71   :  { %444 = vmatmul.mubr.bf16.gmra.mrb[28].mxu0 %v1472_v61 }
  0x72   :  { %940 = vmatmul.mubr.bf16.gmra.mrb[28].mxu1 %v1473_v62  ;;  %1327 = vmatprep.mubr.msk.bf16.mxu0 %vm302_vm0, %v1474_v63 }
  0x73   :  { %1389 = vmatprep.mubr.msk.bf16.mxu1 %vm302_vm0, %v1476_v0 }
  0x79   :  { %452 = vmatmul.mubr.bf16.gmra.mrb[32].mxu0 %v1478_v1 }
  0x7a   :  { %948 = vmatmul.mubr.bf16.gmra.mrb[32].mxu1 %v1479_v2  ;;  %1328 = vmatprep.mubr.msk.bf16.mxu0 %vm302_vm0, %v1480_v3 }
  0x7b   :  { %1390 = vmatprep.mubr.msk.bf16.mxu1 %vm302_vm0, %v1482_v4 }
  0x81   :  { %460 = vmatmul.mubr.bf16.gmra.mrb[36].mxu0 %v1484_v5 }
  0x82   :  { %956 = vmatmul.mubr.bf16.gmra.mrb[36].mxu1 %v1485_v6  ;;  %1329 = vmatprep.mubr.msk.bf16.mxu0 %vm302_vm0, %v1486_v7 }
  0x83   :  { %1391 = vmatprep.mubr.msk.bf16.mxu1 %vm302_vm0, %v1488_v8 }
  0x89   :  { %468 = vmatmul.mubr.bf16.gmra.mrb[40].mxu0 %v1490_v9 }
  0x8a   :  { %964 = vmatmul.mubr.bf16.gmra.mrb[40].mxu1 %v1491_v10  ;;  %1330 = vmatprep.mubr.msk.bf16.mxu0 %vm302_vm0, %v1492_v11 }
  0x8b   :  { %1392 = vmatprep.mubr.msk.bf16.mxu1 %vm302_vm0, %v1494_v12 }
  0x91   :  { %476 = vmatmul.mubr.bf16.gmra.mrb[44].mxu0 %v1496_v13 }
  0x92   :  { %972 = vmatmul.mubr.bf16.gmra.mrb[44].mxu1 %v1497_v14  ;;  %1331 = vmatprep.mubr.msk.bf16.mxu0 %vm302_vm0, %v1498_v15 }
  0x93   :  { %1393 = vmatprep.mubr.msk.bf16.mxu1 %vm302_vm0, %v1500_v16 }
  0x99   :  { %484 = vmatmul.mubr.bf16.gmra.mrb[48].mxu0 %v1502_v17 }
  0x9a   :  { %980 = vmatmul.mubr.bf16.gmra.mrb[48].mxu1 %v1503_v18  ;;  %1332 = vmatprep.mubr.msk.bf16.mxu0 %vm302_vm0, %v1504_v19 }
  0x9b   :  { %1394 = vmatprep.mubr.msk.bf16.mxu1 %vm302_vm0, %v1506_v20 }
  0xa1   :  { %492 = vmatmul.mubr.bf16.gmra.mrb[52].mxu0 %v1508_v21 }
  0xa2   :  { %988 = vmatmul.mubr.bf16.gmra.mrb[52].mxu1 %v1509_v22  ;;  %1333 = vmatprep.mubr.msk.bf16.mxu0 %vm302_vm0, %v1510_v23 }
  0xa3   :  { %1395 = vmatprep.mubr.msk.bf16.mxu1 %vm302_vm0, %v1512_v24 }
  0xa9   :  { %500 = vmatmul.mubr.bf16.gmra.mrb[56].mxu0 %v1514_v25 }
  0xaa   :  { %996 = vmatmul.mubr.bf16.gmra.mrb[56].mxu1 %v1515_v26  ;;  %1334 = vmatprep.mubr.msk.bf16.mxu0 %vm302_vm0, %v1516_v27 }
  0xab   :  { %1396 = vmatprep.mubr.msk.bf16.mxu1 %vm302_vm0, %v1518_v28 }
  0xb1   :  { %508 = vmatmul.mubr.bf16.gmra.mrb[60].mxu0 %v1520_v29 }
  0xb2   :  { %1004 = vmatmul.mubr.bf16.gmra.mrb[60].mxu1 %v1521_v30 }
 0x10c   :  { %v389_v31 = vpop.f32.mrb[0].mxu0 }
 0x10d   :  { %vm1012_vm2 = vcmp.ge.f32.partialorder %v389_v31, 0.0  ;;  %v1044_v32 = vmul.f32 0.01, %v389_v31  ;;  %v885_v33 = vpop.f32.mrb[0].mxu1  ;;  %v391_v34 = vpop.f32.mrb[1].mxu0 }
 0x10e   :  { %vm1108_vm3 = vcmp.ge.f32.partialorder %v885_v33, 0.0  ;;  %v1140_v35 = vmul.f32 0.01, %v885_v33  ;;  %v887_v36 = vpop.f32.mrb[1].mxu1  ;;  %v392_v37 = vpop.f32.mrb[2].mxu0 }
 0x10f   :  { %v1076_v38 = vsel %vm1012_vm2, %v389_v31, %v1044_v32  ;;  %vm1013_vm4 = vcmp.ge.f32.partialorder %v392_v37, 0.0  ;;  %v1045_v39 = vmul.f32 0.01, %v392_v37  ;;  %v888_v40 = vpop.f32.mrb[2].mxu1  ;;  %v394_v41 = vpop.f32.mrb[3].mxu0 }
 0x110   :  { %v1172_v42 = vsel %vm1108_vm3, %v885_v33, %v1140_v35  ;;  %vm1109_vm6 = vcmp.ge.f32.partialorder %v888_v40, 0.0  ;;  %v1141_v43 = vmul.f32 0.01, %v888_v40  ;;  %v890_v44 = vpop.f32.mrb[3].mxu1 }
 0x111   :  { %v1204_v45 = vadd.f32 %v1172_v42, %v1076_v38  ;;  %v1077_v46 = vsel %vm1013_vm4, %v392_v37, %v1045_v39 }
 0x112   :  { %v1173_v47 = vsel %vm1109_vm6, %v888_v40, %v1141_v43 }
 0x113   :  { %1237 = vst.msk [vmem:[%s2016_s4] sm:$0xff] %vm1236_vm5, %v1204_v45  ;;  %v1205_v48 = vadd.f32 %v1173_v47, %v1077_v46 }
 0x114   :  { %v397_v49 = vpop.f32.mrb[4].mxu0 }
 0x115   :  { %1238 = vst.msk [vmem:[%s2016_s4 + $0x8] sm:$0xff] %vm1236_vm5, %v1205_v48  ;;  %vm1014_vm7 = vcmp.ge.f32.partialorder %v397_v49, 0.0  ;;  %v1046_v50 = vmul.f32 0.01, %v397_v49  ;;  %v893_v51 = vpop.f32.mrb[4].mxu1  ;;  %v399_v52 = vpop.f32.mrb[5].mxu0 }
 0x116   :  { %vm1110_vm8 = vcmp.ge.f32.partialorder %v893_v51, 0.0  ;;  %v1142_v53 = vmul.f32 0.01, %v893_v51  ;;  %v895_v54 = vpop.f32.mrb[5].mxu1  ;;  %v400_v55 = vpop.f32.mrb[6].mxu0 }
 0x117   :  { %v1078_v56 = vsel %vm1014_vm7, %v397_v49, %v1046_v50  ;;  %vm1015_vm9 = vcmp.ge.f32.partialorder %v400_v55, 0.0  ;;  %v1047_v57 = vmul.f32 0.01, %v400_v55  ;;  %v896_v58 = vpop.f32.mrb[6].mxu1  ;;  %v402_v59 = vpop.f32.mrb[7].mxu0 }
 0x118   :  { %v1174_v60 = vsel %vm1110_vm8, %v893_v51, %v1142_v53  ;;  %vm1111_vm10 = vcmp.ge.f32.partialorder %v896_v58, 0.0  ;;  %v1143_v61 = vmul.f32 0.01, %v896_v58  ;;  %v898_v62 = vpop.f32.mrb[7].mxu1 }
 0x119   :  { %v1206_v63 = vadd.f32 %v1174_v60, %v1078_v56  ;;  %v1079_v0 = vsel %vm1015_vm9, %v400_v55, %v1047_v57 }
 0x11a   :  { %v1175_v1 = vsel %vm1111_vm10, %v896_v58, %v1143_v61 }
 0x11b   :  { %1239 = vst.msk [vmem:[%s2016_s4 + $0x10] sm:$0xff] %vm1236_vm5, %v1206_v63  ;;  %v1207_v2 = vadd.f32 %v1175_v1, %v1079_v0 }
 0x11c   :  { %v405_v3 = vpop.f32.mrb[8].mxu0 }
 0x11d   :  { %1240 = vst.msk [vmem:[%s2016_s4 + $0x18] sm:$0xff] %vm1236_vm5, %v1207_v2  ;;  %vm1016_vm11 = vcmp.ge.f32.partialorder %v405_v3, 0.0  ;;  %v1048_v4 = vmul.f32 0.01, %v405_v3  ;;  %v901_v5 = vpop.f32.mrb[8].mxu1  ;;  %v407_v6 = vpop.f32.mrb[9].mxu0 }
 0x11e   :  { %vm1112_vm12 = vcmp.ge.f32.partialorder %v901_v5, 0.0  ;;  %v1144_v7 = vmul.f32 0.01, %v901_v5  ;;  %v903_v8 = vpop.f32.mrb[9].mxu1  ;;  %v408_v9 = vpop.f32.mrb[10].mxu0 }
 0x11f   :  { %v1080_v10 = vsel %vm1016_vm11, %v405_v3, %v1048_v4  ;;  %vm1017_vm13 = vcmp.ge.f32.partialorder %v408_v9, 0.0  ;;  %v1049_v11 = vmul.f32 0.01, %v408_v9  ;;  %v904_v12 = vpop.f32.mrb[10].mxu1  ;;  %v410_v13 = vpop.f32.mrb[11].mxu0 }
 0x120   :  { %v1176_v14 = vsel %vm1112_vm12, %v901_v5, %v1144_v7  ;;  %vm1113_vm14 = vcmp.ge.f32.partialorder %v904_v12, 0.0  ;;  %v1145_v15 = vmul.f32 0.01, %v904_v12  ;;  %v906_v16 = vpop.f32.mrb[11].mxu1 }
 0x121   :  { %v1208_v17 = vadd.f32 %v1176_v14, %v1080_v10  ;;  %v1081_v18 = vsel %vm1017_vm13, %v408_v9, %v1049_v11 }
 0x122   :  { %v1177_v19 = vsel %vm1113_vm14, %v904_v12, %v1145_v15 }
 0x123   :  { %1241 = vst.msk [vmem:[%s2016_s4 + $0x20] sm:$0xff] %vm1236_vm5, %v1208_v17  ;;  %v1209_v20 = vadd.f32 %v1177_v19, %v1081_v18 }
 0x124   :  { %v413_v21 = vpop.f32.mrb[12].mxu0 }
 0x125   :  { %1242 = vst.msk [vmem:[%s2016_s4 + $0x28] sm:$0xff] %vm1236_vm5, %v1209_v20  ;;  %vm1018_vm15 = vcmp.ge.f32.partialorder %v413_v21, 0.0  ;;  %v1050_v22 = vmul.f32 0.01, %v413_v21  ;;  %v909_v23 = vpop.f32.mrb[12].mxu1  ;;  %v415_v24 = vpop.f32.mrb[13].mxu0 }
 0x126   :  { %vm1114_vm0 = vcmp.ge.f32.partialorder %v909_v23, 0.0  ;;  %v1146_v25 = vmul.f32 0.01, %v909_v23  ;;  %v911_v26 = vpop.f32.mrb[13].mxu1  ;;  %v416_v27 = vpop.f32.mrb[14].mxu0 }
 0x127   :  { %v1082_v28 = vsel %vm1018_vm15, %v413_v21, %v1050_v22  ;;  %vm1019_vm1 = vcmp.ge.f32.partialorder %v416_v27, 0.0  ;;  %v1051_v29 = vmul.f32 0.01, %v416_v27  ;;  %v912_v30 = vpop.f32.mrb[14].mxu1  ;;  %v418_v31 = vpop.f32.mrb[15].mxu0 }
 0x128   :  { %v1178_v32 = vsel %vm1114_vm0, %v909_v23, %v1146_v25  ;;  %vm1115_vm2 = vcmp.ge.f32.partialorder %v912_v30, 0.0  ;;  %v1147_v33 = vmul.f32 0.01, %v912_v30  ;;  %v914_v34 = vpop.f32.mrb[15].mxu1 }
 0x129   :  { %v1210_v35 = vadd.f32 %v1178_v32, %v1082_v28  ;;  %v1083_v36 = vsel %vm1019_vm1, %v416_v27, %v1051_v29 }
 0x12a   :  { %v1179_v37 = vsel %vm1115_vm2, %v912_v30, %v1147_v33 }
 0x12b   :  { %1243 = vst.msk [vmem:[%s2016_s4 + $0x30] sm:$0xff] %vm1236_vm5, %v1210_v35  ;;  %v1211_v38 = vadd.f32 %v1179_v37, %v1083_v36 }
 0x12c   :  { %v421_v39 = vpop.f32.mrb[16].mxu0 }
 0x12d   :  { %1244 = vst.msk [vmem:[%s2016_s4 + $0x38] sm:$0xff] %vm1236_vm5, %v1211_v38  ;;  %vm1020_vm3 = vcmp.ge.f32.partialorder %v421_v39, 0.0  ;;  %v1052_v40 = vmul.f32 0.01, %v421_v39  ;;  %v917_v41 = vpop.f32.mrb[16].mxu1  ;;  %v423_v42 = vpop.f32.mrb[17].mxu0 }
 0x12e   :  { %vm1116_vm4 = vcmp.ge.f32.partialorder %v917_v41, 0.0  ;;  %v1148_v43 = vmul.f32 0.01, %v917_v41  ;;  %v919_v44 = vpop.f32.mrb[17].mxu1  ;;  %v424_v45 = vpop.f32.mrb[18].mxu0 }
 0x12f   :  { %v1084_v46 = vsel %vm1020_vm3, %v421_v39, %v1052_v40  ;;  %vm1021_vm6 = vcmp.ge.f32.partialorder %v424_v45, 0.0  ;;  %v1053_v47 = vmul.f32 0.01, %v424_v45  ;;  %v920_v48 = vpop.f32.mrb[18].mxu1  ;;  %v426_v49 = vpop.f32.mrb[19].mxu0 }
 0x130   :  { %v1180_v50 = vsel %vm1116_vm4, %v917_v41, %v1148_v43  ;;  %vm1117_vm7 = vcmp.ge.f32.partialorder %v920_v48, 0.0  ;;  %v1149_v51 = vmul.f32 0.01, %v920_v48  ;;  %v922_v52 = vpop.f32.mrb[19].mxu1 }
 0x131   :  { %v1212_v53 = vadd.f32 %v1180_v50, %v1084_v46  ;;  %v1085_v54 = vsel %vm1021_vm6, %v424_v45, %v1053_v47 }
 0x132   :  { %v1181_v55 = vsel %vm1117_vm7, %v920_v48, %v1149_v51 }
 0x133   :  { %1245 = vst.msk [vmem:[%s2016_s4 + $0x40] sm:$0xff] %vm1236_vm5, %v1212_v53  ;;  %v1213_v56 = vadd.f32 %v1181_v55, %v1085_v54 }
 0x134   :  { %v429_v57 = vpop.f32.mrb[20].mxu0 }
 0x135   :  { %1246 = vst.msk [vmem:[%s2016_s4 + $0x48] sm:$0xff] %vm1236_vm5, %v1213_v56  ;;  %vm1022_vm8 = vcmp.ge.f32.partialorder %v429_v57, 0.0  ;;  %v1054_v58 = vmul.f32 0.01, %v429_v57  ;;  %v925_v59 = vpop.f32.mrb[20].mxu1  ;;  %v431_v60 = vpop.f32.mrb[21].mxu0 }
 0x136   :  { %vm1118_vm9 = vcmp.ge.f32.partialorder %v925_v59, 0.0  ;;  %v1150_v61 = vmul.f32 0.01, %v925_v59  ;;  %v927_v62 = vpop.f32.mrb[21].mxu1  ;;  %v432_v63 = vpop.f32.mrb[22].mxu0 }
 0x137   :  { %v1086_v0 = vsel %vm1022_vm8, %v429_v57, %v1054_v58  ;;  %vm1023_vm10 = vcmp.ge.f32.partialorder %v432_v63, 0.0  ;;  %v1055_v1 = vmul.f32 0.01, %v432_v63  ;;  %v928_v2 = vpop.f32.mrb[22].mxu1  ;;  %v434_v3 = vpop.f32.mrb[23].mxu0 }
 0x138   :  { %v1182_v4 = vsel %vm1118_vm9, %v925_v59, %v1150_v61  ;;  %vm1119_vm11 = vcmp.ge.f32.partialorder %v928_v2, 0.0  ;;  %v1151_v5 = vmul.f32 0.01, %v928_v2  ;;  %v930_v6 = vpop.f32.mrb[23].mxu1 }
 0x139   :  { %v1214_v7 = vadd.f32 %v1182_v4, %v1086_v0  ;;  %v1087_v8 = vsel %vm1023_vm10, %v432_v63, %v1055_v1 }
 0x13a   :  { %v1183_v9 = vsel %vm1119_vm11, %v928_v2, %v1151_v5 }
 0x13b   :  { %1247 = vst.msk [vmem:[%s2016_s4 + $0x50] sm:$0xff] %vm1236_vm5, %v1214_v7  ;;  %v1215_v10 = vadd.f32 %v1183_v9, %v1087_v8 }
 0x13c   :  { %v437_v11 = vpop.f32.mrb[24].mxu0 }
 0x13d   :  { %1248 = vst.msk [vmem:[%s2016_s4 + $0x58] sm:$0xff] %vm1236_vm5, %v1215_v10  ;;  %vm1024_vm12 = vcmp.ge.f32.partialorder %v437_v11, 0.0  ;;  %v1056_v12 = vmul.f32 0.01, %v437_v11  ;;  %v933_v13 = vpop.f32.mrb[24].mxu1  ;;  %v439_v14 = vpop.f32.mrb[25].mxu0 }
 0x13e   :  { %vm1120_vm13 = vcmp.ge.f32.partialorder %v933_v13, 0.0  ;;  %v1152_v15 = vmul.f32 0.01, %v933_v13  ;;  %v935_v16 = vpop.f32.mrb[25].mxu1  ;;  %v440_v17 = vpop.f32.mrb[26].mxu0 }
 0x13f   :  { %v1088_v18 = vsel %vm1024_vm12, %v437_v11, %v1056_v12  ;;  %vm1025_vm14 = vcmp.ge.f32.partialorder %v440_v17, 0.0  ;;  %v1057_v19 = vmul.f32 0.01, %v440_v17  ;;  %v936_v20 = vpop.f32.mrb[26].mxu1  ;;  %v442_v21 = vpop.f32.mrb[27].mxu0 }
 0x140   :  { %v1184_v22 = vsel %vm1120_vm13, %v933_v13, %v1152_v15  ;;  %vm1121_vm15 = vcmp.ge.f32.partialorder %v936_v20, 0.0  ;;  %v1153_v23 = vmul.f32 0.01, %v936_v20  ;;  %v938_v24 = vpop.f32.mrb[27].mxu1 }
 0x141   :  { %v1216_v25 = vadd.f32 %v1184_v22, %v1088_v18  ;;  %v1089_v26 = vsel %vm1025_vm14, %v440_v17, %v1057_v19 }
 0x142   :  { %v1185_v27 = vsel %vm1121_vm15, %v936_v20, %v1153_v23 }
 0x143   :  { %1249 = vst.msk [vmem:[%s2016_s4 + $0x60] sm:$0xff] %vm1236_vm5, %v1216_v25  ;;  %v1217_v28 = vadd.f32 %v1185_v27, %v1089_v26 }
 0x144   :  { %v445_v29 = vpop.f32.mrb[28].mxu0 }
 0x145   :  { %1250 = vst.msk [vmem:[%s2016_s4 + $0x68] sm:$0xff] %vm1236_vm5, %v1217_v28  ;;  %vm1026_vm0 = vcmp.ge.f32.partialorder %v445_v29, 0.0  ;;  %v1058_v30 = vmul.f32 0.01, %v445_v29  ;;  %v941_v31 = vpop.f32.mrb[28].mxu1  ;;  %v447_v32 = vpop.f32.mrb[29].mxu0 }
 0x146   :  { %vm1122_vm1 = vcmp.ge.f32.partialorder %v941_v31, 0.0  ;;  %v1154_v33 = vmul.f32 0.01, %v941_v31  ;;  %v943_v34 = vpop.f32.mrb[29].mxu1  ;;  %v448_v35 = vpop.f32.mrb[30].mxu0 }
 0x147   :  { %v1090_v36 = vsel %vm1026_vm0, %v445_v29, %v1058_v30  ;;  %vm1027_vm2 = vcmp.ge.f32.partialorder %v448_v35, 0.0  ;;  %v1059_v37 = vmul.f32 0.01, %v448_v35  ;;  %v944_v38 = vpop.f32.mrb[30].mxu1  ;;  %v450_v39 = vpop.f32.mrb[31].mxu0 }
 0x148   :  { %v1186_v40 = vsel %vm1122_vm1, %v941_v31, %v1154_v33  ;;  %vm1123_vm3 = vcmp.ge.f32.partialorder %v944_v38, 0.0  ;;  %v1155_v41 = vmul.f32 0.01, %v944_v38  ;;  %v946_v42 = vpop.f32.mrb[31].mxu1 }
 0x149   :  { %v1218_v43 = vadd.f32 %v1186_v40, %v1090_v36  ;;  %v1091_v44 = vsel %vm1027_vm2, %v448_v35, %v1059_v37 }
 0x14a   :  { %v1187_v45 = vsel %vm1123_vm3, %v944_v38, %v1155_v41 }
 0x14b   :  { %1251 = vst.msk [vmem:[%s2016_s4 + $0x70] sm:$0xff] %vm1236_vm5, %v1218_v43  ;;  %v1219_v46 = vadd.f32 %v1187_v45, %v1091_v44 }
 0x14c   :  { %v453_v47 = vpop.f32.mrb[32].mxu0 }
 0x14d   :  { %1252 = vst.msk [vmem:[%s2016_s4 + $0x78] sm:$0xff] %vm1236_vm5, %v1219_v46  ;;  %vm1028_vm4 = vcmp.ge.f32.partialorder %v453_v47, 0.0  ;;  %v1060_v48 = vmul.f32 0.01, %v453_v47  ;;  %v949_v49 = vpop.f32.mrb[32].mxu1  ;;  %v455_v50 = vpop.f32.mrb[33].mxu0 }
 0x14e   :  { %vm1124_vm6 = vcmp.ge.f32.partialorder %v949_v49, 0.0  ;;  %v1156_v51 = vmul.f32 0.01, %v949_v49  ;;  %v951_v52 = vpop.f32.mrb[33].mxu1  ;;  %v456_v53 = vpop.f32.mrb[34].mxu0 }
 0x14f   :  { %v1092_v54 = vsel %vm1028_vm4, %v453_v47, %v1060_v48  ;;  %vm1029_vm7 = vcmp.ge.f32.partialorder %v456_v53, 0.0  ;;  %v1061_v55 = vmul.f32 0.01, %v456_v53  ;;  %v952_v56 = vpop.f32.mrb[34].mxu1  ;;  %v458_v57 = vpop.f32.mrb[35].mxu0 }
 0x150   :  { %v1188_v58 = vsel %vm1124_vm6, %v949_v49, %v1156_v51  ;;  %vm1125_vm8 = vcmp.ge.f32.partialorder %v952_v56, 0.0  ;;  %v1157_v59 = vmul.f32 0.01, %v952_v56  ;;  %v954_v60 = vpop.f32.mrb[35].mxu1 }
 0x151   :  { %v1220_v61 = vadd.f32 %v1188_v58, %v1092_v54  ;;  %v1093_v62 = vsel %vm1029_vm7, %v456_v53, %v1061_v55 }
 0x152   :  { %v1189_v63 = vsel %vm1125_vm8, %v952_v56, %v1157_v59 }
 0x153   :  { %1253 = vst.msk [vmem:[%s2016_s4 + $0x80] sm:$0xff] %vm1236_vm5, %v1220_v61  ;;  %v1221_v0 = vadd.f32 %v1189_v63, %v1093_v62 }
 0x154   :  { %v461_v1 = vpop.f32.mrb[36].mxu0 }
 0x155   :  { %1254 = vst.msk [vmem:[%s2016_s4 + $0x88] sm:$0xff] %vm1236_vm5, %v1221_v0  ;;  %vm1030_vm9 = vcmp.ge.f32.partialorder %v461_v1, 0.0  ;;  %v1062_v2 = vmul.f32 0.01, %v461_v1  ;;  %v957_v3 = vpop.f32.mrb[36].mxu1  ;;  %v463_v4 = vpop.f32.mrb[37].mxu0 }
 0x156   :  { %vm1126_vm10 = vcmp.ge.f32.partialorder %v957_v3, 0.0  ;;  %v1158_v5 = vmul.f32 0.01, %v957_v3  ;;  %v959_v6 = vpop.f32.mrb[37].mxu1  ;;  %v464_v7 = vpop.f32.mrb[38].mxu0 }
 0x157   :  { %v1094_v8 = vsel %vm1030_vm9, %v461_v1, %v1062_v2  ;;  %vm1031_vm11 = vcmp.ge.f32.partialorder %v464_v7, 0.0  ;;  %v1063_v9 = vmul.f32 0.01, %v464_v7  ;;  %v960_v10 = vpop.f32.mrb[38].mxu1  ;;  %v466_v11 = vpop.f32.mrb[39].mxu0 }
 0x158   :  { %v1190_v12 = vsel %vm1126_vm10, %v957_v3, %v1158_v5  ;;  %vm1127_vm12 = vcmp.ge.f32.partialorder %v960_v10, 0.0  ;;  %v1159_v13 = vmul.f32 0.01, %v960_v10  ;;  %v962_v14 = vpop.f32.mrb[39].mxu1 }
 0x159   :  { %v1222_v15 = vadd.f32 %v1190_v12, %v1094_v8  ;;  %v1095_v16 = vsel %vm1031_vm11, %v464_v7, %v1063_v9 }
 0x15a   :  { %v1191_v17 = vsel %vm1127_vm12, %v960_v10, %v1159_v13 }
 0x15b   :  { %1255 = vst.msk [vmem:[%s2016_s4 + $0x90] sm:$0xff] %vm1236_vm5, %v1222_v15  ;;  %v1223_v18 = vadd.f32 %v1191_v17, %v1095_v16 }
 0x15c   :  { %v469_v19 = vpop.f32.mrb[40].mxu0 }
 0x15d   :  { %1256 = vst.msk [vmem:[%s2016_s4 + $0x98] sm:$0xff] %vm1236_vm5, %v1223_v18  ;;  %vm1032_vm13 = vcmp.ge.f32.partialorder %v469_v19, 0.0  ;;  %v1064_v20 = vmul.f32 0.01, %v469_v19  ;;  %v965_v21 = vpop.f32.mrb[40].mxu1  ;;  %v471_v22 = vpop.f32.mrb[41].mxu0 }
 0x15e   :  { %vm1128_vm14 = vcmp.ge.f32.partialorder %v965_v21, 0.0  ;;  %v1160_v23 = vmul.f32 0.01, %v965_v21  ;;  %v967_v24 = vpop.f32.mrb[41].mxu1  ;;  %v472_v25 = vpop.f32.mrb[42].mxu0 }
 0x15f   :  { %v1096_v26 = vsel %vm1032_vm13, %v469_v19, %v1064_v20  ;;  %vm1033_vm15 = vcmp.ge.f32.partialorder %v472_v25, 0.0  ;;  %v1065_v27 = vmul.f32 0.01, %v472_v25  ;;  %v968_v28 = vpop.f32.mrb[42].mxu1  ;;  %v474_v29 = vpop.f32.mrb[43].mxu0 }
 0x160   :  { %v1192_v30 = vsel %vm1128_vm14, %v965_v21, %v1160_v23  ;;  %vm1129_vm0 = vcmp.ge.f32.partialorder %v968_v28, 0.0  ;;  %v1161_v31 = vmul.f32 0.01, %v968_v28  ;;  %v970_v32 = vpop.f32.mrb[43].mxu1 }
 0x161   :  { %v1224_v33 = vadd.f32 %v1192_v30, %v1096_v26  ;;  %v1097_v34 = vsel %vm1033_vm15, %v472_v25, %v1065_v27 }
 0x162   :  { %v1193_v35 = vsel %vm1129_vm0, %v968_v28, %v1161_v31 }
 0x163   :  { %1257 = vst.msk [vmem:[%s2016_s4 + $0xa0] sm:$0xff] %vm1236_vm5, %v1224_v33  ;;  %v1225_v36 = vadd.f32 %v1193_v35, %v1097_v34 }
 0x164   :  { %v477_v37 = vpop.f32.mrb[44].mxu0 }
 0x165   :  { %1258 = vst.msk [vmem:[%s2016_s4 + $0xa8] sm:$0xff] %vm1236_vm5, %v1225_v36  ;;  %vm1034_vm1 = vcmp.ge.f32.partialorder %v477_v37, 0.0  ;;  %v1066_v38 = vmul.f32 0.01, %v477_v37  ;;  %v973_v39 = vpop.f32.mrb[44].mxu1  ;;  %v479_v40 = vpop.f32.mrb[45].mxu0 }
 0x166   :  { %vm1130_vm2 = vcmp.ge.f32.partialorder %v973_v39, 0.0  ;;  %v1162_v41 = vmul.f32 0.01, %v973_v39  ;;  %v975_v42 = vpop.f32.mrb[45].mxu1  ;;  %v480_v43 = vpop.f32.mrb[46].mxu0 }
 0x167   :  { %v1098_v44 = vsel %vm1034_vm1, %v477_v37, %v1066_v38  ;;  %vm1035_vm3 = vcmp.ge.f32.partialorder %v480_v43, 0.0  ;;  %v1067_v45 = vmul.f32 0.01, %v480_v43  ;;  %v976_v46 = vpop.f32.mrb[46].mxu1  ;;  %v482_v47 = vpop.f32.mrb[47].mxu0 }
 0x168   :  { %v1194_v48 = vsel %vm1130_vm2, %v973_v39, %v1162_v41  ;;  %vm1131_vm4 = vcmp.ge.f32.partialorder %v976_v46, 0.0  ;;  %v1163_v49 = vmul.f32 0.01, %v976_v46  ;;  %v978_v50 = vpop.f32.mrb[47].mxu1 }
 0x169   :  { %v1226_v51 = vadd.f32 %v1194_v48, %v1098_v44  ;;  %v1099_v52 = vsel %vm1035_vm3, %v480_v43, %v1067_v45 }
 0x16a   :  { %v1195_v53 = vsel %vm1131_vm4, %v976_v46, %v1163_v49 }
 0x16b   :  { %1259 = vst.msk [vmem:[%s2016_s4 + $0xb0] sm:$0xff] %vm1236_vm5, %v1226_v51  ;;  %v1227_v54 = vadd.f32 %v1195_v53, %v1099_v52 }
 0x16c   :  { %v485_v55 = vpop.f32.mrb[48].mxu0 }
 0x16d   :  { %1260 = vst.msk [vmem:[%s2016_s4 + $0xb8] sm:$0xff] %vm1236_vm5, %v1227_v54  ;;  %vm1036_vm6 = vcmp.ge.f32.partialorder %v485_v55, 0.0  ;;  %v1068_v56 = vmul.f32 0.01, %v485_v55  ;;  %v981_v57 = vpop.f32.mrb[48].mxu1  ;;  %v487_v58 = vpop.f32.mrb[49].mxu0 }
 0x16e   :  { %vm1132_vm7 = vcmp.ge.f32.partialorder %v981_v57, 0.0  ;;  %v1164_v59 = vmul.f32 0.01, %v981_v57  ;;  %v983_v60 = vpop.f32.mrb[49].mxu1  ;;  %v488_v61 = vpop.f32.mrb[50].mxu0 }
 0x16f   :  { %v1100_v62 = vsel %vm1036_vm6, %v485_v55, %v1068_v56  ;;  %vm1037_vm8 = vcmp.ge.f32.partialorder %v488_v61, 0.0  ;;  %v1069_v63 = vmul.f32 0.01, %v488_v61  ;;  %v984_v0 = vpop.f32.mrb[50].mxu1  ;;  %v490_v1 = vpop.f32.mrb[51].mxu0 }
 0x170   :  { %v1196_v2 = vsel %vm1132_vm7, %v981_v57, %v1164_v59  ;;  %vm1133_vm9 = vcmp.ge.f32.partialorder %v984_v0, 0.0  ;;  %v1165_v3 = vmul.f32 0.01, %v984_v0  ;;  %v986_v4 = vpop.f32.mrb[51].mxu1 }
 0x171   :  { %v1228_v5 = vadd.f32 %v1196_v2, %v1100_v62  ;;  %v1101_v6 = vsel %vm1037_vm8, %v488_v61, %v1069_v63 }
 0x172   :  { %v1197_v7 = vsel %vm1133_vm9, %v984_v0, %v1165_v3 }
 0x173   :  { %1261 = vst.msk [vmem:[%s2016_s4 + $0xc0] sm:$0xff] %vm1236_vm5, %v1228_v5  ;;  %v1229_v8 = vadd.f32 %v1197_v7, %v1101_v6 }
 0x174   :  { %v493_v9 = vpop.f32.mrb[52].mxu0 }
 0x175   :  { %1262 = vst.msk [vmem:[%s2016_s4 + $0xc8] sm:$0xff] %vm1236_vm5, %v1229_v8  ;;  %vm1038_vm10 = vcmp.ge.f32.partialorder %v493_v9, 0.0  ;;  %v1070_v10 = vmul.f32 0.01, %v493_v9  ;;  %v989_v11 = vpop.f32.mrb[52].mxu1  ;;  %v495_v12 = vpop.f32.mrb[53].mxu0 }
 0x176   :  { %vm1134_vm11 = vcmp.ge.f32.partialorder %v989_v11, 0.0  ;;  %v1166_v13 = vmul.f32 0.01, %v989_v11  ;;  %v991_v14 = vpop.f32.mrb[53].mxu1  ;;  %v496_v15 = vpop.f32.mrb[54].mxu0 }
 0x177   :  { %v1102_v16 = vsel %vm1038_vm10, %v493_v9, %v1070_v10  ;;  %vm1039_vm12 = vcmp.ge.f32.partialorder %v496_v15, 0.0  ;;  %v1071_v17 = vmul.f32 0.01, %v496_v15  ;;  %v992_v18 = vpop.f32.mrb[54].mxu1  ;;  %v498_v19 = vpop.f32.mrb[55].mxu0 }
 0x178   :  { %v1198_v20 = vsel %vm1134_vm11, %v989_v11, %v1166_v13  ;;  %vm1135_vm13 = vcmp.ge.f32.partialorder %v992_v18, 0.0  ;;  %v1167_v21 = vmul.f32 0.01, %v992_v18  ;;  %v994_v22 = vpop.f32.mrb[55].mxu1 }
 0x179   :  { %v1230_v23 = vadd.f32 %v1198_v20, %v1102_v16  ;;  %v1103_v24 = vsel %vm1039_vm12, %v496_v15, %v1071_v17 }
 0x17a   :  { %v1199_v25 = vsel %vm1135_vm13, %v992_v18, %v1167_v21 }
 0x17b   :  { %1263 = vst.msk [vmem:[%s2016_s4 + $0xd0] sm:$0xff] %vm1236_vm5, %v1230_v23  ;;  %v1231_v26 = vadd.f32 %v1199_v25, %v1103_v24 }
 0x17c   :  { %v501_v27 = vpop.f32.mrb[56].mxu0 }
 0x17d   :  { %1264 = vst.msk [vmem:[%s2016_s4 + $0xd8] sm:$0xff] %vm1236_vm5, %v1231_v26  ;;  %vm1040_vm14 = vcmp.ge.f32.partialorder %v501_v27, 0.0  ;;  %v1072_v28 = vmul.f32 0.01, %v501_v27  ;;  %v997_v29 = vpop.f32.mrb[56].mxu1  ;;  %v503_v30 = vpop.f32.mrb[57].mxu0 }
 0x17e   :  { %vm1136_vm15 = vcmp.ge.f32.partialorder %v997_v29, 0.0  ;;  %v1168_v31 = vmul.f32 0.01, %v997_v29  ;;  %v999_v32 = vpop.f32.mrb[57].mxu1  ;;  %v504_v33 = vpop.f32.mrb[58].mxu0 }
 0x17f   :  { %v1104_v34 = vsel %vm1040_vm14, %v501_v27, %v1072_v28  ;;  %vm1041_vm0 = vcmp.ge.f32.partialorder %v504_v33, 0.0  ;;  %v1073_v35 = vmul.f32 0.01, %v504_v33  ;;  %v1000_v36 = vpop.f32.mrb[58].mxu1  ;;  %v506_v37 = vpop.f32.mrb[59].mxu0 }
 0x180   :  { %v1200_v38 = vsel %vm1136_vm15, %v997_v29, %v1168_v31  ;;  %vm1137_vm1 = vcmp.ge.f32.partialorder %v1000_v36, 0.0  ;;  %v1169_v39 = vmul.f32 0.01, %v1000_v36  ;;  %v1002_v40 = vpop.f32.mrb[59].mxu1 }
 0x181   :  { %v1232_v41 = vadd.f32 %v1200_v38, %v1104_v34  ;;  %v1105_v42 = vsel %vm1041_vm0, %v504_v33, %v1073_v35 }
 0x182   :  { %v1201_v43 = vsel %vm1137_vm1, %v1000_v36, %v1169_v39 }
 0x183   :  { %1265 = vst.msk [vmem:[%s2016_s4 + $0xe0] sm:$0xff] %vm1236_vm5, %v1232_v41  ;;  %v1233_v44 = vadd.f32 %v1201_v43, %v1105_v42 }
 0x184   :  { %v509_v45 = vpop.f32.mrb[60].mxu0 }
 0x185   :  { %1266 = vst.msk [vmem:[%s2016_s4 + $0xe8] sm:$0xff] %vm1236_vm5, %v1233_v44  ;;  %vm1042_vm2 = vcmp.ge.f32.partialorder %v509_v45, 0.0  ;;  %v1074_v46 = vmul.f32 0.01, %v509_v45  ;;  %v1005_v47 = vpop.f32.mrb[60].mxu1  ;;  %v511_v48 = vpop.f32.mrb[61].mxu0 }
 0x186   :  { %vm1138_vm3 = vcmp.ge.f32.partialorder %v1005_v47, 0.0  ;;  %v1170_v49 = vmul.f32 0.01, %v1005_v47  ;;  %v1007_v50 = vpop.f32.mrb[61].mxu1  ;;  %v512_v51 = vpop.f32.mrb[62].mxu0 }
 0x187   :  { %v1106_v52 = vsel %vm1042_vm2, %v509_v45, %v1074_v46  ;;  %vm1043_vm4 = vcmp.ge.f32.partialorder %v512_v51, 0.0  ;;  %v1075_v53 = vmul.f32 0.01, %v512_v51  ;;  %v1008_v54 = vpop.f32.mrb[62].mxu1  ;;  %v514_v55 = vpop.f32.mrb[63].mxu0 }
 0x188   :  { %v1202_v56 = vsel %vm1138_vm3, %v1005_v47, %v1170_v49  ;;  %vm1139_vm6 = vcmp.ge.f32.partialorder %v1008_v54, 0.0  ;;  %v1171_v57 = vmul.f32 0.01, %v1008_v54  ;;  %v1010_v58 = vpop.f32.mrb[63].mxu1 }
 0x189   :  { %v1234_v59 = vadd.f32 %v1202_v56, %v1106_v52  ;;  %v1107_v60 = vsel %vm1043_vm4, %v512_v51, %v1075_v53 }
 0x18a   :  { %v1203_v61 = vsel %vm1139_vm6, %v1008_v54, %v1171_v57 }
 0x18b   :  { %1267 = vst.msk [vmem:[%s2016_s4 + $0xf0] sm:$0xff] %vm1236_vm5, %v1234_v59  ;;  %v1235_v62 = vadd.f32 %v1203_v61, %v1107_v60 }
 0x18d   :  { %1268 = vst.msk [vmem:[%s2016_s4 + $0xf8] sm:$0xff] %vm1236_vm5, %v1235_v62 }

// kernel: glnet_forward.12
= control target key start
LH: loop header
LB: loop body
LE: loop exit
PB: predicated region body
PF: predicated region fallthrough
CT: control target
= control target key end

     0   :  { %v1528_v0 = vmov 0   ;;  %vm304_vm0 = vcmask 719872   ;;  %vm353_vm1 = vcmask 1043456   ;;  %vm1110_vm3 = vcmask 64512   ;;  %s2151_s1 = inlined_call_operand.vmem [shape: bf16[216,8], index: 1, kind: input, shape index: {}]   ;;  %s2152_s3 = inlined_call_operand.vmem [shape: bf16[216,8], index: 3, kind: input, shape index: {}]   ;;  %s2153_s0 = inlined_call_operand.vmem [shape: bf16[256,216], index: 0, kind: input, shape index: {}]   ;;  %s2154_s2 = inlined_call_operand.vmem [shape: bf16[256,216], index: 2, kind: input, shape index: {}]   ;;  %s2155_s4 = inlined_call_operand.vmem [shape: f32[256,8], index: 4, kind: output, shape index: {0}]   ;;  %s2156_s5 = inlined_call_operand.vmem [shape: f32[256,8], index: 5, kind: output, shape index: {1}]  }
   0x1   :  { %357 = vmatprep.subr.bf16.mxu0 %v1528_v0  ;;  %853 = vmatprep.subr.bf16.mxu1 %v1528_v0  ;;  %v1404_v1 = vld [vmem:[%s2151_s1] sm:$0xff]   ;;  %v1406_v3 = vld [vmem:[%s2151_s1 + $0x8] sm:$0xff]   ;;  %v1408_v5 = vld [vmem:[%s2151_s1 + $0x10] sm:$0xff]  }
   0x2   :  { %v1405_v2 = vld [vmem:[%s2152_s3] sm:$0xff]   ;;  %358 = vmatpush1.bf16.msra.mxu0 %v1404_v1  ;;  %v1407_v4 = vld [vmem:[%s2152_s3 + $0x8] sm:$0xff]   ;;  %v1409_v6 = vld [vmem:[%s2152_s3 + $0x10] sm:$0xff]  }
   0x3   :  { %854 = vmatpush1.bf16.msra.mxu1 %v1405_v2  ;;  %359 = vmatprep.subr.bf16.mxu0 %v1528_v0  ;;  %v1410_v7 = vld [vmem:[%s2151_s1 + $0x18] sm:$0xff]   ;;  %v1412_v9 = vld [vmem:[%s2151_s1 + $0x20] sm:$0xff]   ;;  %v1414_v11 = vld [vmem:[%s2151_s1 + $0x28] sm:$0xff]  }
   0x4   :  { %855 = vmatprep.subr.bf16.mxu1 %v1528_v0  ;;  %v1411_v8 = vld [vmem:[%s2152_s3 + $0x18] sm:$0xff]   ;;  %v1413_v10 = vld [vmem:[%s2152_s3 + $0x20] sm:$0xff]   ;;  %v1415_v12 = vld [vmem:[%s2152_s3 + $0x28] sm:$0xff]  }
   0x5   :  { %v1416_v13 = vld [vmem:[%s2151_s1 + $0x30] sm:$0xff]   ;;  %v1418_v15 = vld [vmem:[%s2151_s1 + $0x38] sm:$0xff]   ;;  %v1434_v17 = vld [vmem:[%s2153_s0 + $0x4] ss:$8 sps:$4 sm:$0xff]  }
   0x6   :  { %360 = vmatpush1.bf16.msra.mxu0 %v1406_v3  ;;  %v1417_v14 = vld [vmem:[%s2152_s3 + $0x30] sm:$0xff]   ;;  %v1419_v16 = vld [vmem:[%s2152_s3 + $0x38] sm:$0xff]   ;;  %v1437_v18 = vld [vmem:[%s2154_s2 + $0x4] ss:$8 sps:$4 sm:$0xff]   ;;  %1325 = vmatprep.mubr.msk.bf16.mxu0 %vm304_vm0, %v1434_v17 }
   0x7   :  { %856 = vmatpush1.bf16.msra.mxu1 %v1407_v4  ;;  %361 = vmatprep.subr.bf16.mxu0 %v1528_v0  ;;  %v1420_v19 = vld [vmem:[%s2151_s1 + $0x40] sm:$0xff]   ;;  %v1422_v21 = vld [vmem:[%s2151_s1 + $0x48] sm:$0xff]   ;;  %v1424_v23 = vld [vmem:[%s2151_s1 + $0x50] sm:$0xff]  }
   0x8   :  { %857 = vmatprep.subr.bf16.mxu1 %v1528_v0  ;;  %v1421_v20 = vld [vmem:[%s2152_s3 + $0x40] sm:$0xff]   ;;  %1387 = vmatprep.mubr.msk.bf16.mxu1 %vm304_vm0, %v1437_v18  ;;  %v1423_v22 = vld [vmem:[%s2152_s3 + $0x48] sm:$0xff]   ;;  %v1425_v24 = vld [vmem:[%s2152_s3 + $0x50] sm:$0xff]  }
   0x9   :  { %v1426_v25 = vld [vmem:[%s2151_s1 + $0x58] sm:$0xff]   ;;  %v1428_v27 = vld [vmem:[%s2151_s1 + $0x60] sm:$0xff]   ;;  %v1430_v29 = vld [vmem:[%s2151_s1 + $0x68] ss:$0 sps:$4 sm:$0xff]  }
   0xa   :  { %362 = vmatpush1.bf16.msra.mxu0 %v1408_v5  ;;  %v1427_v26 = vld [vmem:[%s2152_s3 + $0x58] sm:$0xff]   ;;  %v1429_v28 = vld [vmem:[%s2152_s3 + $0x60] sm:$0xff]   ;;  %v1431_v30 = vld [vmem:[%s2152_s3 + $0x68] ss:$0 sps:$4 sm:$0xff]   ;;  %v355_v31 = vsel %vm353_vm1, %v1430_v29, 0 }
   0xb   :  { %858 = vmatpush1.bf16.msra.mxu1 %v1409_v6  ;;  %363 = vmatprep.subr.bf16.mxu0 %v1528_v0  ;;  %v851_v32 = vsel %vm353_vm1, %v1431_v30, 0  ;;  %v1432_v33 = vld [vmem:[%s2153_s0] ss:$8 sps:$4 sm:$0xff]   ;;  %v1438_v35 = vld [vmem:[%s2153_s0 + $0x14] ss:$8 sps:$4 sm:$0xff]  }
   0xc   :  { %859 = vmatprep.subr.bf16.mxu1 %v1528_v0  ;;  %v1435_v34 = vld [vmem:[%s2154_s2] ss:$8 sps:$4 sm:$0xff]   ;;  %v1440_v36 = vld [vmem:[%s2154_s2 + $0x14] ss:$8 sps:$4 sm:$0xff]   ;;  %v1442_v37 = vld [vmem:[%s2153_s0 + $0x10] ss:$8 sps:$4 sm:$0xff]  }
   0xd   :  { %v1443_v38 = vld [vmem:[%s2154_s2 + $0x10] ss:$8 sps:$4 sm:$0xff]   ;;  %v1444_v39 = vld [vmem:[%s2153_s0 + $0x24] ss:$8 sps:$4 sm:$0xff]   ;;  %v1448_v41 = vld [vmem:[%s2153_s0 + $0x20] ss:$8 sps:$4 sm:$0xff]  }
   0xe   :  { %364 = vmatpush1.bf16.msra.mxu0 %v1410_v7  ;;  %v1446_v40 = vld [vmem:[%s2154_s2 + $0x24] ss:$8 sps:$4 sm:$0xff]   ;;  %v1449_v42 = vld [vmem:[%s2154_s2 + $0x20] ss:$8 sps:$4 sm:$0xff]   ;;  %v1450_v43 = vld [vmem:[%s2153_s0 + $0x34] ss:$8 sps:$4 sm:$0xff]  }
   0xf   :  { %860 = vmatpush1.bf16.msra.mxu1 %v1411_v8  ;;  %365 = vmatprep.subr.bf16.mxu0 %v1528_v0  ;;  %v1452_v44 = vld [vmem:[%s2154_s2 + $0x34] ss:$8 sps:$4 sm:$0xff]   ;;  %v1454_v45 = vld [vmem:[%s2153_s0 + $0x30] ss:$8 sps:$4 sm:$0xff]   ;;  %v1456_v47 = vld [vmem:[%s2153_s0 + $0x44] ss:$8 sps:$4 sm:$0xff]  }
  0x10   :  { %861 = vmatprep.subr.bf16.mxu1 %v1528_v0  ;;  %v1455_v46 = vld [vmem:[%s2154_s2 + $0x30] ss:$8 sps:$4 sm:$0xff]   ;;  %v1458_v48 = vld [vmem:[%s2154_s2 + $0x44] ss:$8 sps:$4 sm:$0xff]   ;;  %v1460_v49 = vld [vmem:[%s2153_s0 + $0x40] ss:$8 sps:$4 sm:$0xff]  }
  0x11   :  { %v1461_v50 = vld [vmem:[%s2154_s2 + $0x40] ss:$8 sps:$4 sm:$0xff]   ;;  %v1462_v51 = vld [vmem:[%s2153_s0 + $0x54] ss:$8 sps:$4 sm:$0xff]   ;;  %v1466_v53 = vld [vmem:[%s2153_s0 + $0x50] ss:$8 sps:$4 sm:$0xff]  }
  0x12   :  { %366 = vmatpush1.bf16.msra.mxu0 %v1412_v9  ;;  %v1464_v52 = vld [vmem:[%s2154_s2 + $0x54] ss:$8 sps:$4 sm:$0xff]   ;;  %v1467_v54 = vld [vmem:[%s2154_s2 + $0x50] ss:$8 sps:$4 sm:$0xff]   ;;  %v1468_v55 = vld [vmem:[%s2153_s0 + $0x64] ss:$8 sps:$4 sm:$0xff]  }
  0x13   :  { %862 = vmatpush1.bf16.msra.mxu1 %v1413_v10  ;;  %367 = vmatprep.subr.bf16.mxu0 %v1528_v0  ;;  %v1470_v56 = vld [vmem:[%s2154_s2 + $0x64] ss:$8 sps:$4 sm:$0xff]   ;;  %v1472_v57 = vld [vmem:[%s2153_s0 + $0x60] ss:$8 sps:$4 sm:$0xff]   ;;  %v1474_v59 = vld [vmem:[%s2153_s0 + $0x74] ss:$8 sps:$4 sm:$0xff]  }
  0x14   :  { %863 = vmatprep.subr.bf16.mxu1 %v1528_v0  ;;  %v1473_v58 = vld [vmem:[%s2154_s2 + $0x60] ss:$8 sps:$4 sm:$0xff]   ;;  %v1476_v60 = vld [vmem:[%s2154_s2 + $0x74] ss:$8 sps:$4 sm:$0xff]   ;;  %v1478_v61 = vld [vmem:[%s2153_s0 + $0x70] ss:$8 sps:$4 sm:$0xff]  }
  0x15   :  { %v1479_v62 = vld [vmem:[%s2154_s2 + $0x70] ss:$8 sps:$4 sm:$0xff]   ;;  %v1480_v63 = vld [vmem:[%s2153_s0 + $0x84] ss:$8 sps:$4 sm:$0xff]   ;;  %v1484_v1 = vld [vmem:[%s2153_s0 + $0x80] ss:$8 sps:$4 sm:$0xff]  }
  0x16   :  { %368 = vmatpush1.bf16.msra.mxu0 %v1414_v11  ;;  %v1485_v2 = vld [vmem:[%s2154_s2 + $0x80] ss:$8 sps:$4 sm:$0xff]   ;;  %v1486_v3 = vld [vmem:[%s2153_s0 + $0x94] ss:$8 sps:$4 sm:$0xff]   ;;  %v1490_v5 = vld [vmem:[%s2153_s0 + $0x90] ss:$8 sps:$4 sm:$0xff]  }
  0x17   :  { %864 = vmatpush1.bf16.msra.mxu1 %v1415_v12  ;;  %369 = vmatprep.subr.bf16.mxu0 %v1528_v0  ;;  %v1488_v4 = vld [vmem:[%s2154_s2 + $0x94] ss:$8 sps:$4 sm:$0xff]   ;;  %v1491_v6 = vld [vmem:[%s2154_s2 + $0x90] ss:$8 sps:$4 sm:$0xff]   ;;  %v1492_v7 = vld [vmem:[%s2153_s0 + $0xa4] ss:$8 sps:$4 sm:$0xff]  }
  0x18   :  { %865 = vmatprep.subr.bf16.mxu1 %v1528_v0  ;;  %v1494_v8 = vld [vmem:[%s2154_s2 + $0xa4] ss:$8 sps:$4 sm:$0xff]   ;;  %v1496_v9 = vld [vmem:[%s2153_s0 + $0xa0] ss:$8 sps:$4 sm:$0xff]   ;;  %v1498_v11 = vld [vmem:[%s2153_s0 + $0xb4] ss:$8 sps:$4 sm:$0xff]  }
  0x19   :  { %v1497_v10 = vld [vmem:[%s2154_s2 + $0xa0] ss:$8 sps:$4 sm:$0xff]   ;;  %v1500_v12 = vld [vmem:[%s2154_s2 + $0xb4] ss:$8 sps:$4 sm:$0xff]   ;;  %v1526_v29 = vld [vmem:[%s2153_s0 + $0xf0] ss:$8 sps:$4 sm:$0xff]  }
  0x1a   :  { %370 = vmatpush1.bf16.msra.mxu0 %v1416_v13  ;;  %v1502_v13 = vld [vmem:[%s2153_s0 + $0xb0] ss:$8 sps:$4 sm:$0xff]   ;;  %v1508_v17 = vld [vmem:[%s2153_s0 + $0xc0] ss:$8 sps:$4 sm:$0xff]  }
  0x1b   :  { %866 = vmatpush1.bf16.msra.mxu1 %v1417_v14  ;;  %371 = vmatprep.subr.bf16.mxu0 %v1528_v0  ;;  %v1503_v14 = vld [vmem:[%s2154_s2 + $0xb0] ss:$8 sps:$4 sm:$0xff]   ;;  %v1509_v18 = vld [vmem:[%s2154_s2 + $0xc0] ss:$8 sps:$4 sm:$0xff]  }
  0x1c   :  { %867 = vmatprep.subr.bf16.mxu1 %v1528_v0  ;;  %v1527_v30 = vld [vmem:[%s2154_s2 + $0xf0] ss:$8 sps:$4 sm:$0xff]  }
  0x1e   :  { %372 = vmatpush1.bf16.msra.mxu0 %v1418_v15  ;;  %v1504_v15 = vld [vmem:[%s2153_s0 + $0xc4] ss:$8 sps:$4 sm:$0xff]  }
  0x1f   :  { %868 = vmatpush1.bf16.msra.mxu1 %v1419_v16  ;;  %373 = vmatprep.subr.bf16.mxu0 %v1528_v0  ;;  %v1506_v16 = vld [vmem:[%s2154_s2 + $0xc4] ss:$8 sps:$4 sm:$0xff]  }
  0x20   :  { %869 = vmatprep.subr.bf16.mxu1 %v1528_v0 }
  0x22   :  { %374 = vmatpush1.bf16.msra.mxu0 %v1420_v19  ;;  %v1510_v19 = vld [vmem:[%s2153_s0 + $0xd4] ss:$8 sps:$4 sm:$0xff]  }
  0x23   :  { %870 = vmatpush1.bf16.msra.mxu1 %v1421_v20  ;;  %375 = vmatprep.subr.bf16.mxu0 %v1528_v0  ;;  %v1512_v20 = vld [vmem:[%s2154_s2 + $0xd4] ss:$8 sps:$4 sm:$0xff]  }
  0x24   :  { %871 = vmatprep.subr.bf16.mxu1 %v1528_v0 }
  0x26   :  { %376 = vmatpush1.bf16.msra.mxu0 %v1422_v21  ;;  %v1514_v21 = vld [vmem:[%s2153_s0 + $0xd0] ss:$8 sps:$4 sm:$0xff]  }
  0x27   :  { %872 = vmatpush1.bf16.msra.mxu1 %v1423_v22  ;;  %377 = vmatprep.subr.bf16.mxu0 %v1528_v0  ;;  %v1515_v22 = vld [vmem:[%s2154_s2 + $0xd0] ss:$8 sps:$4 sm:$0xff]  }
  0x28   :  { %873 = vmatprep.subr.bf16.mxu1 %v1528_v0 }
  0x2a   :  { %378 = vmatpush1.bf16.msra.mxu0 %v1424_v23  ;;  %v1516_v23 = vld [vmem:[%s2153_s0 + $0xe4] ss:$8 sps:$4 sm:$0xff]  }
  0x2b   :  { %874 = vmatpush1.bf16.msra.mxu1 %v1425_v24  ;;  %379 = vmatprep.subr.bf16.mxu0 %v1528_v0  ;;  %v1518_v24 = vld [vmem:[%s2154_s2 + $0xe4] ss:$8 sps:$4 sm:$0xff]  }
  0x2c   :  { %875 = vmatprep.subr.bf16.mxu1 %v1528_v0 }
  0x2e   :  { %380 = vmatpush1.bf16.msra.mxu0 %v1426_v25  ;;  %v1520_v25 = vld [vmem:[%s2153_s0 + $0xe0] ss:$8 sps:$4 sm:$0xff]  }
  0x2f   :  { %876 = vmatpush1.bf16.msra.mxu1 %v1427_v26  ;;  %381 = vmatprep.subr.bf16.mxu0 %v1528_v0  ;;  %v1521_v26 = vld [vmem:[%s2154_s2 + $0xe0] ss:$8 sps:$4 sm:$0xff]  }
  0x30   :  { %877 = vmatprep.subr.bf16.mxu1 %v1528_v0 }
  0x32   :  { %382 = vmatpush1.bf16.msra.mxu0 %v1428_v27  ;;  %v1522_v27 = vld [vmem:[%s2153_s0 + $0xf4] ss:$8 sps:$4 sm:$0xff]  }
  0x33   :  { %878 = vmatpush1.bf16.msra.mxu1 %v1429_v28  ;;  %383 = vmatprep.subr.bf16.mxu0 %v1528_v0  ;;  %v1524_v28 = vld [vmem:[%s2154_s2 + $0xf4] ss:$8 sps:$4 sm:$0xff]  }
  0x34   :  { %879 = vmatprep.subr.bf16.mxu1 %v1528_v0  ;;  %v1482_v0 = vld [vmem:[%s2154_s2 + $0x84] ss:$8 sps:$4 sm:$0xff]  }
  0x36   :  { %384 = vmatpush1.bf16.msra.mxu0 %v355_v31 }
  0x37   :  { %880 = vmatpush1.bf16.msra.mxu1 %v851_v32 }
  0x39   :  { %390 = vmatmul.mubr.bf16.vlgmr.msra.gmra.mrb[0].mxu0 %v1432_v33 }
  0x3a   :  { %886 = vmatmul.mubr.bf16.vlgmr.msra.gmra.mrb[0].mxu1 %v1435_v34  ;;  %1326 = vmatprep.mubr.msk.bf16.mxu0 %vm304_vm0, %v1438_v35 }
  0x3b   :  { %1388 = vmatprep.mubr.msk.bf16.mxu1 %vm304_vm0, %v1440_v36 }
  0x41   :  { %398 = vmatmul.mubr.bf16.gmra.mrb[4].mxu0 %v1442_v37 }
  0x42   :  { %894 = vmatmul.mubr.bf16.gmra.mrb[4].mxu1 %v1443_v38  ;;  %1327 = vmatprep.mubr.msk.bf16.mxu0 %vm304_vm0, %v1444_v39 }
  0x43   :  { %1389 = vmatprep.mubr.msk.bf16.mxu1 %vm304_vm0, %v1446_v40 }
  0x49   :  { %406 = vmatmul.mubr.bf16.gmra.mrb[8].mxu0 %v1448_v41 }
  0x4a   :  { %902 = vmatmul.mubr.bf16.gmra.mrb[8].mxu1 %v1449_v42  ;;  %1328 = vmatprep.mubr.msk.bf16.mxu0 %vm304_vm0, %v1450_v43 }
  0x4b   :  { %1390 = vmatprep.mubr.msk.bf16.mxu1 %vm304_vm0, %v1452_v44 }
  0x51   :  { %414 = vmatmul.mubr.bf16.gmra.mrb[12].mxu0 %v1454_v45 }
  0x52   :  { %910 = vmatmul.mubr.bf16.gmra.mrb[12].mxu1 %v1455_v46  ;;  %1329 = vmatprep.mubr.msk.bf16.mxu0 %vm304_vm0, %v1456_v47 }
  0x53   :  { %1391 = vmatprep.mubr.msk.bf16.mxu1 %vm304_vm0, %v1458_v48 }
  0x59   :  { %422 = vmatmul.mubr.bf16.gmra.mrb[16].mxu0 %v1460_v49 }
  0x5a   :  { %918 = vmatmul.mubr.bf16.gmra.mrb[16].mxu1 %v1461_v50  ;;  %1330 = vmatprep.mubr.msk.bf16.mxu0 %vm304_vm0, %v1462_v51 }
  0x5b   :  { %1392 = vmatprep.mubr.msk.bf16.mxu1 %vm304_vm0, %v1464_v52 }
  0x61   :  { %430 = vmatmul.mubr.bf16.gmra.mrb[20].mxu0 %v1466_v53 }
  0x62   :  { %926 = vmatmul.mubr.bf16.gmra.mrb[20].mxu1 %v1467_v54  ;;  %1331 = vmatprep.mubr.msk.bf16.mxu0 %vm304_vm0, %v1468_v55 }
  0x63   :  { %1393 = vmatprep.mubr.msk.bf16.mxu1 %vm304_vm0, %v1470_v56 }
  0x69   :  { %438 = vmatmul.mubr.bf16.gmra.mrb[24].mxu0 %v1472_v57 }
  0x6a   :  { %934 = vmatmul.mubr.bf16.gmra.mrb[24].mxu1 %v1473_v58  ;;  %1332 = vmatprep.mubr.msk.bf16.mxu0 %vm304_vm0, %v1474_v59 }
  0x6b   :  { %1394 = vmatprep.mubr.msk.bf16.mxu1 %vm304_vm0, %v1476_v60 }
  0x71   :  { %446 = vmatmul.mubr.bf16.gmra.mrb[28].mxu0 %v1478_v61 }
  0x72   :  { %942 = vmatmul.mubr.bf16.gmra.mrb[28].mxu1 %v1479_v62  ;;  %1333 = vmatprep.mubr.msk.bf16.mxu0 %vm304_vm0, %v1480_v63 }
  0x73   :  { %1395 = vmatprep.mubr.msk.bf16.mxu1 %vm304_vm0, %v1482_v0 }
  0x79   :  { %454 = vmatmul.mubr.bf16.gmra.mrb[32].mxu0 %v1484_v1 }
  0x7a   :  { %950 = vmatmul.mubr.bf16.gmra.mrb[32].mxu1 %v1485_v2  ;;  %1334 = vmatprep.mubr.msk.bf16.mxu0 %vm304_vm0, %v1486_v3 }
  0x7b   :  { %1396 = vmatprep.mubr.msk.bf16.mxu1 %vm304_vm0, %v1488_v4 }
  0x81   :  { %462 = vmatmul.mubr.bf16.gmra.mrb[36].mxu0 %v1490_v5 }
  0x82   :  { %958 = vmatmul.mubr.bf16.gmra.mrb[36].mxu1 %v1491_v6  ;;  %1335 = vmatprep.mubr.msk.bf16.mxu0 %vm304_vm0, %v1492_v7 }
  0x83   :  { %1397 = vmatprep.mubr.msk.bf16.mxu1 %vm304_vm0, %v1494_v8 }
  0x89   :  { %470 = vmatmul.mubr.bf16.gmra.mrb[40].mxu0 %v1496_v9 }
  0x8a   :  { %966 = vmatmul.mubr.bf16.gmra.mrb[40].mxu1 %v1497_v10  ;;  %1336 = vmatprep.mubr.msk.bf16.mxu0 %vm304_vm0, %v1498_v11 }
  0x8b   :  { %1398 = vmatprep.mubr.msk.bf16.mxu1 %vm304_vm0, %v1500_v12 }
  0x91   :  { %478 = vmatmul.mubr.bf16.gmra.mrb[44].mxu0 %v1502_v13 }
  0x92   :  { %974 = vmatmul.mubr.bf16.gmra.mrb[44].mxu1 %v1503_v14  ;;  %1337 = vmatprep.mubr.msk.bf16.mxu0 %vm304_vm0, %v1504_v15 }
  0x93   :  { %1399 = vmatprep.mubr.msk.bf16.mxu1 %vm304_vm0, %v1506_v16 }
  0x99   :  { %486 = vmatmul.mubr.bf16.gmra.mrb[48].mxu0 %v1508_v17 }
  0x9a   :  { %982 = vmatmul.mubr.bf16.gmra.mrb[48].mxu1 %v1509_v18  ;;  %1338 = vmatprep.mubr.msk.bf16.mxu0 %vm304_vm0, %v1510_v19 }
  0x9b   :  { %1400 = vmatprep.mubr.msk.bf16.mxu1 %vm304_vm0, %v1512_v20 }
  0xa1   :  { %494 = vmatmul.mubr.bf16.gmra.mrb[52].mxu0 %v1514_v21 }
  0xa2   :  { %990 = vmatmul.mubr.bf16.gmra.mrb[52].mxu1 %v1515_v22  ;;  %1339 = vmatprep.mubr.msk.bf16.mxu0 %vm304_vm0, %v1516_v23 }
  0xa3   :  { %1401 = vmatprep.mubr.msk.bf16.mxu1 %vm304_vm0, %v1518_v24 }
  0xa9   :  { %502 = vmatmul.mubr.bf16.gmra.mrb[56].mxu0 %v1520_v25 }
  0xaa   :  { %998 = vmatmul.mubr.bf16.gmra.mrb[56].mxu1 %v1521_v26  ;;  %1340 = vmatprep.mubr.msk.bf16.mxu0 %vm304_vm0, %v1522_v27 }
  0xab   :  { %1402 = vmatprep.mubr.msk.bf16.mxu1 %vm304_vm0, %v1524_v28 }
  0xb1   :  { %510 = vmatmul.mubr.bf16.gmra.mrb[60].mxu0 %v1526_v29 }
  0xb2   :  { %1006 = vmatmul.mubr.bf16.gmra.mrb[60].mxu1 %v1527_v30 }
 0x10c   :  { %v391_v31 = vpop.f32.mrb[0].mxu0 }
 0x10d   :  { %vm1014_vm2 = vcmp.ge.f32.partialorder %v391_v31, 0.0  ;;  %v1046_v32 = vmul.f32 0.01, %v391_v31  ;;  %v887_v33 = vpop.f32.mrb[0].mxu1  ;;  %v393_v34 = vpop.f32.mrb[1].mxu0 }
 0x10e   :  { %vm1143_vm4 = vcmp.ge.f32.partialorder %v887_v33, 0.0  ;;  %v1175_v35 = vmul.f32 0.01, %v887_v33  ;;  %v889_v36 = vpop.f32.mrb[1].mxu1  ;;  %v394_v37 = vpop.f32.mrb[2].mxu0 }
 0x10f   :  { %v1078_v38 = vsel %vm1014_vm2, %v391_v31, %v1046_v32  ;;  %vm1015_vm5 = vcmp.ge.f32.partialorder %v394_v37, 0.0  ;;  %v1047_v39 = vmul.f32 0.01, %v394_v37  ;;  %v890_v40 = vpop.f32.mrb[2].mxu1  ;;  %v396_v41 = vpop.f32.mrb[3].mxu0 }
 0x110   :  { %1111 = vst.msk [vmem:[%s2155_s4] sm:$0xff] %vm1110_vm3, %v1078_v38  ;;  %v1207_v42 = vsel %vm1143_vm4, %v887_v33, %v1175_v35  ;;  %vm1144_vm6 = vcmp.ge.f32.partialorder %v890_v40, 0.0  ;;  %v1176_v43 = vmul.f32 0.01, %v890_v40  ;;  %v892_v44 = vpop.f32.mrb[3].mxu1 }
 0x111   :  { %1239 = vst.msk [vmem:[%s2156_s5] sm:$0xff] %vm1110_vm3, %v1207_v42  ;;  %v1079_v45 = vsel %vm1015_vm5, %v394_v37, %v1047_v39 }
 0x112   :  { %1112 = vst.msk [vmem:[%s2155_s4 + $0x8] sm:$0xff] %vm1110_vm3, %v1079_v45  ;;  %v1208_v46 = vsel %vm1144_vm6, %v890_v40, %v1176_v43 }
 0x113   :  { %1240 = vst.msk [vmem:[%s2156_s5 + $0x8] sm:$0xff] %vm1110_vm3, %v1208_v46 }
 0x114   :  { %v399_v47 = vpop.f32.mrb[4].mxu0 }
 0x115   :  { %vm1016_vm7 = vcmp.ge.f32.partialorder %v399_v47, 0.0  ;;  %v1048_v48 = vmul.f32 0.01, %v399_v47  ;;  %v895_v49 = vpop.f32.mrb[4].mxu1  ;;  %v401_v50 = vpop.f32.mrb[5].mxu0 }
 0x116   :  { %vm1145_vm8 = vcmp.ge.f32.partialorder %v895_v49, 0.0  ;;  %v1177_v51 = vmul.f32 0.01, %v895_v49  ;;  %v897_v52 = vpop.f32.mrb[5].mxu1  ;;  %v402_v53 = vpop.f32.mrb[6].mxu0 }
 0x117   :  { %v1080_v54 = vsel %vm1016_vm7, %v399_v47, %v1048_v48  ;;  %vm1017_vm9 = vcmp.ge.f32.partialorder %v402_v53, 0.0  ;;  %v1049_v55 = vmul.f32 0.01, %v402_v53  ;;  %v898_v56 = vpop.f32.mrb[6].mxu1  ;;  %v404_v57 = vpop.f32.mrb[7].mxu0 }
 0x118   :  { %1113 = vst.msk [vmem:[%s2155_s4 + $0x10] sm:$0xff] %vm1110_vm3, %v1080_v54  ;;  %v1209_v58 = vsel %vm1145_vm8, %v895_v49, %v1177_v51  ;;  %vm1146_vm10 = vcmp.ge.f32.partialorder %v898_v56, 0.0  ;;  %v1178_v59 = vmul.f32 0.01, %v898_v56  ;;  %v900_v60 = vpop.f32.mrb[7].mxu1 }
 0x119   :  { %1241 = vst.msk [vmem:[%s2156_s5 + $0x10] sm:$0xff] %vm1110_vm3, %v1209_v58  ;;  %v1081_v61 = vsel %vm1017_vm9, %v402_v53, %v1049_v55 }
 0x11a   :  { %1114 = vst.msk [vmem:[%s2155_s4 + $0x18] sm:$0xff] %vm1110_vm3, %v1081_v61  ;;  %v1210_v62 = vsel %vm1146_vm10, %v898_v56, %v1178_v59 }
 0x11b   :  { %1242 = vst.msk [vmem:[%s2156_s5 + $0x18] sm:$0xff] %vm1110_vm3, %v1210_v62 }
 0x11c   :  { %v407_v63 = vpop.f32.mrb[8].mxu0 }
 0x11d   :  { %vm1018_vm11 = vcmp.ge.f32.partialorder %v407_v63, 0.0  ;;  %v1050_v0 = vmul.f32 0.01, %v407_v63  ;;  %v903_v1 = vpop.f32.mrb[8].mxu1  ;;  %v409_v2 = vpop.f32.mrb[9].mxu0 }
 0x11e   :  { %vm1147_vm12 = vcmp.ge.f32.partialorder %v903_v1, 0.0  ;;  %v1179_v3 = vmul.f32 0.01, %v903_v1  ;;  %v905_v4 = vpop.f32.mrb[9].mxu1  ;;  %v410_v5 = vpop.f32.mrb[10].mxu0 }
 0x11f   :  { %v1082_v6 = vsel %vm1018_vm11, %v407_v63, %v1050_v0  ;;  %vm1019_vm13 = vcmp.ge.f32.partialorder %v410_v5, 0.0  ;;  %v1051_v7 = vmul.f32 0.01, %v410_v5  ;;  %v906_v8 = vpop.f32.mrb[10].mxu1  ;;  %v412_v9 = vpop.f32.mrb[11].mxu0 }
 0x120   :  { %1115 = vst.msk [vmem:[%s2155_s4 + $0x20] sm:$0xff] %vm1110_vm3, %v1082_v6  ;;  %v1211_v10 = vsel %vm1147_vm12, %v903_v1, %v1179_v3  ;;  %vm1148_vm14 = vcmp.ge.f32.partialorder %v906_v8, 0.0  ;;  %v1180_v11 = vmul.f32 0.01, %v906_v8  ;;  %v908_v12 = vpop.f32.mrb[11].mxu1 }
 0x121   :  { %1243 = vst.msk [vmem:[%s2156_s5 + $0x20] sm:$0xff] %vm1110_vm3, %v1211_v10  ;;  %v1083_v13 = vsel %vm1019_vm13, %v410_v5, %v1051_v7 }
 0x122   :  { %1116 = vst.msk [vmem:[%s2155_s4 + $0x28] sm:$0xff] %vm1110_vm3, %v1083_v13  ;;  %v1212_v14 = vsel %vm1148_vm14, %v906_v8, %v1180_v11 }
 0x123   :  { %1244 = vst.msk [vmem:[%s2156_s5 + $0x28] sm:$0xff] %vm1110_vm3, %v1212_v14 }
 0x124   :  { %v415_v15 = vpop.f32.mrb[12].mxu0 }
 0x125   :  { %vm1020_vm15 = vcmp.ge.f32.partialorder %v415_v15, 0.0  ;;  %v1052_v16 = vmul.f32 0.01, %v415_v15  ;;  %v911_v17 = vpop.f32.mrb[12].mxu1  ;;  %v417_v18 = vpop.f32.mrb[13].mxu0 }
 0x126   :  { %vm1149_vm0 = vcmp.ge.f32.partialorder %v911_v17, 0.0  ;;  %v1181_v19 = vmul.f32 0.01, %v911_v17  ;;  %v913_v20 = vpop.f32.mrb[13].mxu1  ;;  %v418_v21 = vpop.f32.mrb[14].mxu0 }
 0x127   :  { %v1084_v22 = vsel %vm1020_vm15, %v415_v15, %v1052_v16  ;;  %vm1021_vm1 = vcmp.ge.f32.partialorder %v418_v21, 0.0  ;;  %v1053_v23 = vmul.f32 0.01, %v418_v21  ;;  %v914_v24 = vpop.f32.mrb[14].mxu1  ;;  %v420_v25 = vpop.f32.mrb[15].mxu0 }
 0x128   :  { %1117 = vst.msk [vmem:[%s2155_s4 + $0x30] sm:$0xff] %vm1110_vm3, %v1084_v22  ;;  %v1213_v26 = vsel %vm1149_vm0, %v911_v17, %v1181_v19  ;;  %vm1150_vm2 = vcmp.ge.f32.partialorder %v914_v24, 0.0  ;;  %v1182_v27 = vmul.f32 0.01, %v914_v24  ;;  %v916_v28 = vpop.f32.mrb[15].mxu1 }
 0x129   :  { %1245 = vst.msk [vmem:[%s2156_s5 + $0x30] sm:$0xff] %vm1110_vm3, %v1213_v26  ;;  %v1085_v29 = vsel %vm1021_vm1, %v418_v21, %v1053_v23 }
 0x12a   :  { %1118 = vst.msk [vmem:[%s2155_s4 + $0x38] sm:$0xff] %vm1110_vm3, %v1085_v29  ;;  %v1214_v30 = vsel %vm1150_vm2, %v914_v24, %v1182_v27 }
 0x12b   :  { %1246 = vst.msk [vmem:[%s2156_s5 + $0x38] sm:$0xff] %vm1110_vm3, %v1214_v30 }
 0x12c   :  { %v423_v31 = vpop.f32.mrb[16].mxu0 }
 0x12d   :  { %vm1022_vm4 = vcmp.ge.f32.partialorder %v423_v31, 0.0  ;;  %v1054_v32 = vmul.f32 0.01, %v423_v31  ;;  %v919_v33 = vpop.f32.mrb[16].mxu1  ;;  %v425_v34 = vpop.f32.mrb[17].mxu0 }
 0x12e   :  { %vm1151_vm5 = vcmp.ge.f32.partialorder %v919_v33, 0.0  ;;  %v1183_v35 = vmul.f32 0.01, %v919_v33  ;;  %v921_v36 = vpop.f32.mrb[17].mxu1  ;;  %v426_v37 = vpop.f32.mrb[18].mxu0 }
 0x12f   :  { %v1086_v38 = vsel %vm1022_vm4, %v423_v31, %v1054_v32  ;;  %vm1023_vm6 = vcmp.ge.f32.partialorder %v426_v37, 0.0  ;;  %v1055_v39 = vmul.f32 0.01, %v426_v37  ;;  %v922_v40 = vpop.f32.mrb[18].mxu1  ;;  %v428_v41 = vpop.f32.mrb[19].mxu0 }
 0x130   :  { %1119 = vst.msk [vmem:[%s2155_s4 + $0x40] sm:$0xff] %vm1110_vm3, %v1086_v38  ;;  %v1215_v42 = vsel %vm1151_vm5, %v919_v33, %v1183_v35  ;;  %vm1152_vm7 = vcmp.ge.f32.partialorder %v922_v40, 0.0  ;;  %v1184_v43 = vmul.f32 0.01, %v922_v40  ;;  %v924_v44 = vpop.f32.mrb[19].mxu1 }
 0x131   :  { %1247 = vst.msk [vmem:[%s2156_s5 + $0x40] sm:$0xff] %vm1110_vm3, %v1215_v42  ;;  %v1087_v45 = vsel %vm1023_vm6, %v426_v37, %v1055_v39 }
 0x132   :  { %1120 = vst.msk [vmem:[%s2155_s4 + $0x48] sm:$0xff] %vm1110_vm3, %v1087_v45  ;;  %v1216_v46 = vsel %vm1152_vm7, %v922_v40, %v1184_v43 }
 0x133   :  { %1248 = vst.msk [vmem:[%s2156_s5 + $0x48] sm:$0xff] %vm1110_vm3, %v1216_v46 }
 0x134   :  { %v431_v47 = vpop.f32.mrb[20].mxu0 }
 0x135   :  { %vm1024_vm8 = vcmp.ge.f32.partialorder %v431_v47, 0.0  ;;  %v1056_v48 = vmul.f32 0.01, %v431_v47  ;;  %v927_v49 = vpop.f32.mrb[20].mxu1  ;;  %v433_v50 = vpop.f32.mrb[21].mxu0 }
 0x136   :  { %vm1153_vm9 = vcmp.ge.f32.partialorder %v927_v49, 0.0  ;;  %v1185_v51 = vmul.f32 0.01, %v927_v49  ;;  %v929_v52 = vpop.f32.mrb[21].mxu1  ;;  %v434_v53 = vpop.f32.mrb[22].mxu0 }
 0x137   :  { %v1088_v54 = vsel %vm1024_vm8, %v431_v47, %v1056_v48  ;;  %vm1025_vm10 = vcmp.ge.f32.partialorder %v434_v53, 0.0  ;;  %v1057_v55 = vmul.f32 0.01, %v434_v53  ;;  %v930_v56 = vpop.f32.mrb[22].mxu1  ;;  %v436_v57 = vpop.f32.mrb[23].mxu0 }
 0x138   :  { %1121 = vst.msk [vmem:[%s2155_s4 + $0x50] sm:$0xff] %vm1110_vm3, %v1088_v54  ;;  %v1217_v58 = vsel %vm1153_vm9, %v927_v49, %v1185_v51  ;;  %vm1154_vm11 = vcmp.ge.f32.partialorder %v930_v56, 0.0  ;;  %v1186_v59 = vmul.f32 0.01, %v930_v56  ;;  %v932_v60 = vpop.f32.mrb[23].mxu1 }
 0x139   :  { %1249 = vst.msk [vmem:[%s2156_s5 + $0x50] sm:$0xff] %vm1110_vm3, %v1217_v58  ;;  %v1089_v61 = vsel %vm1025_vm10, %v434_v53, %v1057_v55 }
 0x13a   :  { %1122 = vst.msk [vmem:[%s2155_s4 + $0x58] sm:$0xff] %vm1110_vm3, %v1089_v61  ;;  %v1218_v62 = vsel %vm1154_vm11, %v930_v56, %v1186_v59 }
 0x13b   :  { %1250 = vst.msk [vmem:[%s2156_s5 + $0x58] sm:$0xff] %vm1110_vm3, %v1218_v62 }
 0x13c   :  { %v439_v63 = vpop.f32.mrb[24].mxu0 }
 0x13d   :  { %vm1026_vm12 = vcmp.ge.f32.partialorder %v439_v63, 0.0  ;;  %v1058_v0 = vmul.f32 0.01, %v439_v63  ;;  %v935_v1 = vpop.f32.mrb[24].mxu1  ;;  %v441_v2 = vpop.f32.mrb[25].mxu0 }
 0x13e   :  { %vm1155_vm13 = vcmp.ge.f32.partialorder %v935_v1, 0.0  ;;  %v1187_v3 = vmul.f32 0.01, %v935_v1  ;;  %v937_v4 = vpop.f32.mrb[25].mxu1  ;;  %v442_v5 = vpop.f32.mrb[26].mxu0 }
 0x13f   :  { %v1090_v6 = vsel %vm1026_vm12, %v439_v63, %v1058_v0  ;;  %vm1027_vm14 = vcmp.ge.f32.partialorder %v442_v5, 0.0  ;;  %v1059_v7 = vmul.f32 0.01, %v442_v5  ;;  %v938_v8 = vpop.f32.mrb[26].mxu1  ;;  %v444_v9 = vpop.f32.mrb[27].mxu0 }
 0x140   :  { %1123 = vst.msk [vmem:[%s2155_s4 + $0x60] sm:$0xff] %vm1110_vm3, %v1090_v6  ;;  %v1219_v10 = vsel %vm1155_vm13, %v935_v1, %v1187_v3  ;;  %vm1156_vm15 = vcmp.ge.f32.partialorder %v938_v8, 0.0  ;;  %v1188_v11 = vmul.f32 0.01, %v938_v8  ;;  %v940_v12 = vpop.f32.mrb[27].mxu1 }
 0x141   :  { %1251 = vst.msk [vmem:[%s2156_s5 + $0x60] sm:$0xff] %vm1110_vm3, %v1219_v10  ;;  %v1091_v13 = vsel %vm1027_vm14, %v442_v5, %v1059_v7 }
 0x142   :  { %1124 = vst.msk [vmem:[%s2155_s4 + $0x68] sm:$0xff] %vm1110_vm3, %v1091_v13  ;;  %v1220_v14 = vsel %vm1156_vm15, %v938_v8, %v1188_v11 }
 0x143   :  { %1252 = vst.msk [vmem:[%s2156_s5 + $0x68] sm:$0xff] %vm1110_vm3, %v1220_v14 }
 0x144   :  { %v447_v15 = vpop.f32.mrb[28].mxu0 }
 0x145   :  { %vm1028_vm0 = vcmp.ge.f32.partialorder %v447_v15, 0.0  ;;  %v1060_v16 = vmul.f32 0.01, %v447_v15  ;;  %v943_v17 = vpop.f32.mrb[28].mxu1  ;;  %v449_v18 = vpop.f32.mrb[29].mxu0 }
 0x146   :  { %vm1157_vm1 = vcmp.ge.f32.partialorder %v943_v17, 0.0  ;;  %v1189_v19 = vmul.f32 0.01, %v943_v17  ;;  %v945_v20 = vpop.f32.mrb[29].mxu1  ;;  %v450_v21 = vpop.f32.mrb[30].mxu0 }
 0x147   :  { %v1092_v22 = vsel %vm1028_vm0, %v447_v15, %v1060_v16  ;;  %vm1029_vm2 = vcmp.ge.f32.partialorder %v450_v21, 0.0  ;;  %v1061_v23 = vmul.f32 0.01, %v450_v21  ;;  %v946_v24 = vpop.f32.mrb[30].mxu1  ;;  %v452_v25 = vpop.f32.mrb[31].mxu0 }
 0x148   :  { %1125 = vst.msk [vmem:[%s2155_s4 + $0x70] sm:$0xff] %vm1110_vm3, %v1092_v22  ;;  %v1221_v26 = vsel %vm1157_vm1, %v943_v17, %v1189_v19  ;;  %vm1158_vm4 = vcmp.ge.f32.partialorder %v946_v24, 0.0  ;;  %v1190_v27 = vmul.f32 0.01, %v946_v24  ;;  %v948_v28 = vpop.f32.mrb[31].mxu1 }
 0x149   :  { %1253 = vst.msk [vmem:[%s2156_s5 + $0x70] sm:$0xff] %vm1110_vm3, %v1221_v26  ;;  %v1093_v29 = vsel %vm1029_vm2, %v450_v21, %v1061_v23 }
 0x14a   :  { %1126 = vst.msk [vmem:[%s2155_s4 + $0x78] sm:$0xff] %vm1110_vm3, %v1093_v29  ;;  %v1222_v30 = vsel %vm1158_vm4, %v946_v24, %v1190_v27 }
 0x14b   :  { %1254 = vst.msk [vmem:[%s2156_s5 + $0x78] sm:$0xff] %vm1110_vm3, %v1222_v30 }
 0x14c   :  { %v455_v31 = vpop.f32.mrb[32].mxu0 }
 0x14d   :  { %vm1030_vm5 = vcmp.ge.f32.partialorder %v455_v31, 0.0  ;;  %v1062_v32 = vmul.f32 0.01, %v455_v31  ;;  %v951_v33 = vpop.f32.mrb[32].mxu1  ;;  %v457_v34 = vpop.f32.mrb[33].mxu0 }
 0x14e   :  { %vm1159_vm6 = vcmp.ge.f32.partialorder %v951_v33, 0.0  ;;  %v1191_v35 = vmul.f32 0.01, %v951_v33  ;;  %v953_v36 = vpop.f32.mrb[33].mxu1  ;;  %v458_v37 = vpop.f32.mrb[34].mxu0 }
 0x14f   :  { %v1094_v38 = vsel %vm1030_vm5, %v455_v31, %v1062_v32  ;;  %vm1031_vm7 = vcmp.ge.f32.partialorder %v458_v37, 0.0  ;;  %v1063_v39 = vmul.f32 0.01, %v458_v37  ;;  %v954_v40 = vpop.f32.mrb[34].mxu1  ;;  %v460_v41 = vpop.f32.mrb[35].mxu0 }
 0x150   :  { %1127 = vst.msk [vmem:[%s2155_s4 + $0x80] sm:$0xff] %vm1110_vm3, %v1094_v38  ;;  %v1223_v42 = vsel %vm1159_vm6, %v951_v33, %v1191_v35  ;;  %vm1160_vm8 = vcmp.ge.f32.partialorder %v954_v40, 0.0  ;;  %v1192_v43 = vmul.f32 0.01, %v954_v40  ;;  %v956_v44 = vpop.f32.mrb[35].mxu1 }
 0x151   :  { %1255 = vst.msk [vmem:[%s2156_s5 + $0x80] sm:$0xff] %vm1110_vm3, %v1223_v42  ;;  %v1095_v45 = vsel %vm1031_vm7, %v458_v37, %v1063_v39 }
 0x152   :  { %1128 = vst.msk [vmem:[%s2155_s4 + $0x88] sm:$0xff] %vm1110_vm3, %v1095_v45  ;;  %v1224_v46 = vsel %vm1160_vm8, %v954_v40, %v1192_v43 }
 0x153   :  { %1256 = vst.msk [vmem:[%s2156_s5 + $0x88] sm:$0xff] %vm1110_vm3, %v1224_v46 }
 0x154   :  { %v463_v47 = vpop.f32.mrb[36].mxu0 }
 0x155   :  { %vm1032_vm9 = vcmp.ge.f32.partialorder %v463_v47, 0.0  ;;  %v1064_v48 = vmul.f32 0.01, %v463_v47  ;;  %v959_v49 = vpop.f32.mrb[36].mxu1  ;;  %v465_v50 = vpop.f32.mrb[37].mxu0 }
 0x156   :  { %vm1161_vm10 = vcmp.ge.f32.partialorder %v959_v49, 0.0  ;;  %v1193_v51 = vmul.f32 0.01, %v959_v49  ;;  %v961_v52 = vpop.f32.mrb[37].mxu1  ;;  %v466_v53 = vpop.f32.mrb[38].mxu0 }
 0x157   :  { %v1096_v54 = vsel %vm1032_vm9, %v463_v47, %v1064_v48  ;;  %vm1033_vm11 = vcmp.ge.f32.partialorder %v466_v53, 0.0  ;;  %v1065_v55 = vmul.f32 0.01, %v466_v53  ;;  %v962_v56 = vpop.f32.mrb[38].mxu1  ;;  %v468_v57 = vpop.f32.mrb[39].mxu0 }
 0x158   :  { %1129 = vst.msk [vmem:[%s2155_s4 + $0x90] sm:$0xff] %vm1110_vm3, %v1096_v54  ;;  %v1225_v58 = vsel %vm1161_vm10, %v959_v49, %v1193_v51  ;;  %vm1162_vm12 = vcmp.ge.f32.partialorder %v962_v56, 0.0  ;;  %v1194_v59 = vmul.f32 0.01, %v962_v56  ;;  %v964_v60 = vpop.f32.mrb[39].mxu1 }
 0x159   :  { %1257 = vst.msk [vmem:[%s2156_s5 + $0x90] sm:$0xff] %vm1110_vm3, %v1225_v58  ;;  %v1097_v61 = vsel %vm1033_vm11, %v466_v53, %v1065_v55 }
 0x15a   :  { %1130 = vst.msk [vmem:[%s2155_s4 + $0x98] sm:$0xff] %vm1110_vm3, %v1097_v61  ;;  %v1226_v62 = vsel %vm1162_vm12, %v962_v56, %v1194_v59 }
 0x15b   :  { %1258 = vst.msk [vmem:[%s2156_s5 + $0x98] sm:$0xff] %vm1110_vm3, %v1226_v62 }
 0x15c   :  { %v471_v63 = vpop.f32.mrb[40].mxu0 }
 0x15d   :  { %vm1034_vm13 = vcmp.ge.f32.partialorder %v471_v63, 0.0  ;;  %v1066_v0 = vmul.f32 0.01, %v471_v63  ;;  %v967_v1 = vpop.f32.mrb[40].mxu1  ;;  %v473_v2 = vpop.f32.mrb[41].mxu0 }
 0x15e   :  { %vm1163_vm14 = vcmp.ge.f32.partialorder %v967_v1, 0.0  ;;  %v1195_v3 = vmul.f32 0.01, %v967_v1  ;;  %v969_v4 = vpop.f32.mrb[41].mxu1  ;;  %v474_v5 = vpop.f32.mrb[42].mxu0 }
 0x15f   :  { %v1098_v6 = vsel %vm1034_vm13, %v471_v63, %v1066_v0  ;;  %vm1035_vm15 = vcmp.ge.f32.partialorder %v474_v5, 0.0  ;;  %v1067_v7 = vmul.f32 0.01, %v474_v5  ;;  %v970_v8 = vpop.f32.mrb[42].mxu1  ;;  %v476_v9 = vpop.f32.mrb[43].mxu0 }
 0x160   :  { %1131 = vst.msk [vmem:[%s2155_s4 + $0xa0] sm:$0xff] %vm1110_vm3, %v1098_v6  ;;  %v1227_v10 = vsel %vm1163_vm14, %v967_v1, %v1195_v3  ;;  %vm1164_vm0 = vcmp.ge.f32.partialorder %v970_v8, 0.0  ;;  %v1196_v11 = vmul.f32 0.01, %v970_v8  ;;  %v972_v12 = vpop.f32.mrb[43].mxu1 }
 0x161   :  { %1259 = vst.msk [vmem:[%s2156_s5 + $0xa0] sm:$0xff] %vm1110_vm3, %v1227_v10  ;;  %v1099_v13 = vsel %vm1035_vm15, %v474_v5, %v1067_v7 }
 0x162   :  { %1132 = vst.msk [vmem:[%s2155_s4 + $0xa8] sm:$0xff] %vm1110_vm3, %v1099_v13  ;;  %v1228_v14 = vsel %vm1164_vm0, %v970_v8, %v1196_v11 }
 0x163   :  { %1260 = vst.msk [vmem:[%s2156_s5 + $0xa8] sm:$0xff] %vm1110_vm3, %v1228_v14 }
 0x164   :  { %v479_v15 = vpop.f32.mrb[44].mxu0 }
 0x165   :  { %vm1036_vm1 = vcmp.ge.f32.partialorder %v479_v15, 0.0  ;;  %v1068_v16 = vmul.f32 0.01, %v479_v15  ;;  %v975_v17 = vpop.f32.mrb[44].mxu1  ;;  %v481_v18 = vpop.f32.mrb[45].mxu0 }
 0x166   :  { %vm1165_vm2 = vcmp.ge.f32.partialorder %v975_v17, 0.0  ;;  %v1197_v19 = vmul.f32 0.01, %v975_v17  ;;  %v977_v20 = vpop.f32.mrb[45].mxu1  ;;  %v482_v21 = vpop.f32.mrb[46].mxu0 }
 0x167   :  { %v1100_v22 = vsel %vm1036_vm1, %v479_v15, %v1068_v16  ;;  %vm1037_vm4 = vcmp.ge.f32.partialorder %v482_v21, 0.0  ;;  %v1069_v23 = vmul.f32 0.01, %v482_v21  ;;  %v978_v24 = vpop.f32.mrb[46].mxu1  ;;  %v484_v25 = vpop.f32.mrb[47].mxu0 }
 0x168   :  { %1133 = vst.msk [vmem:[%s2155_s4 + $0xb0] sm:$0xff] %vm1110_vm3, %v1100_v22  ;;  %v1229_v26 = vsel %vm1165_vm2, %v975_v17, %v1197_v19  ;;  %vm1166_vm5 = vcmp.ge.f32.partialorder %v978_v24, 0.0  ;;  %v1198_v27 = vmul.f32 0.01, %v978_v24  ;;  %v980_v28 = vpop.f32.mrb[47].mxu1 }
 0x169   :  { %1261 = vst.msk [vmem:[%s2156_s5 + $0xb0] sm:$0xff] %vm1110_vm3, %v1229_v26  ;;  %v1101_v29 = vsel %vm1037_vm4, %v482_v21, %v1069_v23 }
 0x16a   :  { %1134 = vst.msk [vmem:[%s2155_s4 + $0xb8] sm:$0xff] %vm1110_vm3, %v1101_v29  ;;  %v1230_v30 = vsel %vm1166_vm5, %v978_v24, %v1198_v27 }
 0x16b   :  { %1262 = vst.msk [vmem:[%s2156_s5 + $0xb8] sm:$0xff] %vm1110_vm3, %v1230_v30 }
 0x16c   :  { %v487_v31 = vpop.f32.mrb[48].mxu0 }
 0x16d   :  { %vm1038_vm6 = vcmp.ge.f32.partialorder %v487_v31, 0.0  ;;  %v1070_v32 = vmul.f32 0.01, %v487_v31  ;;  %v983_v33 = vpop.f32.mrb[48].mxu1  ;;  %v489_v34 = vpop.f32.mrb[49].mxu0 }
 0x16e   :  { %vm1167_vm7 = vcmp.ge.f32.partialorder %v983_v33, 0.0  ;;  %v1199_v35 = vmul.f32 0.01, %v983_v33  ;;  %v985_v36 = vpop.f32.mrb[49].mxu1  ;;  %v490_v37 = vpop.f32.mrb[50].mxu0 }
 0x16f   :  { %v1102_v38 = vsel %vm1038_vm6, %v487_v31, %v1070_v32  ;;  %vm1039_vm8 = vcmp.ge.f32.partialorder %v490_v37, 0.0  ;;  %v1071_v39 = vmul.f32 0.01, %v490_v37  ;;  %v986_v40 = vpop.f32.mrb[50].mxu1  ;;  %v492_v41 = vpop.f32.mrb[51].mxu0 }
 0x170   :  { %1135 = vst.msk [vmem:[%s2155_s4 + $0xc0] sm:$0xff] %vm1110_vm3, %v1102_v38  ;;  %v1231_v42 = vsel %vm1167_vm7, %v983_v33, %v1199_v35  ;;  %vm1168_vm9 = vcmp.ge.f32.partialorder %v986_v40, 0.0  ;;  %v1200_v43 = vmul.f32 0.01, %v986_v40  ;;  %v988_v44 = vpop.f32.mrb[51].mxu1 }
 0x171   :  { %1263 = vst.msk [vmem:[%s2156_s5 + $0xc0] sm:$0xff] %vm1110_vm3, %v1231_v42  ;;  %v1103_v45 = vsel %vm1039_vm8, %v490_v37, %v1071_v39 }
 0x172   :  { %1136 = vst.msk [vmem:[%s2155_s4 + $0xc8] sm:$0xff] %vm1110_vm3, %v1103_v45  ;;  %v1232_v46 = vsel %vm1168_vm9, %v986_v40, %v1200_v43 }
 0x173   :  { %1264 = vst.msk [vmem:[%s2156_s5 + $0xc8] sm:$0xff] %vm1110_vm3, %v1232_v46 }
 0x174   :  { %v495_v47 = vpop.f32.mrb[52].mxu0 }
 0x175   :  { %vm1040_vm10 = vcmp.ge.f32.partialorder %v495_v47, 0.0  ;;  %v1072_v48 = vmul.f32 0.01, %v495_v47  ;;  %v991_v49 = vpop.f32.mrb[52].mxu1  ;;  %v497_v50 = vpop.f32.mrb[53].mxu0 }
 0x176   :  { %vm1169_vm11 = vcmp.ge.f32.partialorder %v991_v49, 0.0  ;;  %v1201_v51 = vmul.f32 0.01, %v991_v49  ;;  %v993_v52 = vpop.f32.mrb[53].mxu1  ;;  %v498_v53 = vpop.f32.mrb[54].mxu0 }
 0x177   :  { %v1104_v54 = vsel %vm1040_vm10, %v495_v47, %v1072_v48  ;;  %vm1041_vm12 = vcmp.ge.f32.partialorder %v498_v53, 0.0  ;;  %v1073_v55 = vmul.f32 0.01, %v498_v53  ;;  %v994_v56 = vpop.f32.mrb[54].mxu1  ;;  %v500_v57 = vpop.f32.mrb[55].mxu0 }
 0x178   :  { %1137 = vst.msk [vmem:[%s2155_s4 + $0xd0] sm:$0xff] %vm1110_vm3, %v1104_v54  ;;  %v1233_v58 = vsel %vm1169_vm11, %v991_v49, %v1201_v51  ;;  %vm1170_vm13 = vcmp.ge.f32.partialorder %v994_v56, 0.0  ;;  %v1202_v59 = vmul.f32 0.01, %v994_v56  ;;  %v996_v60 = vpop.f32.mrb[55].mxu1 }
 0x179   :  { %1265 = vst.msk [vmem:[%s2156_s5 + $0xd0] sm:$0xff] %vm1110_vm3, %v1233_v58  ;;  %v1105_v61 = vsel %vm1041_vm12, %v498_v53, %v1073_v55 }
 0x17a   :  { %1138 = vst.msk [vmem:[%s2155_s4 + $0xd8] sm:$0xff] %vm1110_vm3, %v1105_v61  ;;  %v1234_v62 = vsel %vm1170_vm13, %v994_v56, %v1202_v59 }
 0x17b   :  { %1266 = vst.msk [vmem:[%s2156_s5 + $0xd8] sm:$0xff] %vm1110_vm3, %v1234_v62 }
 0x17c   :  { %v503_v63 = vpop.f32.mrb[56].mxu0 }
 0x17d   :  { %vm1042_vm14 = vcmp.ge.f32.partialorder %v503_v63, 0.0  ;;  %v1074_v0 = vmul.f32 0.01, %v503_v63  ;;  %v999_v1 = vpop.f32.mrb[56].mxu1  ;;  %v505_v2 = vpop.f32.mrb[57].mxu0 }
 0x17e   :  { %vm1171_vm15 = vcmp.ge.f32.partialorder %v999_v1, 0.0  ;;  %v1203_v3 = vmul.f32 0.01, %v999_v1  ;;  %v1001_v4 = vpop.f32.mrb[57].mxu1  ;;  %v506_v5 = vpop.f32.mrb[58].mxu0 }
 0x17f   :  { %v1106_v6 = vsel %vm1042_vm14, %v503_v63, %v1074_v0  ;;  %vm1043_vm0 = vcmp.ge.f32.partialorder %v506_v5, 0.0  ;;  %v1075_v7 = vmul.f32 0.01, %v506_v5  ;;  %v1002_v8 = vpop.f32.mrb[58].mxu1  ;;  %v508_v9 = vpop.f32.mrb[59].mxu0 }
 0x180   :  { %1139 = vst.msk [vmem:[%s2155_s4 + $0xe0] sm:$0xff] %vm1110_vm3, %v1106_v6  ;;  %v1235_v10 = vsel %vm1171_vm15, %v999_v1, %v1203_v3  ;;  %vm1172_vm1 = vcmp.ge.f32.partialorder %v1002_v8, 0.0  ;;  %v1204_v11 = vmul.f32 0.01, %v1002_v8  ;;  %v1004_v12 = vpop.f32.mrb[59].mxu1 }
 0x181   :  { %1267 = vst.msk [vmem:[%s2156_s5 + $0xe0] sm:$0xff] %vm1110_vm3, %v1235_v10  ;;  %v1107_v13 = vsel %vm1043_vm0, %v506_v5, %v1075_v7 }
 0x182   :  { %1140 = vst.msk [vmem:[%s2155_s4 + $0xe8] sm:$0xff] %vm1110_vm3, %v1107_v13  ;;  %v1236_v14 = vsel %vm1172_vm1, %v1002_v8, %v1204_v11 }
 0x183   :  { %1268 = vst.msk [vmem:[%s2156_s5 + $0xe8] sm:$0xff] %vm1110_vm3, %v1236_v14 }
 0x184   :  { %v511_v15 = vpop.f32.mrb[60].mxu0 }
 0x185   :  { %vm1044_vm2 = vcmp.ge.f32.partialorder %v511_v15, 0.0  ;;  %v1076_v16 = vmul.f32 0.01, %v511_v15  ;;  %v1007_v17 = vpop.f32.mrb[60].mxu1  ;;  %v513_v18 = vpop.f32.mrb[61].mxu0 }
 0x186   :  { %vm1173_vm4 = vcmp.ge.f32.partialorder %v1007_v17, 0.0  ;;  %v1205_v19 = vmul.f32 0.01, %v1007_v17  ;;  %v1009_v20 = vpop.f32.mrb[61].mxu1  ;;  %v514_v21 = vpop.f32.mrb[62].mxu0 }
 0x187   :  { %v1108_v22 = vsel %vm1044_vm2, %v511_v15, %v1076_v16  ;;  %vm1045_vm5 = vcmp.ge.f32.partialorder %v514_v21, 0.0  ;;  %v1077_v23 = vmul.f32 0.01, %v514_v21  ;;  %v1010_v24 = vpop.f32.mrb[62].mxu1  ;;  %v516_v25 = vpop.f32.mrb[63].mxu0 }
 0x188   :  { %1141 = vst.msk [vmem:[%s2155_s4 + $0xf0] sm:$0xff] %vm1110_vm3, %v1108_v22  ;;  %v1237_v26 = vsel %vm1173_vm4, %v1007_v17, %v1205_v19  ;;  %vm1174_vm6 = vcmp.ge.f32.partialorder %v1010_v24, 0.0  ;;  %v1206_v27 = vmul.f32 0.01, %v1010_v24  ;;  %v1012_v28 = vpop.f32.mrb[63].mxu1 }
 0x189   :  { %1269 = vst.msk [vmem:[%s2156_s5 + $0xf0] sm:$0xff] %vm1110_vm3, %v1237_v26  ;;  %v1109_v29 = vsel %vm1045_vm5, %v514_v21, %v1077_v23 }
 0x18a   :  { %1142 = vst.msk [vmem:[%s2155_s4 + $0xf8] sm:$0xff] %vm1110_vm3, %v1109_v29  ;;  %v1238_v30 = vsel %vm1174_vm6, %v1010_v24, %v1206_v27 }
 0x18b   :  { %1270 = vst.msk [vmem:[%s2156_s5 + $0xf8] sm:$0xff] %vm1110_vm3, %v1238_v30 }

// kernel: glnet_forward.13
= control target key start
LH: loop header
LB: loop body
LE: loop exit
PB: predicated region body
PF: predicated region fallthrough
CT: control target
= control target key end

     0   :  { %v20_v0 = vlaneseq  ;;  %v341_v4 = vmov 1983009808   ;;  %v342_v6 = vmov 1966171168   ;;  %vm100_vm0 = vcmask 1041408   ;;  %s442_s0 = inlined_call_operand.vmem [shape: f32[2,2,1024], index: 0, kind: input, shape index: {}]   ;;  %s443_s1 = inlined_call_operand.vmem [shape: f32[2,1,1024], index: 1, kind: output, shape index: {}]  }
   0x1   :  { %v8_v1 = vld [vmem:[%s442_s0] sm:$0xff]  ;;  %v9_v2 = vld [vmem:[%s442_s0 + $0x8] sm:$0xff]  ;;  %v10_v3 = vld [vmem:[%s442_s0 + $0x10] sm:$0xff]  ;;  %v18_v5 = vunpack.c.l.s4 %v341_v4  ;;  %v234_v7 = vunpack.c.l.s4 %v342_v6 }
   0x2   :  { %v11_v8 = vld [vmem:[%s442_s0 + $0x18] sm:$0xff]  ;;  %v21_v9 = vshrl.u32 %v20_v0, 7  ;;  %v16_v10 = vcombine.high %v8_v1, %v8_v1  ;;  %v33_v12 = vcombine.high %v9_v2, %v9_v2  ;;  %v50_v14 = vcombine.high %v10_v3, %v10_v3 }
   0x3   :  { %v19_v11 = vunpack.c.0.s8 %v18_v5  ;;  %v235_v13 = vunpack.c.0.s8 %v234_v7  ;;  %v67_v15 = vcombine.high %v11_v8, %v11_v8 }
   0x5   :  { %v22_v16 = vsub.s32 %v19_v11, %v21_v9  ;;  %v365_v17 = vsub.s32 %v235_v13, %v21_v9 }
   0x7   :  { %v23_v18 = vrot.slane %v8_v1, %v22_v16  ;;  %v30_v19 = vrot.slane %v16_v10, %v22_v16  ;;  %v40_v20 = vrot.slane %v9_v2, %v22_v16  ;;  %v47_v21 = vrot.slane %v33_v12, %v22_v16 }
   0x8   :  { %v367_v22 = vrot.slane %v10_v3, %v22_v16  ;;  %v369_v23 = vrot.slane %v50_v14, %v22_v16  ;;  %v371_v24 = vrot.slane %v11_v8, %v22_v16  ;;  %v373_v25 = vrot.slane %v67_v15, %v22_v16 }
   0x9   :  { %v31_v26 = vcombine.high %v23_v18, %v23_v18  ;;  %v32_v27 = vcombine.high %v30_v19, %v30_v19  ;;  %v48_v28 = vcombine.high %v40_v20, %v40_v20  ;;  %v49_v29 = vcombine.high %v47_v21, %v47_v21 }
   0xa   :  { %v65_v30 = vcombine.high %v367_v22, %v367_v22  ;;  %v66_v31 = vcombine.high %v369_v23, %v369_v23  ;;  %v82_v32 = vcombine.high %v371_v24, %v371_v24  ;;  %v83_v33 = vcombine.high %v373_v25, %v373_v25 }
   0xb   :  { %v101_v34 = vsel %vm100_vm0, %v23_v18, -inf  ;;  %v108_v35 = vsel %vm100_vm0, %v31_v26, -inf  ;;  %v115_v36 = vsel %vm100_vm0, %v30_v19, -inf  ;;  %v122_v37 = vsel %vm100_vm0, %v32_v27, -inf }
   0xc   :  { %v102_v38 = vrot.slane %v101_v34, 4  ;;  %v109_v39 = vrot.slane %v108_v35, 4  ;;  %v116_v40 = vrot.slane %v115_v36, 4  ;;  %v123_v41 = vrot.slane %v122_v37, 4 }
   0xd   :  { %v129_v42 = vsel %vm100_vm0, %v40_v20, -inf  ;;  %v136_v43 = vsel %vm100_vm0, %v48_v28, -inf  ;;  %v143_v44 = vsel %vm100_vm0, %v47_v21, -inf  ;;  %v150_v45 = vsel %vm100_vm0, %v49_v29, -inf }
   0xe   :  { %v103_v46 = vmax.f32 %v101_v34, %v102_v38  ;;  %v110_v47 = vmax.f32 %v108_v35, %v109_v39  ;;  %v117_v48 = vmax.f32 %v115_v36, %v116_v40  ;;  %v124_v49 = vmax.f32 %v122_v37, %v123_v41 }
   0xf   :  { %v130_v50 = vrot.slane %v129_v42, 4  ;;  %v137_v51 = vrot.slane %v136_v43, 4  ;;  %v144_v52 = vrot.slane %v143_v44, 4  ;;  %v151_v53 = vrot.slane %v150_v45, 4 }
  0x10   :  { %v104_v54 = vrot.slane %v103_v46, 2  ;;  %v111_v55 = vrot.slane %v110_v47, 2  ;;  %v118_v56 = vrot.slane %v117_v48, 2  ;;  %v125_v57 = vrot.slane %v124_v49, 2 }
  0x11   :  { %v131_v58 = vmax.f32 %v129_v42, %v130_v50  ;;  %v138_v59 = vmax.f32 %v136_v43, %v137_v51  ;;  %v145_v60 = vmax.f32 %v143_v44, %v144_v52  ;;  %v152_v61 = vmax.f32 %v150_v45, %v151_v53 }
  0x12   :  { %v105_v62 = vmax.f32 %v103_v46, %v104_v54  ;;  %v112_v63 = vmax.f32 %v110_v47, %v111_v55  ;;  %v119_v0 = vmax.f32 %v117_v48, %v118_v56  ;;  %v126_v1 = vmax.f32 %v124_v49, %v125_v57 }
  0x13   :  { %v132_v2 = vrot.slane %v131_v58, 2  ;;  %v139_v3 = vrot.slane %v138_v59, 2  ;;  %v146_v4 = vrot.slane %v145_v60, 2  ;;  %v153_v5 = vrot.slane %v152_v61, 2 }
  0x14   :  { %v106_v6 = vrot.slane %v105_v62, 1  ;;  %v113_v7 = vrot.slane %v112_v63, 1  ;;  %v120_v8 = vrot.slane %v119_v0, 1  ;;  %v127_v9 = vrot.slane %v126_v1, 1 }
  0x15   :  { %v133_v10 = vmax.f32 %v131_v58, %v132_v2  ;;  %v140_v11 = vmax.f32 %v138_v59, %v139_v3  ;;  %v147_v12 = vmax.f32 %v145_v60, %v146_v4  ;;  %v154_v13 = vmax.f32 %v152_v61, %v153_v5 }
  0x16   :  { %v391_v14 = vmax.f32 %v105_v62, %v106_v6  ;;  %v393_v15 = vmax.f32 %v112_v63, %v113_v7  ;;  %v395_v16 = vmax.f32 %v119_v0, %v120_v8  ;;  %v397_v18 = vmax.f32 %v126_v1, %v127_v9 }
  0x17   :  { %v134_v19 = vrot.slane %v133_v10, 1  ;;  %v141_v20 = vrot.slane %v140_v11, 1  ;;  %v148_v21 = vrot.slane %v147_v12, 1  ;;  %v155_v26 = vrot.slane %v154_v13, 1 }
  0x18   :  { %v157_v27 = vsel %vm100_vm0, %v367_v22, -inf  ;;  %v164_v28 = vsel %vm100_vm0, %v65_v30, -inf  ;;  %v171_v29 = vsel %vm100_vm0, %v369_v23, -inf  ;;  %v178_v34 = vsel %vm100_vm0, %v66_v31, -inf }
  0x19   :  { %v405_v35 = vmax.f32 %v133_v10, %v134_v19  ;;  %v142_v36 = vmax.f32 %v140_v11, %v141_v20  ;;  %v149_v37 = vmax.f32 %v147_v12, %v148_v21  ;;  %v156_v38 = vmax.f32 %v154_v13, %v155_v26 }
  0x1a   :  { %v158_v39 = vrot.slane %v157_v27, 4  ;;  %v165_v40 = vrot.slane %v164_v28, 4  ;;  %v172_v41 = vrot.slane %v171_v29, 4  ;;  %v179_v42 = vrot.slane %v178_v34, 4 }
  0x1b   :  { %v185_v43 = vsel %vm100_vm0, %v371_v24, -inf  ;;  %v192_v22 = vsel %vm100_vm0, %v82_v32, -inf  ;;  %v199_v23 = vsel %vm100_vm0, %v373_v25, -inf  ;;  %v206_v30 = vsel %vm100_vm0, %v83_v33, -inf }
  0x1c   :  { %v159_v31 = vmax.f32 %v157_v27, %v158_v39  ;;  %v166_v44 = vmax.f32 %v164_v28, %v165_v40  ;;  %v173_v45 = vmax.f32 %v171_v29, %v172_v41  ;;  %v180_v46 = vmax.f32 %v178_v34, %v179_v42 }
  0x1d   :  { %v186_v47 = vrot.slane %v185_v43, 4  ;;  %v193_v48 = vrot.slane %v192_v22, 4  ;;  %v200_v49 = vrot.slane %v199_v23, 4  ;;  %v207_v50 = vrot.slane %v206_v30, 4 }
  0x1e   :  { %v160_v51 = vrot.slane %v159_v31, 2  ;;  %v167_v24 = vrot.slane %v166_v44, 2  ;;  %v174_v52 = vrot.slane %v173_v45, 2  ;;  %v181_v32 = vrot.slane %v180_v46, 2 }
  0x1f   :  { %v187_v53 = vmax.f32 %v185_v43, %v186_v47  ;;  %v194_v54 = vmax.f32 %v192_v22, %v193_v48  ;;  %v201_v55 = vmax.f32 %v199_v23, %v200_v49  ;;  %v208_v56 = vmax.f32 %v206_v30, %v207_v50 }
  0x20   :  { %v161_v57 = vmax.f32 %v159_v31, %v160_v51  ;;  %v168_v25 = vmax.f32 %v166_v44, %v167_v24  ;;  %v175_v58 = vmax.f32 %v173_v45, %v174_v52  ;;  %v182_v33 = vmax.f32 %v180_v46, %v181_v32 }
  0x21   :  { %v188_v59 = vrot.slane %v187_v53, 2  ;;  %v195_v60 = vrot.slane %v194_v54, 2  ;;  %v202_v61 = vrot.slane %v201_v55, 2  ;;  %v209_v62 = vrot.slane %v208_v56, 2 }
  0x22   :  { %v162_v63 = vrot.slane %v161_v57, 1  ;;  %v169_v0 = vrot.slane %v168_v25, 1  ;;  %v176_v1 = vrot.slane %v175_v58, 1  ;;  %v183_v2 = vrot.slane %v182_v33, 1 }
  0x23   :  { %v189_v3 = vmax.f32 %v187_v53, %v188_v59  ;;  %v196_v4 = vmax.f32 %v194_v54, %v195_v60  ;;  %v203_v5 = vmax.f32 %v201_v55, %v202_v61  ;;  %v210_v6 = vmax.f32 %v208_v56, %v209_v62 }
  0x24   :  { %v163_v7 = vmax.f32 %v161_v57, %v162_v63  ;;  %v170_v8 = vmax.f32 %v168_v25, %v169_v0  ;;  %v177_v9 = vmax.f32 %v175_v58, %v176_v1  ;;  %v184_v10 = vmax.f32 %v182_v33, %v183_v2 }
  0x25   :  { %v190_v11 = vrot.slane %v189_v3, 1  ;;  %v197_v12 = vrot.slane %v196_v4, 1  ;;  %v204_v13 = vrot.slane %v203_v5, 1  ;;  %v211_v19 = vrot.slane %v210_v6, 1 }
  0x26   :  { %v229_v20 = vcombine.low %v391_v14, %v393_v15  ;;  %v230_v21 = vcombine.low %v395_v16, %v397_v18  ;;  %v231_v26 = vcombine.low %v405_v35, %v142_v36  ;;  %v232_v27 = vcombine.low %v149_v37, %v156_v38 }
  0x27   :  { %v191_v28 = vmax.f32 %v189_v3, %v190_v11  ;;  %v198_v29 = vmax.f32 %v196_v4, %v197_v12  ;;  %v205_v34 = vmax.f32 %v203_v5, %v204_v13  ;;  %v212_v39 = vmax.f32 %v210_v6, %v211_v19 }
  0x28   :  { %v239_v40 = vrot.slane %v229_v20, %v365_v17  ;;  %v246_v41 = vrot.slane %v230_v21, %v365_v17  ;;  %v253_v42 = vrot.slane %v231_v26, %v365_v17  ;;  %v260_v43 = vrot.slane %v232_v27, %v365_v17 }
  0x29   :  { %v278_v22 = vcombine.low %v163_v7, %v170_v8  ;;  %v279_v14 = vcombine.low %v177_v9, %v184_v10  ;;  %v280_v15 = vcombine.low %v191_v28, %v198_v29  ;;  %v281_v23 = vcombine.low %v205_v34, %v212_v39 }
  0x2a   :  { %v261_v16 = vcombine.low %v239_v40, %v246_v41  ;;  %v262_v18 = vcombine.low %v253_v42, %v260_v43 }
  0x2b   :  { %v288_v35 = vrot.slane %v278_v22, %v365_v17  ;;  %v295_v36 = vrot.slane %v279_v14, %v365_v17  ;;  %v302_v37 = vrot.slane %v280_v15, %v365_v17  ;;  %v309_v38 = vrot.slane %v281_v23, %v365_v17 }
  0x2c   :  { %v269_v30 = vrot.slane %v261_v16, %v365_v17  ;;  %v276_v31 = vrot.slane %v262_v18, %v365_v17 }
  0x2d   :  { %v310_v44 = vcombine.low %v288_v35, %v295_v36  ;;  %v311_v45 = vcombine.low %v302_v37, %v309_v38 }
  0x2e   :  { %v277_v46 = vcombine.low %v269_v30, %v276_v31 }
  0x2f   :  { %v318_v47 = vrot.slane %v310_v44, %v365_v17  ;;  %v325_v48 = vrot.slane %v311_v45, %v365_v17 }
  0x30   :  { %329 = vst [vmem:[%s443_s1] sm:$0xff] %v277_v46 }
  0x31   :  { %v326_v49 = vcombine.low %v318_v47, %v325_v48 }
  0x33   :  { %330 = vst [vmem:[%s443_s1 + $0x8] sm:$0xff] %v326_v49 }

</bundles_post_ra>
